<compile_context>
chip_gen: v7x
topology: tpu7x:2x2x1
jax: 0.10.0
libtpu: 0.0.40
codegen_flags: <defaults>
</compile_context>

<pallas_src>
import functools
import math

import jax
import jax.numpy as jnp
from jax.experimental import pallas as pl
from jax.experimental.pallas import tpu as pltpu


# ----------------------------------------------------------------------------
# Pallas kernels
# ----------------------------------------------------------------------------

def _mm_bias_kernel(x_ref, w_ref, b_ref, o_ref, *, relu):
    """(TM, K) @ (K, N) on the MXU (bf16 operands, f32 accum) with fused bias (+ReLU)."""
    acc = jnp.dot(x_ref[...], w_ref[...], preferred_element_type=jnp.float32)
    acc = acc + b_ref[...]
    if relu:
        acc = jnp.maximum(acc, 0.0)
    o_ref[...] = acc.astype(o_ref.dtype)


def _diff_mm_bias_kernel(a_ref, b_ref, w_ref, bias_ref, o_ref):
    """Fused head: (a - b) @ [Wl | Wc] + bias. The subtract rides the VPU slots while the
    MXU is busy; no separate diff tensor ever hits HBM."""
    d = a_ref[...] - b_ref[...]          # bf16 subtract (v5e converts internally; trivial)
    acc = jnp.dot(d, w_ref[...], preferred_element_type=jnp.float32)
    acc = acc + bias_ref[...]
    o_ref[...] = acc.astype(o_ref.dtype)


# ----------------------------------------------------------------------------
# Matmul wrappers (full-extent K/N blocks -> no zero padding of K or N)
# ----------------------------------------------------------------------------

def _round_up(n, m):
    return ((n + m - 1) // m) * m


def _m_tiling(M):
    """Pick (TM, Mp, num_blocks): big blocks, grid of 1 for small stages, >=2 blocks on
    big stages so both v7x TensorCores get work on the 'parallel' M axis."""
    Mp = _round_up(M, 8)
    if Mp <= 512:
        return Mp, Mp, 1
    TM = min(1024, _round_up((Mp + 1) // 2, 8))
    Mp = _round_up(Mp, TM)
    return TM, Mp, Mp // TM


def _pad_rows(x, Mp):
    M = x.shape[0]
    if Mp == M:
        return x
    return jnp.pad(x, ((0, Mp - M), (0, 0)))


def conv_matmul(x, w, b, *, relu, out_dtype):
    """x: (M, K) bf16, w: (K, N) bf16, b: (1, N) f32  ->  (M, N) out_dtype."""
    M, K = x.shape
    N = w.shape[1]
    TM, Mp, steps = _m_tiling(M)
    xp = _pad_rows(x, Mp)
    out = pl.pallas_call(
        functools.partial(_mm_bias_kernel, relu=relu),
        out_shape=jax.ShapeDtypeStruct((Mp, N), out_dtype),
        grid_spec=pltpu.PrefetchScalarGridSpec(
            num_scalar_prefetch=0,
            grid=(steps,),
            in_specs=[
                pl.BlockSpec((TM, K), lambda i: (i, 0)),   # K = full extent (27/144/288)
                pl.BlockSpec((K, N), lambda i: (0, 0)),    # full weight, resident
                pl.BlockSpec((1, N), lambda i: (0, 0)),
            ],
            out_specs=pl.BlockSpec((TM, N), lambda i: (i, 0)),
        ),
        compiler_params=pltpu.CompilerParams(dimension_semantics=("parallel",)),
    )(xp, w, b)
    return out if Mp == M else out[:M]


def diff_head_matmul(a, b, w, bias):
    """a, b: (M, K) bf16 patches of cur/ref features; w: (K, N) bf16 fused [Wl|Wc]."""
    M, K = a.shape
    N = w.shape[1]
    TM, Mp, steps = _m_tiling(M)
    ap = _pad_rows(a, Mp)
    bp = _pad_rows(b, Mp)
    out = pl.pallas_call(
        _diff_mm_bias_kernel,
        out_shape=jax.ShapeDtypeStruct((Mp, N), jnp.float32),
        grid_spec=pltpu.PrefetchScalarGridSpec(
            num_scalar_prefetch=0,
            grid=(steps,),
            in_specs=[
                pl.BlockSpec((TM, K), lambda i: (i, 0)),
                pl.BlockSpec((TM, K), lambda i: (i, 0)),
                pl.BlockSpec((K, N), lambda i: (0, 0)),
                pl.BlockSpec((1, N), lambda i: (0, 0)),
            ],
            out_specs=pl.BlockSpec((TM, N), lambda i: (i, 0)),
        ),
        compiler_params=pltpu.CompilerParams(dimension_semantics=("parallel",)),
    )(ap, bp, w, bias)
    return out if Mp == M else out[:M]


# ----------------------------------------------------------------------------
# Conv / pool glue (plain JAX, fused by XLA under jit)
# ----------------------------------------------------------------------------

def im2col_3x3(x):
    """x: (N, H, W, C) -> (N*H*W, 9*C), 'same' padding, stride 1."""
    n, h, w, c = x.shape
    xp = jnp.pad(x, ((0, 0), (1, 1), (1, 1), (0, 0)))
    cols = []
    for i in range(3):
        for j in range(3):
            cols.append(xp[:, i:i + h, j:j + w, :])
    patches = jnp.concatenate(cols, axis=-1)           # (N, H, W, 9*C)
    return patches.reshape(n * h * w, 9 * c)


def conv3x3(x, wm, b, *, relu, out_dtype):
    """x: (N,H,W,Cin) bf16, wm: (9*Cin, Cout) bf16, b: (1, Cout) f32 -> (N,H,W,Cout)."""
    n, h, wd, cin = x.shape
    cout = wm.shape[1]
    patches = im2col_3x3(x)                            # (N*H*W, 9*Cin) bf16
    out = conv_matmul(patches, wm, b, relu=relu, out_dtype=out_dtype)
    return out.reshape(n, h, wd, cout)


def maxpool2(x):
    n, h, w, c = x.shape
    return x.reshape(n, h // 2, 2, w // 2, 2, c).max(axis=(2, 4))


# ----------------------------------------------------------------------------
# RefNet: params, priors, forward
# ----------------------------------------------------------------------------

BACKBONE_CH = [16, 32, 32, 32, 32]   # tiny VGG16-like stack, one conv+pool per stage
NAS = [3, 4, 3, 3, 3]                # anchors per location per head (as in __init__)
ASP_RATIOS = [0.5, 1.0, 2.0]
NC = 1


def init_params(key, in_ch=3):
    """Weights are stored already reshaped to (9*Cin, Cout) and cast to bf16; the two
    head convs of each scale are pre-fused along the output-channel axis."""
    params = {"convs": [], "heads": []}
    cin = in_ch
    for cout in BACKBONE_CH:
        key, k1 = jax.random.split(key)
        w = jax.random.normal(k1, (3, 3, cin, cout), jnp.float32) * 0.05
        wm = w.reshape(9 * cin, cout).astype(jnp.bfloat16)
        b = jnp.zeros((1, cout), jnp.float32)
        params["convs"].append((wm, b))
        cin = cout
    for k_idx, na in enumerate(NAS):
        c = BACKBONE_CH[k_idx]
        key, k1, k2 = jax.random.split(key, 3)
        wl = jax.random.normal(k1, (3, 3, c, na * 4), jnp.float32) * 0.05
        wc = jax.random.normal(k2, (3, 3, c, na * NC), jnp.float32) * 0.05
        w_head = jnp.concatenate([wl, wc], axis=-1)            # (3,3,c, na*4 + na*NC)
        w_head = w_head.reshape(9 * c, na * (4 + NC)).astype(jnp.bfloat16)
        b_head = jnp.zeros((1, na * (4 + NC)), jnp.float32)
        params["heads"].append((w_head, b_head))
    return params


def make_priors(feat_sizes, nas, asp_ratios):
    """SSD-style (cx, cy, w, h) priors, cell-major / anchor-minor ordering."""
    scales = [0.1, 0.25, 0.45, 0.65, 0.85, 1.0]
    all_boxes = []
    for k, (f, na) in enumerate(zip(feat_sizes, nas)):
        sk = scales[k]
        ars = [(sk * math.sqrt(ar), sk / math.sqrt(ar)) for ar in asp_ratios]
        if na > len(asp_ratios):
            skp = math.sqrt(sk * scales[k + 1])
            ars.append((skp, skp))
        ars = ars[:na]
        idx = (jnp.arange(f, dtype=jnp.float32) + 0.5) / f
        cy, cx = jnp.meshgrid(idx, idx, indexing="ij")
        centers = jnp.stack([cx.reshape(-1), cy.reshape(-1)], axis=-1)   # (f*f, 2)
        whs = jnp.array(ars, jnp.float32)                                # (na, 2)
        cxy = jnp.repeat(centers, na, axis=0)
        wh = jnp.tile(whs, (f * f, 1))
        all_boxes.append(jnp.concatenate([cxy, wh], axis=-1))
    return jnp.concatenate(all_boxes, axis=0)                            # (total_anchors, 4)


def backbone(x_nhwc, params):
    feats = []
    h = x_nhwc
    for (wm, b) in params["convs"]:
        h = conv3x3(h, wm, b, relu=True, out_dtype=jnp.bfloat16)
        h = maxpool2(h)
        feats.append(h)
    return feats


def refnet_forward(params, priors, x_cur, x_ref):
    """x_cur, x_ref: NCHW float32.  Returns (loc, conf, priors)."""
    xc = jnp.transpose(x_cur, (0, 2, 3, 1)).astype(jnp.bfloat16)   # -> NHWC, bf16 MXU path
    xr = jnp.transpose(x_ref, (0, 2, 3, 1)).astype(jnp.bfloat16)
    x = jnp.concatenate([xc, xr], axis=0)        # both branches share the backbone: 1 pass
    feats = backbone(x, params)
    n = x_cur.shape[0]

    locs, confs = [], []
    for k, na in enumerate(NAS):
        f = feats[k]
        fc, fr = f[:n], f[n:]
        w_head, b_head = params["heads"][k]
        pa = im2col_3x3(fc)
        pb = im2col_3x3(fr)
        out = diff_head_matmul(pa, pb, w_head, b_head)         # (n*hs*ws, na*(4+NC)) f32
        hs, ws = fc.shape[1], fc.shape[2]
        out = out.reshape(n, hs, ws, na * (4 + NC))
        loc = out[..., : na * 4].reshape(n, hs * ws * na, 4)
        conf = out[..., na * 4:].reshape(n, hs * ws * na, NC)
        locs.append(loc)
        confs.append(conf)
    return jnp.concatenate(locs, axis=1), jnp.concatenate(confs, axis=1), priors


# ----------------------------------------------------------------------------

if __name__ == "__main__":
    IMGSZ = 32
    BATCH = 2
    key = jax.random.PRNGKey(0)
    key, kp, kc, kr = jax.random.split(key, 4)

    params = init_params(kp, in_ch=3)
    feat_sizes = [IMGSZ // (2 ** (i + 1)) for i in range(len(BACKBONE_CH))]  # [16,8,4,2,1]
    priors = make_priors(feat_sizes, NAS, ASP_RATIOS)

    x_cur = jax.random.normal(kc, (BATCH, 3, IMGSZ, IMGSZ), jnp.float32)
    x_ref = jax.random.normal(kr, (BATCH, 3, IMGSZ, IMGSZ), jnp.float32)

    fwd = jax.jit(refnet_forward)
    loc, conf, pri = fwd(params, priors, x_cur, x_ref)
    jax.block_until_ready((loc, conf, pri))

    total_anchors = sum(f * f * na for f, na in zip(feat_sizes, NAS))
    assert loc.shape == (BATCH, total_anchors, 4), loc.shape
    assert conf.shape == (BATCH, total_anchors, NC), conf.shape
    assert pri.shape == (total_anchors, 4), pri.shape
    assert bool(jnp.isfinite(loc).all()) and bool(jnp.isfinite(conf).all())
    print("KERNEL_OK")
</pallas_src>

<mosaic_0001>
module attributes {stable_mosaic.version = 11 : i64} {
  func.func @_mm_bias_kernel(%arg0: i32, %arg1: memref<1024x27xbf16, #tpu.memory_space<vmem>>, %arg2: memref<27x16xbf16, #tpu.memory_space<vmem>>, %arg3: memref<1x16xf32, #tpu.memory_space<vmem>>, %arg4: memref<1024x16xbf16, #tpu.memory_space<vmem>>) attributes {dimension_semantics = [#tpu.dimension_semantics<parallel>], iteration_bounds = array<i64: 4>, scalar_prefetch = 0 : i64, scratch_operands = 0 : i64, tpu.core_type = #tpu.core_type<tc>, window_params = [{transform_indices = @transform_0, window_bounds = array<i64: 1024, 27>}, {pipeline_mode = #tpu.pipeline_mode<synchronous>, transform_indices = @transform_1, window_bounds = array<i64: 27, 16>}, {pipeline_mode = #tpu.pipeline_mode<synchronous>, transform_indices = @transform_2, window_bounds = array<i64: 1, 16>}, {transform_indices = @transform_3, window_bounds = array<i64: 1024, 16>}]} {
    %c0 = arith.constant 0 : index
    %c0_0 = arith.constant 0 : index
    %0 = vector.load %arg1[%c0, %c0_0] : memref<1024x27xbf16, #tpu.memory_space<vmem>>, vector<1024x27xbf16>
    %c0_1 = arith.constant 0 : index
    %c0_2 = arith.constant 0 : index
    %1 = vector.load %arg2[%c0_1, %c0_2] : memref<27x16xbf16, #tpu.memory_space<vmem>>, vector<27x16xbf16>
    %cst = arith.constant dense<0.000000e+00> : vector<1024x16xf32>
    %2 = tpu.matmul %0, %1, %cst {dimension_numbers = #tpu.dot_dimension_numbers<[1], [0], [0], [1], [0, 0, 1, 1], [], []>} : vector<1024x27xbf16>, vector<27x16xbf16>, vector<1024x16xf32> -> vector<1024x16xf32>
    %c0_3 = arith.constant 0 : index
    %c0_4 = arith.constant 0 : index
    %3 = vector.load %arg3[%c0_3, %c0_4] : memref<1x16xf32, #tpu.memory_space<vmem>>, vector<1x16xf32>
    %4 = vector.broadcast %3 : vector<1x16xf32> to vector<1024x16xf32>
    %5 = arith.addf %2, %4 : vector<1024x16xf32>
    %cst_5 = arith.constant 0.000000e+00 : f32
    %6 = vector.broadcast %cst_5 : f32 to vector<1024x16xf32>
    %7 = arith.maximumf %5, %6 : vector<1024x16xf32>
    %8 = arith.truncf %7 : vector<1024x16xf32> to vector<1024x16xbf16>
    %c0_6 = arith.constant 0 : index
    %c0_7 = arith.constant 0 : index
    %9 = vector.load %arg4[%c0_6, %c0_7] : memref<1024x16xbf16, #tpu.memory_space<vmem>>, vector<1024x16xbf16>
    tpu.vector_store %arg4[%c0_6, %c0_7], %8 {strides = array<i32>} : memref<1024x16xbf16, #tpu.memory_space<vmem>>, vector<1024x16xbf16>,
    return
  }
  func.func @transform_0(%arg0: i32) -> (i32, i32) {
    %c0_i32 = arith.constant 0 : i32
    %c0_i32_0 = arith.constant 0 : i32
    return %arg0, %c0_i32 : i32, i32
  }
  func.func @transform_1(%arg0: i32) -> (i32, i32) {
    %c0_i32 = arith.constant 0 : i32
    %c0_i32_0 = arith.constant 0 : i32
    %c0_i32_1 = arith.constant 0 : i32
    return %c0_i32, %c0_i32_0 : i32, i32
  }
  func.func @transform_2(%arg0: i32) -> (i32, i32) {
    %c0_i32 = arith.constant 0 : i32
    %c0_i32_0 = arith.constant 0 : i32
    %c0_i32_1 = arith.constant 0 : i32
    return %c0_i32, %c0_i32_0 : i32, i32
  }
  func.func @transform_3(%arg0: i32) -> (i32, i32) {
    %c0_i32 = arith.constant 0 : i32
    %c0_i32_0 = arith.constant 0 : i32
    return %arg0, %c0_i32 : i32, i32
  }
}

module attributes {stable_mosaic.version = 11 : i64} {
  func.func @_mm_bias_kernel(%arg0: i32, %arg1: memref<512x144xbf16, #tpu.memory_space<vmem>>, %arg2: memref<144x32xbf16, #tpu.memory_space<vmem>>, %arg3: memref<1x32xf32, #tpu.memory_space<vmem>>, %arg4: memref<512x32xbf16, #tpu.memory_space<vmem>>) attributes {dimension_semantics = [#tpu.dimension_semantics<parallel>], iteration_bounds = array<i64: 2>, scalar_prefetch = 0 : i64, scratch_operands = 0 : i64, tpu.core_type = #tpu.core_type<tc>, window_params = [{transform_indices = @transform_0, window_bounds = array<i64: 512, 144>}, {pipeline_mode = #tpu.pipeline_mode<synchronous>, transform_indices = @transform_1, window_bounds = array<i64: 144, 32>}, {pipeline_mode = #tpu.pipeline_mode<synchronous>, transform_indices = @transform_2, window_bounds = array<i64: 1, 32>}, {transform_indices = @transform_3, window_bounds = array<i64: 512, 32>}]} {
    %c0 = arith.constant 0 : index
    %c0_0 = arith.constant 0 : index
    %0 = vector.load %arg1[%c0, %c0_0] : memref<512x144xbf16, #tpu.memory_space<vmem>>, vector<512x144xbf16>
    %c0_1 = arith.constant 0 : index
    %c0_2 = arith.constant 0 : index
    %1 = vector.load %arg2[%c0_1, %c0_2] : memref<144x32xbf16, #tpu.memory_space<vmem>>, vector<144x32xbf16>
    %cst = arith.constant dense<0.000000e+00> : vector<512x32xf32>
    %2 = tpu.matmul %0, %1, %cst {dimension_numbers = #tpu.dot_dimension_numbers<[1], [0], [0], [1], [0, 0, 1, 1], [], []>} : vector<512x144xbf16>, vector<144x32xbf16>, vector<512x32xf32> -> vector<512x32xf32>
    %c0_3 = arith.constant 0 : index
    %c0_4 = arith.constant 0 : index
    %3 = vector.load %arg3[%c0_3, %c0_4] : memref<1x32xf32, #tpu.memory_space<vmem>>, vector<1x32xf32>
    %4 = vector.broadcast %3 : vector<1x32xf32> to vector<512x32xf32>
    %5 = arith.addf %2, %4 : vector<512x32xf32>
    %cst_5 = arith.constant 0.000000e+00 : f32
    %6 = vector.broadcast %cst_5 : f32 to vector<512x32xf32>
    %7 = arith.maximumf %5, %6 : vector<512x32xf32>
    %8 = arith.truncf %7 : vector<512x32xf32> to vector<512x32xbf16>
    %c0_6 = arith.constant 0 : index
    %c0_7 = arith.constant 0 : index
    %9 = vector.load %arg4[%c0_6, %c0_7] : memref<512x32xbf16, #tpu.memory_space<vmem>>, vector<512x32xbf16>
    tpu.vector_store %arg4[%c0_6, %c0_7], %8 {strides = array<i32>} : memref<512x32xbf16, #tpu.memory_space<vmem>>, vector<512x32xbf16>,
    return
  }
  func.func @transform_0(%arg0: i32) -> (i32, i32) {
    %c0_i32 = arith.constant 0 : i32
    %c0_i32_0 = arith.constant 0 : i32
    return %arg0, %c0_i32 : i32, i32
  }
  func.func @transform_1(%arg0: i32) -> (i32, i32) {
    %c0_i32 = arith.constant 0 : i32
    %c0_i32_0 = arith.constant 0 : i32
    %c0_i32_1 = arith.constant 0 : i32
    return %c0_i32, %c0_i32_0 : i32, i32
  }
  func.func @transform_2(%arg0: i32) -> (i32, i32) {
    %c0_i32 = arith.constant 0 : i32
    %c0_i32_0 = arith.constant 0 : i32
    %c0_i32_1 = arith.constant 0 : i32
    return %c0_i32, %c0_i32_0 : i32, i32
  }
  func.func @transform_3(%arg0: i32) -> (i32, i32) {
    %c0_i32 = arith.constant 0 : i32
    %c0_i32_0 = arith.constant 0 : i32
    return %arg0, %c0_i32 : i32, i32
  }
}

module attributes {stable_mosaic.version = 11 : i64} {
  func.func @_mm_bias_kernel(%arg0: i32, %arg1: memref<256x288xbf16, #tpu.memory_space<vmem>>, %arg2: memref<288x32xbf16, #tpu.memory_space<vmem>>, %arg3: memref<1x32xf32, #tpu.memory_space<vmem>>, %arg4: memref<256x32xbf16, #tpu.memory_space<vmem>>) attributes {dimension_semantics = [#tpu.dimension_semantics<parallel>], iteration_bounds = array<i64: 1>, scalar_prefetch = 0 : i64, scratch_operands = 0 : i64, tpu.core_type = #tpu.core_type<tc>, window_params = [{transform_indices = @transform_0, window_bounds = array<i64: 256, 288>}, {pipeline_mode = #tpu.pipeline_mode<synchronous>, transform_indices = @transform_1, window_bounds = array<i64: 288, 32>}, {pipeline_mode = #tpu.pipeline_mode<synchronous>, transform_indices = @transform_2, window_bounds = array<i64: 1, 32>}, {transform_indices = @transform_3, window_bounds = array<i64: 256, 32>}]} {
    %c0 = arith.constant 0 : index
    %c0_0 = arith.constant 0 : index
    %0 = vector.load %arg1[%c0, %c0_0] : memref<256x288xbf16, #tpu.memory_space<vmem>>, vector<256x288xbf16>
    %c0_1 = arith.constant 0 : index
    %c0_2 = arith.constant 0 : index
    %1 = vector.load %arg2[%c0_1, %c0_2] : memref<288x32xbf16, #tpu.memory_space<vmem>>, vector<288x32xbf16>
    %cst = arith.constant dense<0.000000e+00> : vector<256x32xf32>
    %2 = tpu.matmul %0, %1, %cst {dimension_numbers = #tpu.dot_dimension_numbers<[1], [0], [0], [1], [0, 0, 1, 1], [], []>} : vector<256x288xbf16>, vector<288x32xbf16>, vector<256x32xf32> -> vector<256x32xf32>
    %c0_3 = arith.constant 0 : index
    %c0_4 = arith.constant 0 : index
    %3 = vector.load %arg3[%c0_3, %c0_4] : memref<1x32xf32, #tpu.memory_space<vmem>>, vector<1x32xf32>
    %4 = vector.broadcast %3 : vector<1x32xf32> to vector<256x32xf32>
    %5 = arith.addf %2, %4 : vector<256x32xf32>
    %cst_5 = arith.constant 0.000000e+00 : f32
    %6 = vector.broadcast %cst_5 : f32 to vector<256x32xf32>
    %7 = arith.maximumf %5, %6 : vector<256x32xf32>
    %8 = arith.truncf %7 : vector<256x32xf32> to vector<256x32xbf16>
    %c0_6 = arith.constant 0 : index
    %c0_7 = arith.constant 0 : index
    %9 = vector.load %arg4[%c0_6, %c0_7] : memref<256x32xbf16, #tpu.memory_space<vmem>>, vector<256x32xbf16>
    tpu.vector_store %arg4[%c0_6, %c0_7], %8 {strides = array<i32>} : memref<256x32xbf16, #tpu.memory_space<vmem>>, vector<256x32xbf16>,
    return
  }
  func.func @transform_0(%arg0: i32) -> (i32, i32) {
    %c0_i32 = arith.constant 0 : i32
    %c0_i32_0 = arith.constant 0 : i32
    return %arg0, %c0_i32 : i32, i32
  }
  func.func @transform_1(%arg0: i32) -> (i32, i32) {
    %c0_i32 = arith.constant 0 : i32
    %c0_i32_0 = arith.constant 0 : i32
    %c0_i32_1 = arith.constant 0 : i32
    return %c0_i32, %c0_i32_0 : i32, i32
  }
  func.func @transform_2(%arg0: i32) -> (i32, i32) {
    %c0_i32 = arith.constant 0 : i32
    %c0_i32_0 = arith.constant 0 : i32
    %c0_i32_1 = arith.constant 0 : i32
    return %c0_i32, %c0_i32_0 : i32, i32
  }
  func.func @transform_3(%arg0: i32) -> (i32, i32) {
    %c0_i32 = arith.constant 0 : i32
    %c0_i32_0 = arith.constant 0 : i32
    return %arg0, %c0_i32 : i32, i32
  }
}

module attributes {stable_mosaic.version = 11 : i64} {
  func.func @_mm_bias_kernel(%arg0: i32, %arg1: memref<64x288xbf16, #tpu.memory_space<vmem>>, %arg2: memref<288x32xbf16, #tpu.memory_space<vmem>>, %arg3: memref<1x32xf32, #tpu.memory_space<vmem>>, %arg4: memref<64x32xbf16, #tpu.memory_space<vmem>>) attributes {dimension_semantics = [#tpu.dimension_semantics<parallel>], iteration_bounds = array<i64: 1>, scalar_prefetch = 0 : i64, scratch_operands = 0 : i64, tpu.core_type = #tpu.core_type<tc>, window_params = [{transform_indices = @transform_0, window_bounds = array<i64: 64, 288>}, {pipeline_mode = #tpu.pipeline_mode<synchronous>, transform_indices = @transform_1, window_bounds = array<i64: 288, 32>}, {pipeline_mode = #tpu.pipeline_mode<synchronous>, transform_indices = @transform_2, window_bounds = array<i64: 1, 32>}, {transform_indices = @transform_3, window_bounds = array<i64: 64, 32>}]} {
    %c0 = arith.constant 0 : index
    %c0_0 = arith.constant 0 : index
    %0 = vector.load %arg1[%c0, %c0_0] : memref<64x288xbf16, #tpu.memory_space<vmem>>, vector<64x288xbf16>
    %c0_1 = arith.constant 0 : index
    %c0_2 = arith.constant 0 : index
    %1 = vector.load %arg2[%c0_1, %c0_2] : memref<288x32xbf16, #tpu.memory_space<vmem>>, vector<288x32xbf16>
    %cst = arith.constant dense<0.000000e+00> : vector<64x32xf32>
    %2 = tpu.matmul %0, %1, %cst {dimension_numbers = #tpu.dot_dimension_numbers<[1], [0], [0], [1], [0, 0, 1, 1], [], []>} : vector<64x288xbf16>, vector<288x32xbf16>, vector<64x32xf32> -> vector<64x32xf32>
    %c0_3 = arith.constant 0 : index
    %c0_4 = arith.constant 0 : index
    %3 = vector.load %arg3[%c0_3, %c0_4] : memref<1x32xf32, #tpu.memory_space<vmem>>, vector<1x32xf32>
    %4 = vector.broadcast %3 : vector<1x32xf32> to vector<64x32xf32>
    %5 = arith.addf %2, %4 : vector<64x32xf32>
    %cst_5 = arith.constant 0.000000e+00 : f32
    %6 = vector.broadcast %cst_5 : f32 to vector<64x32xf32>
    %7 = arith.maximumf %5, %6 : vector<64x32xf32>
    %8 = arith.truncf %7 : vector<64x32xf32> to vector<64x32xbf16>
    %c0_6 = arith.constant 0 : index
    %c0_7 = arith.constant 0 : index
    %9 = vector.load %arg4[%c0_6, %c0_7] : memref<64x32xbf16, #tpu.memory_space<vmem>>, vector<64x32xbf16>
    tpu.vector_store %arg4[%c0_6, %c0_7], %8 {strides = array<i32>} : memref<64x32xbf16, #tpu.memory_space<vmem>>, vector<64x32xbf16>,
    return
  }
  func.func @transform_0(%arg0: i32) -> (i32, i32) {
    %c0_i32 = arith.constant 0 : i32
    %c0_i32_0 = arith.constant 0 : i32
    return %arg0, %c0_i32 : i32, i32
  }
  func.func @transform_1(%arg0: i32) -> (i32, i32) {
    %c0_i32 = arith.constant 0 : i32
    %c0_i32_0 = arith.constant 0 : i32
    %c0_i32_1 = arith.constant 0 : i32
    return %c0_i32, %c0_i32_0 : i32, i32
  }
  func.func @transform_2(%arg0: i32) -> (i32, i32) {
    %c0_i32 = arith.constant 0 : i32
    %c0_i32_0 = arith.constant 0 : i32
    %c0_i32_1 = arith.constant 0 : i32
    return %c0_i32, %c0_i32_0 : i32, i32
  }
  func.func @transform_3(%arg0: i32) -> (i32, i32) {
    %c0_i32 = arith.constant 0 : i32
    %c0_i32_0 = arith.constant 0 : i32
    return %arg0, %c0_i32 : i32, i32
  }
}

module attributes {stable_mosaic.version = 11 : i64} {
  func.func @_mm_bias_kernel(%arg0: i32, %arg1: memref<16x288xbf16, #tpu.memory_space<vmem>>, %arg2: memref<288x32xbf16, #tpu.memory_space<vmem>>, %arg3: memref<1x32xf32, #tpu.memory_space<vmem>>, %arg4: memref<16x32xbf16, #tpu.memory_space<vmem>>) attributes {dimension_semantics = [#tpu.dimension_semantics<parallel>], iteration_bounds = array<i64: 1>, scalar_prefetch = 0 : i64, scratch_operands = 0 : i64, tpu.core_type = #tpu.core_type<tc>, window_params = [{transform_indices = @transform_0, window_bounds = array<i64: 16, 288>}, {pipeline_mode = #tpu.pipeline_mode<synchronous>, transform_indices = @transform_1, window_bounds = array<i64: 288, 32>}, {pipeline_mode = #tpu.pipeline_mode<synchronous>, transform_indices = @transform_2, window_bounds = array<i64: 1, 32>}, {transform_indices = @transform_3, window_bounds = array<i64: 16, 32>}]} {
    %c0 = arith.constant 0 : index
    %c0_0 = arith.constant 0 : index
    %0 = vector.load %arg1[%c0, %c0_0] : memref<16x288xbf16, #tpu.memory_space<vmem>>, vector<16x288xbf16>
    %c0_1 = arith.constant 0 : index
    %c0_2 = arith.constant 0 : index
    %1 = vector.load %arg2[%c0_1, %c0_2] : memref<288x32xbf16, #tpu.memory_space<vmem>>, vector<288x32xbf16>
    %cst = arith.constant dense<0.000000e+00> : vector<16x32xf32>
    %2 = tpu.matmul %0, %1, %cst {dimension_numbers = #tpu.dot_dimension_numbers<[1], [0], [0], [1], [0, 0, 1, 1], [], []>} : vector<16x288xbf16>, vector<288x32xbf16>, vector<16x32xf32> -> vector<16x32xf32>
    %c0_3 = arith.constant 0 : index
    %c0_4 = arith.constant 0 : index
    %3 = vector.load %arg3[%c0_3, %c0_4] : memref<1x32xf32, #tpu.memory_space<vmem>>, vector<1x32xf32>
    %4 = vector.broadcast %3 : vector<1x32xf32> to vector<16x32xf32>
    %5 = arith.addf %2, %4 : vector<16x32xf32>
    %cst_5 = arith.constant 0.000000e+00 : f32
    %6 = vector.broadcast %cst_5 : f32 to vector<16x32xf32>
    %7 = arith.maximumf %5, %6 : vector<16x32xf32>
    %8 = arith.truncf %7 : vector<16x32xf32> to vector<16x32xbf16>
    %c0_6 = arith.constant 0 : index
    %c0_7 = arith.constant 0 : index
    %9 = vector.load %arg4[%c0_6, %c0_7] : memref<16x32xbf16, #tpu.memory_space<vmem>>, vector<16x32xbf16>
    tpu.vector_store %arg4[%c0_6, %c0_7], %8 {strides = array<i32>} : memref<16x32xbf16, #tpu.memory_space<vmem>>, vector<16x32xbf16>,
    return
  }
  func.func @transform_0(%arg0: i32) -> (i32, i32) {
    %c0_i32 = arith.constant 0 : i32
    %c0_i32_0 = arith.constant 0 : i32
    return %arg0, %c0_i32 : i32, i32
  }
  func.func @transform_1(%arg0: i32) -> (i32, i32) {
    %c0_i32 = arith.constant 0 : i32
    %c0_i32_0 = arith.constant 0 : i32
    %c0_i32_1 = arith.constant 0 : i32
    return %c0_i32, %c0_i32_0 : i32, i32
  }
  func.func @transform_2(%arg0: i32) -> (i32, i32) {
    %c0_i32 = arith.constant 0 : i32
    %c0_i32_0 = arith.constant 0 : i32
    %c0_i32_1 = arith.constant 0 : i32
    return %c0_i32, %c0_i32_0 : i32, i32
  }
  func.func @transform_3(%arg0: i32) -> (i32, i32) {
    %c0_i32 = arith.constant 0 : i32
    %c0_i32_0 = arith.constant 0 : i32
    return %arg0, %c0_i32 : i32, i32
  }
}

module attributes {stable_mosaic.version = 11 : i64} {
  func.func @_diff_mm_bias_kernel(%arg0: i32, %arg1: memref<8x288xbf16, #tpu.memory_space<vmem>>, %arg2: memref<8x288xbf16, #tpu.memory_space<vmem>>, %arg3: memref<288x15xbf16, #tpu.memory_space<vmem>>, %arg4: memref<1x15xf32, #tpu.memory_space<vmem>>, %arg5: memref<8x15xf32, #tpu.memory_space<vmem>>) attributes {dimension_semantics = [#tpu.dimension_semantics<parallel>], iteration_bounds = array<i64: 1>, scalar_prefetch = 0 : i64, scratch_operands = 0 : i64, tpu.core_type = #tpu.core_type<tc>, window_params = [{transform_indices = @transform_0, window_bounds = array<i64: 8, 288>}, {transform_indices = @transform_1, window_bounds = array<i64: 8, 288>}, {pipeline_mode = #tpu.pipeline_mode<synchronous>, transform_indices = @transform_2, window_bounds = array<i64: 288, 15>}, {pipeline_mode = #tpu.pipeline_mode<synchronous>, transform_indices = @transform_3, window_bounds = array<i64: 1, 15>}, {transform_indices = @transform_4, window_bounds = array<i64: 8, 15>}]} {
    %c0 = arith.constant 0 : index
    %c0_0 = arith.constant 0 : index
    %0 = vector.load %arg1[%c0, %c0_0] : memref<8x288xbf16, #tpu.memory_space<vmem>>, vector<8x288xbf16>
    %c0_1 = arith.constant 0 : index
    %c0_2 = arith.constant 0 : index
    %1 = vector.load %arg2[%c0_1, %c0_2] : memref<8x288xbf16, #tpu.memory_space<vmem>>, vector<8x288xbf16>
    %2 = arith.subf %0, %1 : vector<8x288xbf16>
    %c0_3 = arith.constant 0 : index
    %c0_4 = arith.constant 0 : index
    %3 = vector.load %arg3[%c0_3, %c0_4] : memref<288x15xbf16, #tpu.memory_space<vmem>>, vector<288x15xbf16>
    %cst = arith.constant dense<0.000000e+00> : vector<8x15xf32>
    %4 = tpu.matmul %2, %3, %cst {dimension_numbers = #tpu.dot_dimension_numbers<[1], [0], [0], [1], [0, 0, 1, 1], [], []>} : vector<8x288xbf16>, vector<288x15xbf16>, vector<8x15xf32> -> vector<8x15xf32>
    %c0_5 = arith.constant 0 : index
    %c0_6 = arith.constant 0 : index
    %5 = vector.load %arg4[%c0_5, %c0_6] : memref<1x15xf32, #tpu.memory_space<vmem>>, vector<1x15xf32>
    %6 = vector.broadcast %5 : vector<1x15xf32> to vector<8x15xf32>
    %7 = arith.addf %4, %6 : vector<8x15xf32>
    %c0_7 = arith.constant 0 : index
    %c0_8 = arith.constant 0 : index
    %8 = vector.load %arg5[%c0_7, %c0_8] : memref<8x15xf32, #tpu.memory_space<vmem>>, vector<8x15xf32>
    tpu.vector_store %arg5[%c0_7, %c0_8], %7 {strides = array<i32>} : memref<8x15xf32, #tpu.memory_space<vmem>>, vector<8x15xf32>,
    return
  }
  func.func @transform_0(%arg0: i32) -> (i32, i32) {
    %c0_i32 = arith.constant 0 : i32
    %c0_i32_0 = arith.constant 0 : i32
    return %arg0, %c0_i32 : i32, i32
  }
  func.func @transform_1(%arg0: i32) -> (i32, i32) {
    %c0_i32 = arith.constant 0 : i32
    %c0_i32_0 = arith.constant 0 : i32
    return %arg0, %c0_i32 : i32, i32
  }
  func.func @transform_2(%arg0: i32) -> (i32, i32) {
    %c0_i32 = arith.constant 0 : i32
    %c0_i32_0 = arith.constant 0 : i32
    %c0_i32_1 = arith.constant 0 : i32
    return %c0_i32, %c0_i32_0 : i32, i32
  }
  func.func @transform_3(%arg0: i32) -> (i32, i32) {
    %c0_i32 = arith.constant 0 : i32
    %c0_i32_0 = arith.constant 0 : i32
    %c0_i32_1 = arith.constant 0 : i32
    return %c0_i32, %c0_i32_0 : i32, i32
  }
  func.func @transform_4(%arg0: i32) -> (i32, i32) {
    %c0_i32 = arith.constant 0 : i32
    %c0_i32_0 = arith.constant 0 : i32
    return %arg0, %c0_i32 : i32, i32
  }
}

module attributes {stable_mosaic.version = 11 : i64} {
  func.func @_diff_mm_bias_kernel(%arg0: i32, %arg1: memref<32x288xbf16, #tpu.memory_space<vmem>>, %arg2: memref<32x288xbf16, #tpu.memory_space<vmem>>, %arg3: memref<288x15xbf16, #tpu.memory_space<vmem>>, %arg4: memref<1x15xf32, #tpu.memory_space<vmem>>, %arg5: memref<32x15xf32, #tpu.memory_space<vmem>>) attributes {dimension_semantics = [#tpu.dimension_semantics<parallel>], iteration_bounds = array<i64: 1>, scalar_prefetch = 0 : i64, scratch_operands = 0 : i64, tpu.core_type = #tpu.core_type<tc>, window_params = [{transform_indices = @transform_0, window_bounds = array<i64: 32, 288>}, {transform_indices = @transform_1, window_bounds = array<i64: 32, 288>}, {pipeline_mode = #tpu.pipeline_mode<synchronous>, transform_indices = @transform_2, window_bounds = array<i64: 288, 15>}, {pipeline_mode = #tpu.pipeline_mode<synchronous>, transform_indices = @transform_3, window_bounds = array<i64: 1, 15>}, {transform_indices = @transform_4, window_bounds = array<i64: 32, 15>}]} {
    %c0 = arith.constant 0 : index
    %c0_0 = arith.constant 0 : index
    %0 = vector.load %arg1[%c0, %c0_0] : memref<32x288xbf16, #tpu.memory_space<vmem>>, vector<32x288xbf16>
    %c0_1 = arith.constant 0 : index
    %c0_2 = arith.constant 0 : index
    %1 = vector.load %arg2[%c0_1, %c0_2] : memref<32x288xbf16, #tpu.memory_space<vmem>>, vector<32x288xbf16>
    %2 = arith.subf %0, %1 : vector<32x288xbf16>
    %c0_3 = arith.constant 0 : index
    %c0_4 = arith.constant 0 : index
    %3 = vector.load %arg3[%c0_3, %c0_4] : memref<288x15xbf16, #tpu.memory_space<vmem>>, vector<288x15xbf16>
    %cst = arith.constant dense<0.000000e+00> : vector<32x15xf32>
    %4 = tpu.matmul %2, %3, %cst {dimension_numbers = #tpu.dot_dimension_numbers<[1], [0], [0], [1], [0, 0, 1, 1], [], []>} : vector<32x288xbf16>, vector<288x15xbf16>, vector<32x15xf32> -> vector<32x15xf32>
    %c0_5 = arith.constant 0 : index
    %c0_6 = arith.constant 0 : index
    %5 = vector.load %arg4[%c0_5, %c0_6] : memref<1x15xf32, #tpu.memory_space<vmem>>, vector<1x15xf32>
    %6 = vector.broadcast %5 : vector<1x15xf32> to vector<32x15xf32>
    %7 = arith.addf %4, %6 : vector<32x15xf32>
    %c0_7 = arith.constant 0 : index
    %c0_8 = arith.constant 0 : index
    %8 = vector.load %arg5[%c0_7, %c0_8] : memref<32x15xf32, #tpu.memory_space<vmem>>, vector<32x15xf32>
    tpu.vector_store %arg5[%c0_7, %c0_8], %7 {strides = array<i32>} : memref<32x15xf32, #tpu.memory_space<vmem>>, vector<32x15xf32>,
    return
  }
  func.func @transform_0(%arg0: i32) -> (i32, i32) {
    %c0_i32 = arith.constant 0 : i32
    %c0_i32_0 = arith.constant 0 : i32
    return %arg0, %c0_i32 : i32, i32
  }
  func.func @transform_1(%arg0: i32) -> (i32, i32) {
    %c0_i32 = arith.constant 0 : i32
    %c0_i32_0 = arith.constant 0 : i32
    return %arg0, %c0_i32 : i32, i32
  }
  func.func @transform_2(%arg0: i32) -> (i32, i32) {
    %c0_i32 = arith.constant 0 : i32
    %c0_i32_0 = arith.constant 0 : i32
    %c0_i32_1 = arith.constant 0 : i32
    return %c0_i32, %c0_i32_0 : i32, i32
  }
  func.func @transform_3(%arg0: i32) -> (i32, i32) {
    %c0_i32 = arith.constant 0 : i32
    %c0_i32_0 = arith.constant 0 : i32
    %c0_i32_1 = arith.constant 0 : i32
    return %c0_i32, %c0_i32_0 : i32, i32
  }
  func.func @transform_4(%arg0: i32) -> (i32, i32) {
    %c0_i32 = arith.constant 0 : i32
    %c0_i32_0 = arith.constant 0 : i32
    return %arg0, %c0_i32 : i32, i32
  }
}

module attributes {stable_mosaic.version = 11 : i64} {
  func.func @_diff_mm_bias_kernel(%arg0: i32, %arg1: memref<128x288xbf16, #tpu.memory_space<vmem>>, %arg2: memref<128x288xbf16, #tpu.memory_space<vmem>>, %arg3: memref<288x20xbf16, #tpu.memory_space<vmem>>, %arg4: memref<1x20xf32, #tpu.memory_space<vmem>>, %arg5: memref<128x20xf32, #tpu.memory_space<vmem>>) attributes {dimension_semantics = [#tpu.dimension_semantics<parallel>], iteration_bounds = array<i64: 1>, scalar_prefetch = 0 : i64, scratch_operands = 0 : i64, tpu.core_type = #tpu.core_type<tc>, window_params = [{transform_indices = @transform_0, window_bounds = array<i64: 128, 288>}, {transform_indices = @transform_1, window_bounds = array<i64: 128, 288>}, {pipeline_mode = #tpu.pipeline_mode<synchronous>, transform_indices = @transform_2, window_bounds = array<i64: 288, 20>}, {pipeline_mode = #tpu.pipeline_mode<synchronous>, transform_indices = @transform_3, window_bounds = array<i64: 1, 20>}, {transform_indices = @transform_4, window_bounds = array<i64: 128, 20>}]} {
    %c0 = arith.constant 0 : index
    %c0_0 = arith.constant 0 : index
    %0 = vector.load %arg1[%c0, %c0_0] : memref<128x288xbf16, #tpu.memory_space<vmem>>, vector<128x288xbf16>
    %c0_1 = arith.constant 0 : index
    %c0_2 = arith.constant 0 : index
    %1 = vector.load %arg2[%c0_1, %c0_2] : memref<128x288xbf16, #tpu.memory_space<vmem>>, vector<128x288xbf16>
    %2 = arith.subf %0, %1 : vector<128x288xbf16>
    %c0_3 = arith.constant 0 : index
    %c0_4 = arith.constant 0 : index
    %3 = vector.load %arg3[%c0_3, %c0_4] : memref<288x20xbf16, #tpu.memory_space<vmem>>, vector<288x20xbf16>
    %cst = arith.constant dense<0.000000e+00> : vector<128x20xf32>
    %4 = tpu.matmul %2, %3, %cst {dimension_numbers = #tpu.dot_dimension_numbers<[1], [0], [0], [1], [0, 0, 1, 1], [], []>} : vector<128x288xbf16>, vector<288x20xbf16>, vector<128x20xf32> -> vector<128x20xf32>
    %c0_5 = arith.constant 0 : index
    %c0_6 = arith.constant 0 : index
    %5 = vector.load %arg4[%c0_5, %c0_6] : memref<1x20xf32, #tpu.memory_space<vmem>>, vector<1x20xf32>
    %6 = vector.broadcast %5 : vector<1x20xf32> to vector<128x20xf32>
    %7 = arith.addf %4, %6 : vector<128x20xf32>
    %c0_7 = arith.constant 0 : index
    %c0_8 = arith.constant 0 : index
    %8 = vector.load %arg5[%c0_7, %c0_8] : memref<128x20xf32, #tpu.memory_space<vmem>>, vector<128x20xf32>
    tpu.vector_store %arg5[%c0_7, %c0_8], %7 {strides = array<i32>} : memref<128x20xf32, #tpu.memory_space<vmem>>, vector<128x20xf32>,
    return
  }
  func.func @transform_0(%arg0: i32) -> (i32, i32) {
    %c0_i32 = arith.constant 0 : i32
    %c0_i32_0 = arith.constant 0 : i32
    return %arg0, %c0_i32 : i32, i32
  }
  func.func @transform_1(%arg0: i32) -> (i32, i32) {
    %c0_i32 = arith.constant 0 : i32
    %c0_i32_0 = arith.constant 0 : i32
    return %arg0, %c0_i32 : i32, i32
  }
  func.func @transform_2(%arg0: i32) -> (i32, i32) {
    %c0_i32 = arith.constant 0 : i32
    %c0_i32_0 = arith.constant 0 : i32
    %c0_i32_1 = arith.constant 0 : i32
    return %c0_i32, %c0_i32_0 : i32, i32
  }
  func.func @transform_3(%arg0: i32) -> (i32, i32) {
    %c0_i32 = arith.constant 0 : i32
    %c0_i32_0 = arith.constant 0 : i32
    %c0_i32_1 = arith.constant 0 : i32
    return %c0_i32, %c0_i32_0 : i32, i32
  }
  func.func @transform_4(%arg0: i32) -> (i32, i32) {
    %c0_i32 = arith.constant 0 : i32
    %c0_i32_0 = arith.constant 0 : i32
    return %arg0, %c0_i32 : i32, i32
  }
}

module attributes {stable_mosaic.version = 11 : i64} {
  func.func @_diff_mm_bias_kernel(%arg0: i32, %arg1: memref<512x144xbf16, #tpu.memory_space<vmem>>, %arg2: memref<512x144xbf16, #tpu.memory_space<vmem>>, %arg3: memref<144x15xbf16, #tpu.memory_space<vmem>>, %arg4: memref<1x15xf32, #tpu.memory_space<vmem>>, %arg5: memref<512x15xf32, #tpu.memory_space<vmem>>) attributes {dimension_semantics = [#tpu.dimension_semantics<parallel>], iteration_bounds = array<i64: 1>, scalar_prefetch = 0 : i64, scratch_operands = 0 : i64, tpu.core_type = #tpu.core_type<tc>, window_params = [{transform_indices = @transform_0, window_bounds = array<i64: 512, 144>}, {transform_indices = @transform_1, window_bounds = array<i64: 512, 144>}, {pipeline_mode = #tpu.pipeline_mode<synchronous>, transform_indices = @transform_2, window_bounds = array<i64: 144, 15>}, {pipeline_mode = #tpu.pipeline_mode<synchronous>, transform_indices = @transform_3, window_bounds = array<i64: 1, 15>}, {transform_indices = @transform_4, window_bounds = array<i64: 512, 15>}]} {
    %c0 = arith.constant 0 : index
    %c0_0 = arith.constant 0 : index
    %0 = vector.load %arg1[%c0, %c0_0] : memref<512x144xbf16, #tpu.memory_space<vmem>>, vector<512x144xbf16>
    %c0_1 = arith.constant 0 : index
    %c0_2 = arith.constant 0 : index
    %1 = vector.load %arg2[%c0_1, %c0_2] : memref<512x144xbf16, #tpu.memory_space<vmem>>, vector<512x144xbf16>
    %2 = arith.subf %0, %1 : vector<512x144xbf16>
    %c0_3 = arith.constant 0 : index
    %c0_4 = arith.constant 0 : index
    %3 = vector.load %arg3[%c0_3, %c0_4] : memref<144x15xbf16, #tpu.memory_space<vmem>>, vector<144x15xbf16>
    %cst = arith.constant dense<0.000000e+00> : vector<512x15xf32>
    %4 = tpu.matmul %2, %3, %cst {dimension_numbers = #tpu.dot_dimension_numbers<[1], [0], [0], [1], [0, 0, 1, 1], [], []>} : vector<512x144xbf16>, vector<144x15xbf16>, vector<512x15xf32> -> vector<512x15xf32>
    %c0_5 = arith.constant 0 : index
    %c0_6 = arith.constant 0 : index
    %5 = vector.load %arg4[%c0_5, %c0_6] : memref<1x15xf32, #tpu.memory_space<vmem>>, vector<1x15xf32>
    %6 = vector.broadcast %5 : vector<1x15xf32> to vector<512x15xf32>
    %7 = arith.addf %4, %6 : vector<512x15xf32>
    %c0_7 = arith.constant 0 : index
    %c0_8 = arith.constant 0 : index
    %8 = vector.load %arg5[%c0_7, %c0_8] : memref<512x15xf32, #tpu.memory_space<vmem>>, vector<512x15xf32>
    tpu.vector_store %arg5[%c0_7, %c0_8], %7 {strides = array<i32>} : memref<512x15xf32, #tpu.memory_space<vmem>>, vector<512x15xf32>,
    return
  }
  func.func @transform_0(%arg0: i32) -> (i32, i32) {
    %c0_i32 = arith.constant 0 : i32
    %c0_i32_0 = arith.constant 0 : i32
    return %arg0, %c0_i32 : i32, i32
  }
  func.func @transform_1(%arg0: i32) -> (i32, i32) {
    %c0_i32 = arith.constant 0 : i32
    %c0_i32_0 = arith.constant 0 : i32
    return %arg0, %c0_i32 : i32, i32
  }
  func.func @transform_2(%arg0: i32) -> (i32, i32) {
    %c0_i32 = arith.constant 0 : i32
    %c0_i32_0 = arith.constant 0 : i32
    %c0_i32_1 = arith.constant 0 : i32
    return %c0_i32, %c0_i32_0 : i32, i32
  }
  func.func @transform_3(%arg0: i32) -> (i32, i32) {
    %c0_i32 = arith.constant 0 : i32
    %c0_i32_0 = arith.constant 0 : i32
    %c0_i32_1 = arith.constant 0 : i32
    return %c0_i32, %c0_i32_0 : i32, i32
  }
  func.func @transform_4(%arg0: i32) -> (i32, i32) {
    %c0_i32 = arith.constant 0 : i32
    %c0_i32_0 = arith.constant 0 : i32
    return %arg0, %c0_i32 : i32, i32
  }
}

</mosaic_0001>

<bundles_post_ra>
// kernel: refnet_forward.10
= control target key start
LH: loop header
LB: loop body
LE: loop exit
PB: predicated region body
PF: predicated region fallthrough
CT: control target
= control target key end

     0   :  { %s2920_s12 = smov 0   ;;  %s3476_s0 = inlined_call_operand.vmem [shape: bf16[4096,27], index: 0, kind: input, shape index: {}]   ;;  %s3477_s1 = inlined_call_operand.vmem [shape: bf16[27,16], index: 1, kind: input, shape index: {}]   ;;  %s3478_s2 = inlined_call_operand.vmem [shape: f32[1,16], index: 2, kind: input, shape index: {}]   ;;  %s3479_s3 = inlined_call_operand.vmem [shape: bf16[4096,16], index: 3, kind: output, shape index: {}]  }
   0x1 LB: > { %s2215_s13 = sadd.s32 4294967295, %s2897_s12   ;;  %p2219_p0 = scmp.ge.s32.totalorder %s2897_s12, 1  ;;  %s2897_s12 = sphi %s2920_s12, %s13_s12  }
   0x2   : > { %p138_p1 = scmp.lt.s32.totalorder %s2897_s12, 5 }
   0x4   : > { %p139_p2 = pnand %p2219_p0, %p138_p1 }
   0x5   : > { %v2824_v0 = vld [vmem:[%s3477_s1] sm:$0xff] (!%p139_p2)   ;;  %vm838_vm0 = vcmask (!%p139_p2), 1044480   ;;  %v2825_v1 = vld [vmem:[%s3477_s1 + $0x8] sm:$0x3f] (!%p139_p2)   ;;  %vm839_vm1 = vcmask (!%p139_p2), 1045504   ;;  %s2220_s18 = sshll.u32 (!%p139_p2), %s2215_s13, 7 }
   0x6   : > { %142 = sbr.rel (%p139_p2) target bundleno = 361 (0x169), region = 32  ;;  %2679 = vmatprep.subr.bf16.mxu0 (!%p139_p2), %v2824_v0  ;;  %2811 = vmatprep.subr.bf16.mxu1 (!%p139_p2), %v2824_v0  ;;  %v2899_v2 = vmov (!%p139_p2), 65535   ;;  %p163_p3 = scmp.lt.s32.totalorder (!%p139_p2), %s2220_s18, 511  ;;  %vm645_vm2 = vcmask (!%p139_p2), 220160   ;;  %vm2030_vm3 = vcmask (!%p139_p2), 125952  }
   0x7   : > { %2680 = vmatpush3.bf16.msra.mxu0 (!%p139_p2), %v2824_v0  ;;  %2813 = vmatpush3.bf16.msra.mxu1 (!%p139_p2), %v2824_v0  ;;  %v840_v3 = vsel (!%p139_p2), %vm838_vm0, 4294967295, %v2899_v2 }
   0x8   : > { %v841_v4 = vsel (!%p139_p2), %vm839_vm1, %v840_v3, 0 }
   0x9   : > { %v843_v5 = vand.u32 (!%p139_p2), %v2825_v1, %v841_v4 }
   0xb   : > { %2681 = vmatprep.subr.bf16.mxu0 (!%p139_p2), %v843_v5  ;;  %2812 = vmatprep.subr.bf16.mxu1 (!%p139_p2), %v843_v5 }
   0xc   : > { %2682 = vmatpush3.bf16.msra.mxu0 (!%p139_p2), %v843_v5  ;;  %2814 = vmatpush3.bf16.msra.mxu1 (!%p139_p2), %v843_v5 }
   0xd   : > { %s3481_s18 = smov (!%p163_p3, %s2220_s18), 511 }
   0xe   : > { %s2221_s19 = sshll.u32 %s3481_s18, 2 }
   0xf   : > { %s2942_s22 = scalar_lea.vmem %s3476_s0, %s2221_s19  ;;  %s3087_s27 = scalar_lea.vmem %s3479_s3, %s2221_s19 }
  0x10   : > { %v2826_v6 = vld [vmem:[%s2942_s22] sm:$0xff]   ;;  %v2828_v8 = vld [vmem:[%s2942_s22 + $0x8] sm:$0xff]   ;;  %v2830_v10 = vld [vmem:[%s2942_s22 + $0x10] sm:$0xff]  }
  0x11   : > { %v2827_v7 = vld [vmem:[%s2942_s22 + $0x100] sm:$0xff]   ;;  %2683 = vmatprep.mubr.msk.bf16.mxu0 %vm645_vm2, %v2826_v6  ;;  %v2829_v9 = vld [vmem:[%s2942_s22 + $0x108] sm:$0xff]   ;;  %v2831_v11 = vld [vmem:[%s2942_s22 + $0x110] sm:$0xff]  }
  0x12   : > { %2747 = vmatprep.mubr.msk.bf16.mxu1 %vm645_vm2, %v2827_v7  ;;  %2684 = vmatmul.mubr.msk.bf16.vlgmr.msra.gmra.mrb[0].mxu0 %vm645_vm2, %v2828_v8  ;;  %v2832_v12 = vld [vmem:[%s2942_s22 + $0x18] sm:$0xff]   ;;  %v2834_v14 = vld [vmem:[%s2942_s22 + $0x20] sm:$0xff]   ;;  %v2836_v16 = vld [vmem:[%s2942_s22 + $0x28] sm:$0xff]  }
  0x13   : > { %2748 = vmatmul.mubr.msk.bf16.vlgmr.msra.gmra.mrb[0].mxu1 %vm645_vm2, %v2829_v9  ;;  %2687 = vmatprep.mubr.msk.bf16.mxu0 %vm645_vm2, %v2830_v10  ;;  %v2833_v13 = vld [vmem:[%s2942_s22 + $0x118] sm:$0xff]   ;;  %v2835_v15 = vld [vmem:[%s2942_s22 + $0x120] sm:$0xff]   ;;  %v2837_v17 = vld [vmem:[%s2942_s22 + $0x128] sm:$0xff]  }
  0x14   : > { %2751 = vmatprep.mubr.msk.bf16.mxu1 %vm645_vm2, %v2831_v11  ;;  %v2838_v18 = vld [vmem:[%s2942_s22 + $0x30] sm:$0xff]   ;;  %v2840_v20 = vld [vmem:[%s2942_s22 + $0x38] sm:$0xff]   ;;  %v2842_v22 = vld [vmem:[%s2942_s22 + $0x40] sm:$0xff]  }
  0x15   : > { %v2839_v19 = vld [vmem:[%s2942_s22 + $0x130] sm:$0xff]   ;;  %v2841_v21 = vld [vmem:[%s2942_s22 + $0x138] sm:$0xff]   ;;  %v2843_v23 = vld [vmem:[%s2942_s22 + $0x140] sm:$0xff]  }
  0x16   : > { %v2844_v24 = vld [vmem:[%s2942_s22 + $0x48] sm:$0xff]   ;;  %v2846_v26 = vld [vmem:[%s2942_s22 + $0x50] sm:$0xff]   ;;  %v2848_v28 = vld [vmem:[%s2942_s22 + $0x58] sm:$0xff]  }
  0x17   : > { %v2845_v25 = vld [vmem:[%s2942_s22 + $0x148] sm:$0xff]   ;;  %v2847_v27 = vld [vmem:[%s2942_s22 + $0x150] sm:$0xff]   ;;  %v2849_v29 = vld [vmem:[%s2942_s22 + $0x158] sm:$0xff]  }
  0x18   : > { %v2850_v30 = vld [vmem:[%s2942_s22 + $0x60] sm:$0xff]   ;;  %v2852_v32 = vld [vmem:[%s2942_s22 + $0x68] sm:$0xff]   ;;  %v2854_v34 = vld [vmem:[%s2942_s22 + $0x70] sm:$0xff]  }
  0x19   : > { %v2851_v31 = vld [vmem:[%s2942_s22 + $0x160] sm:$0xff]   ;;  %v2853_v33 = vld [vmem:[%s2942_s22 + $0x168] sm:$0xff]   ;;  %v2855_v35 = vld [vmem:[%s2942_s22 + $0x170] sm:$0xff]  }
  0x1a   : > { %2688 = vmatmul.mubr.msk.bf16.gmra.mrb[4].mxu0 %vm645_vm2, %v2832_v12  ;;  %v2856_v36 = vld [vmem:[%s2942_s22 + $0x78] sm:$0xff]   ;;  %v2858_v38 = vld [vmem:[%s2942_s22 + $0x80] sm:$0xff]   ;;  %v2860_v40 = vld [vmem:[%s2942_s22 + $0x88] sm:$0xff]  }
  0x1b   : > { %2752 = vmatmul.mubr.msk.bf16.gmra.mrb[4].mxu1 %vm645_vm2, %v2833_v13  ;;  %2691 = vmatprep.mubr.msk.bf16.mxu0 %vm645_vm2, %v2834_v14  ;;  %v2857_v37 = vld [vmem:[%s2942_s22 + $0x178] sm:$0xff]   ;;  %v2859_v39 = vld [vmem:[%s2942_s22 + $0x180] sm:$0xff]   ;;  %v2861_v41 = vld [vmem:[%s2942_s22 + $0x188] sm:$0xff]  }
  0x1c   : > { %2755 = vmatprep.mubr.msk.bf16.mxu1 %vm645_vm2, %v2835_v15  ;;  %v2862_v42 = vld [vmem:[%s2942_s22 + $0x90] sm:$0xff]   ;;  %v2864_v44 = vld [vmem:[%s2942_s22 + $0x98] sm:$0xff]   ;;  %v2866_v46 = vld [vmem:[%s2942_s22 + $0xa0] sm:$0xff]  }
  0x1d   : > { %v2863_v43 = vld [vmem:[%s2942_s22 + $0x190] sm:$0xff]   ;;  %v2865_v45 = vld [vmem:[%s2942_s22 + $0x198] sm:$0xff]   ;;  %v2867_v47 = vld [vmem:[%s2942_s22 + $0x1a0] sm:$0xff]  }
  0x1e   : > { %v2868_v48 = vld [vmem:[%s2942_s22 + $0xa8] sm:$0xff]   ;;  %v2870_v50 = vld [vmem:[%s2942_s22 + $0xb0] sm:$0xff]   ;;  %v2872_v52 = vld [vmem:[%s2942_s22 + $0xb8] sm:$0xff]  }
  0x1f   : > { %v2869_v49 = vld [vmem:[%s2942_s22 + $0x1a8] sm:$0xff]   ;;  %v2871_v51 = vld [vmem:[%s2942_s22 + $0x1b0] sm:$0xff]   ;;  %v2873_v53 = vld [vmem:[%s2942_s22 + $0x1b8] sm:$0xff]  }
  0x20   : > { %v2874_v54 = vld [vmem:[%s2942_s22 + $0xc0] sm:$0xff]   ;;  %v2876_v56 = vld [vmem:[%s2942_s22 + $0xc8] sm:$0xff]   ;;  %v2878_v58 = vld [vmem:[%s2942_s22 + $0xd0] sm:$0xff]  }
  0x21   : > { %v2875_v55 = vld [vmem:[%s2942_s22 + $0x1c0] sm:$0xff]   ;;  %v2877_v57 = vld [vmem:[%s2942_s22 + $0x1c8] sm:$0xff]   ;;  %v2879_v59 = vld [vmem:[%s2942_s22 + $0x1d0] sm:$0xff]  }
  0x22   : > { %2692 = vmatmul.mubr.msk.bf16.gmra.mrb[8].mxu0 %vm645_vm2, %v2836_v16  ;;  %v2880_v60 = vld [vmem:[%s2942_s22 + $0xd8] sm:$0xff]   ;;  %v2882_v62 = vld [vmem:[%s2942_s22 + $0xe0] sm:$0xff]   ;;  %v2884_v0 = vld [vmem:[%s2942_s22 + $0xe8] sm:$0xff]  }
  0x23   : > { %2756 = vmatmul.mubr.msk.bf16.gmra.mrb[8].mxu1 %vm645_vm2, %v2837_v17  ;;  %2695 = vmatprep.mubr.msk.bf16.mxu0 %vm645_vm2, %v2838_v18  ;;  %v2881_v61 = vld [vmem:[%s2942_s22 + $0x1d8] sm:$0xff]   ;;  %v2883_v63 = vld [vmem:[%s2942_s22 + $0x1e0] sm:$0xff]   ;;  %v2885_v1 = vld [vmem:[%s2942_s22 + $0x1e8] sm:$0xff]  }
  0x24   : > { %2759 = vmatprep.mubr.msk.bf16.mxu1 %vm645_vm2, %v2839_v19  ;;  %v2886_v2 = vld [vmem:[%s2942_s22 + $0xf0] sm:$0xff]   ;;  %v2888_v4 = vld [vmem:[%s2942_s22 + $0xf8] sm:$0xff]   ;;  %v3075_v6 = vld [vmem:[%s3478_s2] ss:$0 sm:$0xff] }
  0x25   : > { %v2887_v3 = vld [vmem:[%s2942_s22 + $0x1f0] sm:$0xff]   ;;  %v2889_v5 = vld [vmem:[%s2942_s22 + $0x1f8] sm:$0xff]  }
  0x2a   : > { %2696 = vmatmul.mubr.msk.bf16.gmra.mrb[12].mxu0 %vm645_vm2, %v2840_v20 }
  0x2b   : > { %2760 = vmatmul.mubr.msk.bf16.gmra.mrb[12].mxu1 %vm645_vm2, %v2841_v21  ;;  %2699 = vmatprep.mubr.msk.bf16.mxu0 %vm645_vm2, %v2842_v22 }
  0x2c   : > { %2763 = vmatprep.mubr.msk.bf16.mxu1 %vm645_vm2, %v2843_v23 }
  0x32   : > { %2700 = vmatmul.mubr.msk.bf16.gmra.mrb[16].mxu0 %vm645_vm2, %v2844_v24 }
  0x33   : > { %2764 = vmatmul.mubr.msk.bf16.gmra.mrb[16].mxu1 %vm645_vm2, %v2845_v25  ;;  %2703 = vmatprep.mubr.msk.bf16.mxu0 %vm645_vm2, %v2846_v26 }
  0x34   : > { %2767 = vmatprep.mubr.msk.bf16.mxu1 %vm645_vm2, %v2847_v27 }
  0x3a   : > { %2704 = vmatmul.mubr.msk.bf16.gmra.mrb[20].mxu0 %vm645_vm2, %v2848_v28 }
  0x3b   : > { %2768 = vmatmul.mubr.msk.bf16.gmra.mrb[20].mxu1 %vm645_vm2, %v2849_v29  ;;  %2707 = vmatprep.mubr.msk.bf16.mxu0 %vm645_vm2, %v2850_v30 }
  0x3c   : > { %2771 = vmatprep.mubr.msk.bf16.mxu1 %vm645_vm2, %v2851_v31 }
  0x42   : > { %2708 = vmatmul.mubr.msk.bf16.gmra.mrb[24].mxu0 %vm645_vm2, %v2852_v32 }
  0x43   : > { %2772 = vmatmul.mubr.msk.bf16.gmra.mrb[24].mxu1 %vm645_vm2, %v2853_v33  ;;  %2711 = vmatprep.mubr.msk.bf16.mxu0 %vm645_vm2, %v2854_v34 }
  0x44   : > { %2775 = vmatprep.mubr.msk.bf16.mxu1 %vm645_vm2, %v2855_v35 }
  0x4a   : > { %2712 = vmatmul.mubr.msk.bf16.gmra.mrb[28].mxu0 %vm645_vm2, %v2856_v36 }
  0x4b   : > { %2776 = vmatmul.mubr.msk.bf16.gmra.mrb[28].mxu1 %vm645_vm2, %v2857_v37  ;;  %2715 = vmatprep.mubr.msk.bf16.mxu0 %vm645_vm2, %v2858_v38 }
  0x4c   : > { %2779 = vmatprep.mubr.msk.bf16.mxu1 %vm645_vm2, %v2859_v39 }
  0x52   : > { %2716 = vmatmul.mubr.msk.bf16.gmra.mrb[32].mxu0 %vm645_vm2, %v2860_v40 }
  0x53   : > { %2780 = vmatmul.mubr.msk.bf16.gmra.mrb[32].mxu1 %vm645_vm2, %v2861_v41  ;;  %2719 = vmatprep.mubr.msk.bf16.mxu0 %vm645_vm2, %v2862_v42 }
  0x54   : > { %2783 = vmatprep.mubr.msk.bf16.mxu1 %vm645_vm2, %v2863_v43 }
  0x5a   : > { %2720 = vmatmul.mubr.msk.bf16.gmra.mrb[36].mxu0 %vm645_vm2, %v2864_v44 }
  0x5b   : > { %2784 = vmatmul.mubr.msk.bf16.gmra.mrb[36].mxu1 %vm645_vm2, %v2865_v45  ;;  %2723 = vmatprep.mubr.msk.bf16.mxu0 %vm645_vm2, %v2866_v46 }
  0x5c   : > { %2787 = vmatprep.mubr.msk.bf16.mxu1 %vm645_vm2, %v2867_v47 }
  0x62   : > { %2724 = vmatmul.mubr.msk.bf16.gmra.mrb[40].mxu0 %vm645_vm2, %v2868_v48 }
  0x63   : > { %2788 = vmatmul.mubr.msk.bf16.gmra.mrb[40].mxu1 %vm645_vm2, %v2869_v49  ;;  %2727 = vmatprep.mubr.msk.bf16.mxu0 %vm645_vm2, %v2870_v50 }
  0x64   : > { %2791 = vmatprep.mubr.msk.bf16.mxu1 %vm645_vm2, %v2871_v51 }
  0x6a   : > { %2728 = vmatmul.mubr.msk.bf16.gmra.mrb[44].mxu0 %vm645_vm2, %v2872_v52 }
  0x6b   : > { %2792 = vmatmul.mubr.msk.bf16.gmra.mrb[44].mxu1 %vm645_vm2, %v2873_v53  ;;  %2731 = vmatprep.mubr.msk.bf16.mxu0 %vm645_vm2, %v2874_v54 }
  0x6c   : > { %2795 = vmatprep.mubr.msk.bf16.mxu1 %vm645_vm2, %v2875_v55 }
  0x72   : > { %2732 = vmatmul.mubr.msk.bf16.gmra.mrb[48].mxu0 %vm645_vm2, %v2876_v56 }
  0x73   : > { %2796 = vmatmul.mubr.msk.bf16.gmra.mrb[48].mxu1 %vm645_vm2, %v2877_v57  ;;  %2735 = vmatprep.mubr.msk.bf16.mxu0 %vm645_vm2, %v2878_v58 }
  0x74   : > { %2799 = vmatprep.mubr.msk.bf16.mxu1 %vm645_vm2, %v2879_v59 }
  0x7a   : > { %2736 = vmatmul.mubr.msk.bf16.gmra.mrb[52].mxu0 %vm645_vm2, %v2880_v60 }
  0x7b   : > { %2800 = vmatmul.mubr.msk.bf16.gmra.mrb[52].mxu1 %vm645_vm2, %v2881_v61  ;;  %2739 = vmatprep.mubr.msk.bf16.mxu0 %vm645_vm2, %v2882_v62 }
  0x7c   : > { %2803 = vmatprep.mubr.msk.bf16.mxu1 %vm645_vm2, %v2883_v63 }
  0x82   : > { %2740 = vmatmul.mubr.msk.bf16.gmra.mrb[56].mxu0 %vm645_vm2, %v2884_v0 }
  0x83   : > { %2804 = vmatmul.mubr.msk.bf16.gmra.mrb[56].mxu1 %vm645_vm2, %v2885_v1  ;;  %2743 = vmatprep.mubr.msk.bf16.mxu0 %vm645_vm2, %v2886_v2 }
  0x84   : > { %2807 = vmatprep.mubr.msk.bf16.mxu1 %vm645_vm2, %v2887_v3 }
  0x8a   : > { %2744 = vmatmul.mubr.msk.bf16.gmra.mrb[60].mxu0 %vm645_vm2, %v2888_v4 }
  0x8b   : > { %2808 = vmatmul.mubr.msk.bf16.gmra.mrb[60].mxu1 %vm645_vm2, %v2889_v5 }
  0xe5   : > { %v2685_v7 = vpop.f32.mrb[0].mxu0 }
  0xe6   : > { %v888_v8 = vadd.f32 %v2685_v7, %v3075_v6  ;;  %v2749_v9 = vpop.f32.mrb[0].mxu1  ;;  %v879_v10 = vpop.f32.mrb[1].mxu0 }
  0xe7   : > { %v1144_v11 = vadd.f32 %v2749_v9, %v3075_v6  ;;  %v880_v12 = vadd.f32 %v3075_v6, %v879_v10  ;;  %v1135_v13 = vpop.f32.mrb[1].mxu1  ;;  %v2686_v14 = vpop.f32.mrb[2].mxu0 }
  0xe8   : > { %v1392_v15 = vmax.f32 %v888_v8, 0.0  ;;  %v1136_v16 = vadd.f32 %v3075_v6, %v1135_v13  ;;  %v891_v17 = vadd.f32 %v2686_v14, %v3075_v6  ;;  %v2750_v18 = vpop.f32.mrb[2].mxu1  ;;  %v882_v19 = vpop.f32.mrb[3].mxu0 }
  0xe9   : > { %v1456_v20 = vmax.f32 %v1144_v11, 0.0  ;;  %v1390_v21 = vmax.f32 %v880_v12, 0.0  ;;  %v1147_v22 = vadd.f32 %v2750_v18, %v3075_v6  ;;  %v883_v23 = vadd.f32 %v3075_v6, %v882_v19  ;;  %v1138_v24 = vpop.f32.mrb[3].mxu1 }
  0xea   : > { %v2487_v25 = vpack.c.bf16 %v1392_v15, %v1392_v15  ;;  %v1454_v26 = vmax.f32 %v1136_v16, 0.0  ;;  %v1393_v27 = vmax.f32 %v891_v17, 0.0  ;;  %v1139_v28 = vadd.f32 %v3075_v6, %v1138_v24 }
  0xeb   : > { %v2551_v29 = vpack.c.bf16 %v1456_v20, %v1456_v20  ;;  %v2485_v30 = vpack.c.bf16 %v1390_v21, %v1390_v21  ;;  %v1457_v31 = vmax.f32 %v1147_v22, 0.0  ;;  %v1391_v32 = vmax.f32 %v883_v23, 0.0 }
  0xec   : > { %2033 = vst.msk [vmem:[%s3087_s27 + $0x8] sm:$0xf] %vm2030_vm3, %v2487_v25  ;;  %v2549_v33 = vpack.c.bf16 %v1454_v26, %v1454_v26  ;;  %v2488_v34 = vpack.c.bf16 %v1393_v27, %v1393_v27  ;;  %v1455_v35 = vmax.f32 %v1139_v28, 0.0 }
  0xed   : > { %2097 = vst.msk [vmem:[%s3087_s27 + $0x108] sm:$0xf] %vm2030_vm3, %v2551_v29  ;;  %2031 = vst.msk [vmem:[%s3087_s27] sm:$0xf] %vm2030_vm3, %v2485_v30  ;;  %v2552_v36 = vpack.c.bf16 %v1457_v31, %v1457_v31  ;;  %v2486_v37 = vpack.c.bf16 %v1391_v32, %v1391_v32  ;;  %v2689_v38 = vpop.f32.mrb[4].mxu0 }
  0xee   : > { %2095 = vst.msk [vmem:[%s3087_s27 + $0x100] sm:$0xf] %vm2030_vm3, %v2549_v33  ;;  %2034 = vst.msk [vmem:[%s3087_s27 + $0xc] sm:$0xf] %vm2030_vm3, %v2488_v34  ;;  %v2550_v39 = vpack.c.bf16 %v1455_v35, %v1455_v35  ;;  %v904_v40 = vadd.f32 %v2689_v38, %v3075_v6  ;;  %v2753_v41 = vpop.f32.mrb[4].mxu1  ;;  %v895_v42 = vpop.f32.mrb[5].mxu0 }
  0xef   : > { %2098 = vst.msk [vmem:[%s3087_s27 + $0x10c] sm:$0xf] %vm2030_vm3, %v2552_v36  ;;  %2032 = vst.msk [vmem:[%s3087_s27 + $0x4] sm:$0xf] %vm2030_vm3, %v2486_v37  ;;  %v1160_v43 = vadd.f32 %v2753_v41, %v3075_v6  ;;  %v896_v44 = vadd.f32 %v3075_v6, %v895_v42  ;;  %v1151_v45 = vpop.f32.mrb[5].mxu1  ;;  %v2690_v46 = vpop.f32.mrb[6].mxu0 }
  0xf0   : > { %2096 = vst.msk [vmem:[%s3087_s27 + $0x104] sm:$0xf] %vm2030_vm3, %v2550_v39  ;;  %v1396_v47 = vmax.f32 %v904_v40, 0.0  ;;  %v1152_v48 = vadd.f32 %v3075_v6, %v1151_v45  ;;  %v907_v49 = vadd.f32 %v2690_v46, %v3075_v6  ;;  %v2754_v50 = vpop.f32.mrb[6].mxu1  ;;  %v898_v51 = vpop.f32.mrb[7].mxu0 }
  0xf1   : > { %v1460_v52 = vmax.f32 %v1160_v43, 0.0  ;;  %v1394_v53 = vmax.f32 %v896_v44, 0.0  ;;  %v1163_v54 = vadd.f32 %v2754_v50, %v3075_v6  ;;  %v899_v55 = vadd.f32 %v3075_v6, %v898_v51  ;;  %v1154_v56 = vpop.f32.mrb[7].mxu1 }
  0xf2   : > { %v2491_v57 = vpack.c.bf16 %v1396_v47, %v1396_v47  ;;  %v1458_v58 = vmax.f32 %v1152_v48, 0.0  ;;  %v1397_v59 = vmax.f32 %v907_v49, 0.0  ;;  %v1155_v60 = vadd.f32 %v3075_v6, %v1154_v56 }
  0xf3   : > { %v2555_v61 = vpack.c.bf16 %v1460_v52, %v1460_v52  ;;  %v2489_v62 = vpack.c.bf16 %v1394_v53, %v1394_v53  ;;  %v1461_v63 = vmax.f32 %v1163_v54, 0.0  ;;  %v1395_v0 = vmax.f32 %v899_v55, 0.0 }
  0xf4   : > { %2037 = vst.msk [vmem:[%s3087_s27 + $0x18] sm:$0xf] %vm2030_vm3, %v2491_v57  ;;  %v2553_v1 = vpack.c.bf16 %v1458_v58, %v1458_v58  ;;  %v2492_v2 = vpack.c.bf16 %v1397_v59, %v1397_v59  ;;  %v1459_v3 = vmax.f32 %v1155_v60, 0.0 }
  0xf5   : > { %2101 = vst.msk [vmem:[%s3087_s27 + $0x118] sm:$0xf] %vm2030_vm3, %v2555_v61  ;;  %2035 = vst.msk [vmem:[%s3087_s27 + $0x10] sm:$0xf] %vm2030_vm3, %v2489_v62  ;;  %v2556_v4 = vpack.c.bf16 %v1461_v63, %v1461_v63  ;;  %v2490_v5 = vpack.c.bf16 %v1395_v0, %v1395_v0  ;;  %v2693_v7 = vpop.f32.mrb[8].mxu0 }
  0xf6   : > { %2099 = vst.msk [vmem:[%s3087_s27 + $0x110] sm:$0xf] %vm2030_vm3, %v2553_v1  ;;  %2038 = vst.msk [vmem:[%s3087_s27 + $0x1c] sm:$0xf] %vm2030_vm3, %v2492_v2  ;;  %v2554_v8 = vpack.c.bf16 %v1459_v3, %v1459_v3  ;;  %v920_v9 = vadd.f32 %v2693_v7, %v3075_v6  ;;  %v2757_v10 = vpop.f32.mrb[8].mxu1  ;;  %v911_v11 = vpop.f32.mrb[9].mxu0 }
  0xf7   : > { %2102 = vst.msk [vmem:[%s3087_s27 + $0x11c] sm:$0xf] %vm2030_vm3, %v2556_v4  ;;  %2036 = vst.msk [vmem:[%s3087_s27 + $0x14] sm:$0xf] %vm2030_vm3, %v2490_v5  ;;  %v1176_v12 = vadd.f32 %v2757_v10, %v3075_v6  ;;  %v912_v13 = vadd.f32 %v3075_v6, %v911_v11  ;;  %v1167_v14 = vpop.f32.mrb[9].mxu1  ;;  %v2694_v15 = vpop.f32.mrb[10].mxu0 }
  0xf8   : > { %2100 = vst.msk [vmem:[%s3087_s27 + $0x114] sm:$0xf] %vm2030_vm3, %v2554_v8  ;;  %v1400_v16 = vmax.f32 %v920_v9, 0.0  ;;  %v1168_v17 = vadd.f32 %v3075_v6, %v1167_v14  ;;  %v923_v18 = vadd.f32 %v2694_v15, %v3075_v6  ;;  %v2758_v19 = vpop.f32.mrb[10].mxu1  ;;  %v914_v20 = vpop.f32.mrb[11].mxu0 }
  0xf9   : > { %v1464_v21 = vmax.f32 %v1176_v12, 0.0  ;;  %v1398_v22 = vmax.f32 %v912_v13, 0.0  ;;  %v1179_v23 = vadd.f32 %v2758_v19, %v3075_v6  ;;  %v915_v24 = vadd.f32 %v3075_v6, %v914_v20  ;;  %v1170_v25 = vpop.f32.mrb[11].mxu1 }
  0xfa   : > { %v2495_v26 = vpack.c.bf16 %v1400_v16, %v1400_v16  ;;  %v1462_v27 = vmax.f32 %v1168_v17, 0.0  ;;  %v1401_v28 = vmax.f32 %v923_v18, 0.0  ;;  %v1171_v29 = vadd.f32 %v3075_v6, %v1170_v25 }
  0xfb   : > { %v2559_v30 = vpack.c.bf16 %v1464_v21, %v1464_v21  ;;  %v2493_v31 = vpack.c.bf16 %v1398_v22, %v1398_v22  ;;  %v1465_v32 = vmax.f32 %v1179_v23, 0.0  ;;  %v1399_v33 = vmax.f32 %v915_v24, 0.0 }
  0xfc   : > { %2041 = vst.msk [vmem:[%s3087_s27 + $0x28] sm:$0xf] %vm2030_vm3, %v2495_v26  ;;  %v2557_v34 = vpack.c.bf16 %v1462_v27, %v1462_v27  ;;  %v2496_v35 = vpack.c.bf16 %v1401_v28, %v1401_v28  ;;  %v1463_v36 = vmax.f32 %v1171_v29, 0.0 }
  0xfd   : > { %2105 = vst.msk [vmem:[%s3087_s27 + $0x128] sm:$0xf] %vm2030_vm3, %v2559_v30  ;;  %2039 = vst.msk [vmem:[%s3087_s27 + $0x20] sm:$0xf] %vm2030_vm3, %v2493_v31  ;;  %v2560_v37 = vpack.c.bf16 %v1465_v32, %v1465_v32  ;;  %v2494_v38 = vpack.c.bf16 %v1399_v33, %v1399_v33  ;;  %v2697_v39 = vpop.f32.mrb[12].mxu0 }
  0xfe   : > { %2103 = vst.msk [vmem:[%s3087_s27 + $0x120] sm:$0xf] %vm2030_vm3, %v2557_v34  ;;  %2042 = vst.msk [vmem:[%s3087_s27 + $0x2c] sm:$0xf] %vm2030_vm3, %v2496_v35  ;;  %v2558_v40 = vpack.c.bf16 %v1463_v36, %v1463_v36  ;;  %v936_v41 = vadd.f32 %v2697_v39, %v3075_v6  ;;  %v2761_v42 = vpop.f32.mrb[12].mxu1  ;;  %v927_v43 = vpop.f32.mrb[13].mxu0 }
  0xff   : > { %2106 = vst.msk [vmem:[%s3087_s27 + $0x12c] sm:$0xf] %vm2030_vm3, %v2560_v37  ;;  %2040 = vst.msk [vmem:[%s3087_s27 + $0x24] sm:$0xf] %vm2030_vm3, %v2494_v38  ;;  %v1192_v44 = vadd.f32 %v2761_v42, %v3075_v6  ;;  %v928_v45 = vadd.f32 %v3075_v6, %v927_v43  ;;  %v1183_v46 = vpop.f32.mrb[13].mxu1  ;;  %v2698_v47 = vpop.f32.mrb[14].mxu0 }
 0x100   : > { %2104 = vst.msk [vmem:[%s3087_s27 + $0x124] sm:$0xf] %vm2030_vm3, %v2558_v40  ;;  %v1404_v48 = vmax.f32 %v936_v41, 0.0  ;;  %v1184_v49 = vadd.f32 %v3075_v6, %v1183_v46  ;;  %v939_v50 = vadd.f32 %v2698_v47, %v3075_v6  ;;  %v2762_v51 = vpop.f32.mrb[14].mxu1  ;;  %v930_v52 = vpop.f32.mrb[15].mxu0 }
 0x101   : > { %v1468_v53 = vmax.f32 %v1192_v44, 0.0  ;;  %v1402_v54 = vmax.f32 %v928_v45, 0.0  ;;  %v1195_v55 = vadd.f32 %v2762_v51, %v3075_v6  ;;  %v931_v56 = vadd.f32 %v3075_v6, %v930_v52  ;;  %v1186_v57 = vpop.f32.mrb[15].mxu1 }
 0x102   : > { %v2499_v58 = vpack.c.bf16 %v1404_v48, %v1404_v48  ;;  %v1466_v59 = vmax.f32 %v1184_v49, 0.0  ;;  %v1405_v60 = vmax.f32 %v939_v50, 0.0  ;;  %v1187_v61 = vadd.f32 %v3075_v6, %v1186_v57 }
 0x103   : > { %v2563_v62 = vpack.c.bf16 %v1468_v53, %v1468_v53  ;;  %v2497_v63 = vpack.c.bf16 %v1402_v54, %v1402_v54  ;;  %v1469_v0 = vmax.f32 %v1195_v55, 0.0  ;;  %v1403_v1 = vmax.f32 %v931_v56, 0.0 }
 0x104   : > { %2045 = vst.msk [vmem:[%s3087_s27 + $0x38] sm:$0xf] %vm2030_vm3, %v2499_v58  ;;  %v2561_v2 = vpack.c.bf16 %v1466_v59, %v1466_v59  ;;  %v2500_v3 = vpack.c.bf16 %v1405_v60, %v1405_v60  ;;  %v1467_v4 = vmax.f32 %v1187_v61, 0.0 }
 0x105   : > { %2109 = vst.msk [vmem:[%s3087_s27 + $0x138] sm:$0xf] %vm2030_vm3, %v2563_v62  ;;  %2043 = vst.msk [vmem:[%s3087_s27 + $0x30] sm:$0xf] %vm2030_vm3, %v2497_v63  ;;  %v2564_v5 = vpack.c.bf16 %v1469_v0, %v1469_v0  ;;  %v2498_v7 = vpack.c.bf16 %v1403_v1, %v1403_v1  ;;  %v2701_v8 = vpop.f32.mrb[16].mxu0 }
 0x106   : > { %2107 = vst.msk [vmem:[%s3087_s27 + $0x130] sm:$0xf] %vm2030_vm3, %v2561_v2  ;;  %2046 = vst.msk [vmem:[%s3087_s27 + $0x3c] sm:$0xf] %vm2030_vm3, %v2500_v3  ;;  %v2562_v9 = vpack.c.bf16 %v1467_v4, %v1467_v4  ;;  %v952_v10 = vadd.f32 %v2701_v8, %v3075_v6  ;;  %v2765_v11 = vpop.f32.mrb[16].mxu1  ;;  %v943_v12 = vpop.f32.mrb[17].mxu0 }
 0x107   : > { %2110 = vst.msk [vmem:[%s3087_s27 + $0x13c] sm:$0xf] %vm2030_vm3, %v2564_v5  ;;  %2044 = vst.msk [vmem:[%s3087_s27 + $0x34] sm:$0xf] %vm2030_vm3, %v2498_v7  ;;  %v1208_v13 = vadd.f32 %v2765_v11, %v3075_v6  ;;  %v944_v14 = vadd.f32 %v3075_v6, %v943_v12  ;;  %v1199_v15 = vpop.f32.mrb[17].mxu1  ;;  %v2702_v16 = vpop.f32.mrb[18].mxu0 }
 0x108   : > { %2108 = vst.msk [vmem:[%s3087_s27 + $0x134] sm:$0xf] %vm2030_vm3, %v2562_v9  ;;  %v1408_v17 = vmax.f32 %v952_v10, 0.0  ;;  %v1200_v18 = vadd.f32 %v3075_v6, %v1199_v15  ;;  %v955_v19 = vadd.f32 %v2702_v16, %v3075_v6  ;;  %v2766_v20 = vpop.f32.mrb[18].mxu1  ;;  %v946_v21 = vpop.f32.mrb[19].mxu0 }
 0x109   : > { %v1472_v22 = vmax.f32 %v1208_v13, 0.0  ;;  %v1406_v23 = vmax.f32 %v944_v14, 0.0  ;;  %v1211_v24 = vadd.f32 %v2766_v20, %v3075_v6  ;;  %v947_v25 = vadd.f32 %v3075_v6, %v946_v21  ;;  %v1202_v26 = vpop.f32.mrb[19].mxu1 }
 0x10a   : > { %v2503_v27 = vpack.c.bf16 %v1408_v17, %v1408_v17  ;;  %v1470_v28 = vmax.f32 %v1200_v18, 0.0  ;;  %v1409_v29 = vmax.f32 %v955_v19, 0.0  ;;  %v1203_v30 = vadd.f32 %v3075_v6, %v1202_v26 }
 0x10b   : > { %v2567_v31 = vpack.c.bf16 %v1472_v22, %v1472_v22  ;;  %v2501_v32 = vpack.c.bf16 %v1406_v23, %v1406_v23  ;;  %v1473_v33 = vmax.f32 %v1211_v24, 0.0  ;;  %v1407_v34 = vmax.f32 %v947_v25, 0.0 }
 0x10c   : > { %2049 = vst.msk [vmem:[%s3087_s27 + $0x48] sm:$0xf] %vm2030_vm3, %v2503_v27  ;;  %v2565_v35 = vpack.c.bf16 %v1470_v28, %v1470_v28  ;;  %v2504_v36 = vpack.c.bf16 %v1409_v29, %v1409_v29  ;;  %v1471_v37 = vmax.f32 %v1203_v30, 0.0 }
 0x10d   : > { %2113 = vst.msk [vmem:[%s3087_s27 + $0x148] sm:$0xf] %vm2030_vm3, %v2567_v31  ;;  %2047 = vst.msk [vmem:[%s3087_s27 + $0x40] sm:$0xf] %vm2030_vm3, %v2501_v32  ;;  %v2568_v38 = vpack.c.bf16 %v1473_v33, %v1473_v33  ;;  %v2502_v39 = vpack.c.bf16 %v1407_v34, %v1407_v34  ;;  %v2705_v40 = vpop.f32.mrb[20].mxu0 }
 0x10e   : > { %2111 = vst.msk [vmem:[%s3087_s27 + $0x140] sm:$0xf] %vm2030_vm3, %v2565_v35  ;;  %2050 = vst.msk [vmem:[%s3087_s27 + $0x4c] sm:$0xf] %vm2030_vm3, %v2504_v36  ;;  %v2566_v41 = vpack.c.bf16 %v1471_v37, %v1471_v37  ;;  %v968_v42 = vadd.f32 %v2705_v40, %v3075_v6  ;;  %v2769_v43 = vpop.f32.mrb[20].mxu1  ;;  %v959_v44 = vpop.f32.mrb[21].mxu0 }
 0x10f   : > { %2114 = vst.msk [vmem:[%s3087_s27 + $0x14c] sm:$0xf] %vm2030_vm3, %v2568_v38  ;;  %2048 = vst.msk [vmem:[%s3087_s27 + $0x44] sm:$0xf] %vm2030_vm3, %v2502_v39  ;;  %v1224_v45 = vadd.f32 %v2769_v43, %v3075_v6  ;;  %v960_v46 = vadd.f32 %v3075_v6, %v959_v44  ;;  %v1215_v47 = vpop.f32.mrb[21].mxu1  ;;  %v2706_v48 = vpop.f32.mrb[22].mxu0 }
 0x110   : > { %2112 = vst.msk [vmem:[%s3087_s27 + $0x144] sm:$0xf] %vm2030_vm3, %v2566_v41  ;;  %v1412_v49 = vmax.f32 %v968_v42, 0.0  ;;  %v1216_v50 = vadd.f32 %v3075_v6, %v1215_v47  ;;  %v971_v51 = vadd.f32 %v2706_v48, %v3075_v6  ;;  %v2770_v52 = vpop.f32.mrb[22].mxu1  ;;  %v962_v53 = vpop.f32.mrb[23].mxu0 }
 0x111   : > { %v1476_v54 = vmax.f32 %v1224_v45, 0.0  ;;  %v1410_v55 = vmax.f32 %v960_v46, 0.0  ;;  %v1227_v56 = vadd.f32 %v2770_v52, %v3075_v6  ;;  %v963_v57 = vadd.f32 %v3075_v6, %v962_v53  ;;  %v1218_v58 = vpop.f32.mrb[23].mxu1 }
 0x112   : > { %v2507_v59 = vpack.c.bf16 %v1412_v49, %v1412_v49  ;;  %v1474_v60 = vmax.f32 %v1216_v50, 0.0  ;;  %v1413_v61 = vmax.f32 %v971_v51, 0.0  ;;  %v1219_v62 = vadd.f32 %v3075_v6, %v1218_v58 }
 0x113   : > { %v2571_v63 = vpack.c.bf16 %v1476_v54, %v1476_v54  ;;  %v2505_v0 = vpack.c.bf16 %v1410_v55, %v1410_v55  ;;  %v1477_v1 = vmax.f32 %v1227_v56, 0.0  ;;  %v1411_v2 = vmax.f32 %v963_v57, 0.0 }
 0x114   : > { %2053 = vst.msk [vmem:[%s3087_s27 + $0x58] sm:$0xf] %vm2030_vm3, %v2507_v59  ;;  %v2569_v3 = vpack.c.bf16 %v1474_v60, %v1474_v60  ;;  %v2508_v4 = vpack.c.bf16 %v1413_v61, %v1413_v61  ;;  %v1475_v5 = vmax.f32 %v1219_v62, 0.0 }
 0x115   : > { %2117 = vst.msk [vmem:[%s3087_s27 + $0x158] sm:$0xf] %vm2030_vm3, %v2571_v63  ;;  %2051 = vst.msk [vmem:[%s3087_s27 + $0x50] sm:$0xf] %vm2030_vm3, %v2505_v0  ;;  %v2572_v7 = vpack.c.bf16 %v1477_v1, %v1477_v1  ;;  %v2506_v8 = vpack.c.bf16 %v1411_v2, %v1411_v2  ;;  %v2709_v9 = vpop.f32.mrb[24].mxu0 }
 0x116   : > { %2115 = vst.msk [vmem:[%s3087_s27 + $0x150] sm:$0xf] %vm2030_vm3, %v2569_v3  ;;  %2054 = vst.msk [vmem:[%s3087_s27 + $0x5c] sm:$0xf] %vm2030_vm3, %v2508_v4  ;;  %v2570_v10 = vpack.c.bf16 %v1475_v5, %v1475_v5  ;;  %v984_v11 = vadd.f32 %v2709_v9, %v3075_v6  ;;  %v2773_v12 = vpop.f32.mrb[24].mxu1  ;;  %v975_v13 = vpop.f32.mrb[25].mxu0 }
 0x117   : > { %2118 = vst.msk [vmem:[%s3087_s27 + $0x15c] sm:$0xf] %vm2030_vm3, %v2572_v7  ;;  %2052 = vst.msk [vmem:[%s3087_s27 + $0x54] sm:$0xf] %vm2030_vm3, %v2506_v8  ;;  %v1240_v14 = vadd.f32 %v2773_v12, %v3075_v6  ;;  %v976_v15 = vadd.f32 %v3075_v6, %v975_v13  ;;  %v1231_v16 = vpop.f32.mrb[25].mxu1  ;;  %v2710_v17 = vpop.f32.mrb[26].mxu0 }
 0x118   : > { %2116 = vst.msk [vmem:[%s3087_s27 + $0x154] sm:$0xf] %vm2030_vm3, %v2570_v10  ;;  %v1416_v18 = vmax.f32 %v984_v11, 0.0  ;;  %v1232_v19 = vadd.f32 %v3075_v6, %v1231_v16  ;;  %v987_v20 = vadd.f32 %v2710_v17, %v3075_v6  ;;  %v2774_v21 = vpop.f32.mrb[26].mxu1  ;;  %v978_v22 = vpop.f32.mrb[27].mxu0 }
 0x119   : > { %v1480_v23 = vmax.f32 %v1240_v14, 0.0  ;;  %v1414_v24 = vmax.f32 %v976_v15, 0.0  ;;  %v1243_v25 = vadd.f32 %v2774_v21, %v3075_v6  ;;  %v979_v26 = vadd.f32 %v3075_v6, %v978_v22  ;;  %v1234_v27 = vpop.f32.mrb[27].mxu1 }
 0x11a   : > { %v2511_v28 = vpack.c.bf16 %v1416_v18, %v1416_v18  ;;  %v1478_v29 = vmax.f32 %v1232_v19, 0.0  ;;  %v1417_v30 = vmax.f32 %v987_v20, 0.0  ;;  %v1235_v31 = vadd.f32 %v3075_v6, %v1234_v27 }
 0x11b   : > { %v2575_v32 = vpack.c.bf16 %v1480_v23, %v1480_v23  ;;  %v2509_v33 = vpack.c.bf16 %v1414_v24, %v1414_v24  ;;  %v1481_v34 = vmax.f32 %v1243_v25, 0.0  ;;  %v1415_v35 = vmax.f32 %v979_v26, 0.0 }
 0x11c   : > { %2057 = vst.msk [vmem:[%s3087_s27 + $0x68] sm:$0xf] %vm2030_vm3, %v2511_v28  ;;  %v2573_v36 = vpack.c.bf16 %v1478_v29, %v1478_v29  ;;  %v2512_v37 = vpack.c.bf16 %v1417_v30, %v1417_v30  ;;  %v1479_v38 = vmax.f32 %v1235_v31, 0.0 }
 0x11d   : > { %2121 = vst.msk [vmem:[%s3087_s27 + $0x168] sm:$0xf] %vm2030_vm3, %v2575_v32  ;;  %2055 = vst.msk [vmem:[%s3087_s27 + $0x60] sm:$0xf] %vm2030_vm3, %v2509_v33  ;;  %v2576_v39 = vpack.c.bf16 %v1481_v34, %v1481_v34  ;;  %v2510_v40 = vpack.c.bf16 %v1415_v35, %v1415_v35  ;;  %v2713_v41 = vpop.f32.mrb[28].mxu0 }
 0x11e   : > { %2119 = vst.msk [vmem:[%s3087_s27 + $0x160] sm:$0xf] %vm2030_vm3, %v2573_v36  ;;  %2058 = vst.msk [vmem:[%s3087_s27 + $0x6c] sm:$0xf] %vm2030_vm3, %v2512_v37  ;;  %v2574_v42 = vpack.c.bf16 %v1479_v38, %v1479_v38  ;;  %v1000_v43 = vadd.f32 %v2713_v41, %v3075_v6  ;;  %v2777_v44 = vpop.f32.mrb[28].mxu1  ;;  %v991_v45 = vpop.f32.mrb[29].mxu0 }
 0x11f   : > { %2122 = vst.msk [vmem:[%s3087_s27 + $0x16c] sm:$0xf] %vm2030_vm3, %v2576_v39  ;;  %2056 = vst.msk [vmem:[%s3087_s27 + $0x64] sm:$0xf] %vm2030_vm3, %v2510_v40  ;;  %v1256_v46 = vadd.f32 %v2777_v44, %v3075_v6  ;;  %v992_v47 = vadd.f32 %v3075_v6, %v991_v45  ;;  %v1247_v48 = vpop.f32.mrb[29].mxu1  ;;  %v2714_v49 = vpop.f32.mrb[30].mxu0 }
 0x120   : > { %2120 = vst.msk [vmem:[%s3087_s27 + $0x164] sm:$0xf] %vm2030_vm3, %v2574_v42  ;;  %v1420_v50 = vmax.f32 %v1000_v43, 0.0  ;;  %v1248_v51 = vadd.f32 %v3075_v6, %v1247_v48  ;;  %v1003_v52 = vadd.f32 %v2714_v49, %v3075_v6  ;;  %v2778_v53 = vpop.f32.mrb[30].mxu1  ;;  %v994_v54 = vpop.f32.mrb[31].mxu0 }
 0x121   : > { %v1484_v55 = vmax.f32 %v1256_v46, 0.0  ;;  %v1418_v56 = vmax.f32 %v992_v47, 0.0  ;;  %v1259_v57 = vadd.f32 %v2778_v53, %v3075_v6  ;;  %v995_v58 = vadd.f32 %v3075_v6, %v994_v54  ;;  %v1250_v59 = vpop.f32.mrb[31].mxu1 }
 0x122   : > { %v2515_v60 = vpack.c.bf16 %v1420_v50, %v1420_v50  ;;  %v1482_v61 = vmax.f32 %v1248_v51, 0.0  ;;  %v1421_v62 = vmax.f32 %v1003_v52, 0.0  ;;  %v1251_v63 = vadd.f32 %v3075_v6, %v1250_v59 }
 0x123   : > { %v2579_v0 = vpack.c.bf16 %v1484_v55, %v1484_v55  ;;  %v2513_v1 = vpack.c.bf16 %v1418_v56, %v1418_v56  ;;  %v1485_v2 = vmax.f32 %v1259_v57, 0.0  ;;  %v1419_v3 = vmax.f32 %v995_v58, 0.0 }
 0x124   : > { %2061 = vst.msk [vmem:[%s3087_s27 + $0x78] sm:$0xf] %vm2030_vm3, %v2515_v60  ;;  %v2577_v4 = vpack.c.bf16 %v1482_v61, %v1482_v61  ;;  %v2516_v5 = vpack.c.bf16 %v1421_v62, %v1421_v62  ;;  %v1483_v7 = vmax.f32 %v1251_v63, 0.0 }
 0x125   : > { %2125 = vst.msk [vmem:[%s3087_s27 + $0x178] sm:$0xf] %vm2030_vm3, %v2579_v0  ;;  %2059 = vst.msk [vmem:[%s3087_s27 + $0x70] sm:$0xf] %vm2030_vm3, %v2513_v1  ;;  %v2580_v8 = vpack.c.bf16 %v1485_v2, %v1485_v2  ;;  %v2514_v9 = vpack.c.bf16 %v1419_v3, %v1419_v3  ;;  %v2717_v10 = vpop.f32.mrb[32].mxu0 }
 0x126   : > { %2123 = vst.msk [vmem:[%s3087_s27 + $0x170] sm:$0xf] %vm2030_vm3, %v2577_v4  ;;  %2062 = vst.msk [vmem:[%s3087_s27 + $0x7c] sm:$0xf] %vm2030_vm3, %v2516_v5  ;;  %v2578_v11 = vpack.c.bf16 %v1483_v7, %v1483_v7  ;;  %v1016_v12 = vadd.f32 %v2717_v10, %v3075_v6  ;;  %v2781_v13 = vpop.f32.mrb[32].mxu1  ;;  %v1007_v14 = vpop.f32.mrb[33].mxu0 }
 0x127   : > { %2126 = vst.msk [vmem:[%s3087_s27 + $0x17c] sm:$0xf] %vm2030_vm3, %v2580_v8  ;;  %2060 = vst.msk [vmem:[%s3087_s27 + $0x74] sm:$0xf] %vm2030_vm3, %v2514_v9  ;;  %v1272_v15 = vadd.f32 %v2781_v13, %v3075_v6  ;;  %v1008_v16 = vadd.f32 %v3075_v6, %v1007_v14  ;;  %v1263_v17 = vpop.f32.mrb[33].mxu1  ;;  %v2718_v18 = vpop.f32.mrb[34].mxu0 }
 0x128   : > { %2124 = vst.msk [vmem:[%s3087_s27 + $0x174] sm:$0xf] %vm2030_vm3, %v2578_v11  ;;  %v1424_v19 = vmax.f32 %v1016_v12, 0.0  ;;  %v1264_v20 = vadd.f32 %v3075_v6, %v1263_v17  ;;  %v1019_v21 = vadd.f32 %v2718_v18, %v3075_v6  ;;  %v2782_v22 = vpop.f32.mrb[34].mxu1  ;;  %v1010_v23 = vpop.f32.mrb[35].mxu0 }
 0x129   : > { %v1488_v24 = vmax.f32 %v1272_v15, 0.0  ;;  %v1422_v25 = vmax.f32 %v1008_v16, 0.0  ;;  %v1275_v26 = vadd.f32 %v2782_v22, %v3075_v6  ;;  %v1011_v27 = vadd.f32 %v3075_v6, %v1010_v23  ;;  %v1266_v28 = vpop.f32.mrb[35].mxu1 }
 0x12a   : > { %v2519_v29 = vpack.c.bf16 %v1424_v19, %v1424_v19  ;;  %v1486_v30 = vmax.f32 %v1264_v20, 0.0  ;;  %v1425_v31 = vmax.f32 %v1019_v21, 0.0  ;;  %v1267_v32 = vadd.f32 %v3075_v6, %v1266_v28 }
 0x12b   : > { %v2583_v33 = vpack.c.bf16 %v1488_v24, %v1488_v24  ;;  %v2517_v34 = vpack.c.bf16 %v1422_v25, %v1422_v25  ;;  %v1489_v35 = vmax.f32 %v1275_v26, 0.0  ;;  %v1423_v36 = vmax.f32 %v1011_v27, 0.0 }
 0x12c   : > { %2065 = vst.msk [vmem:[%s3087_s27 + $0x88] sm:$0xf] %vm2030_vm3, %v2519_v29  ;;  %v2581_v37 = vpack.c.bf16 %v1486_v30, %v1486_v30  ;;  %v2520_v38 = vpack.c.bf16 %v1425_v31, %v1425_v31  ;;  %v1487_v39 = vmax.f32 %v1267_v32, 0.0 }
 0x12d   : > { %2129 = vst.msk [vmem:[%s3087_s27 + $0x188] sm:$0xf] %vm2030_vm3, %v2583_v33  ;;  %2063 = vst.msk [vmem:[%s3087_s27 + $0x80] sm:$0xf] %vm2030_vm3, %v2517_v34  ;;  %v2584_v40 = vpack.c.bf16 %v1489_v35, %v1489_v35  ;;  %v2518_v41 = vpack.c.bf16 %v1423_v36, %v1423_v36  ;;  %v2721_v42 = vpop.f32.mrb[36].mxu0 }
 0x12e   : > { %2127 = vst.msk [vmem:[%s3087_s27 + $0x180] sm:$0xf] %vm2030_vm3, %v2581_v37  ;;  %2066 = vst.msk [vmem:[%s3087_s27 + $0x8c] sm:$0xf] %vm2030_vm3, %v2520_v38  ;;  %v2582_v43 = vpack.c.bf16 %v1487_v39, %v1487_v39  ;;  %v1032_v44 = vadd.f32 %v2721_v42, %v3075_v6  ;;  %v2785_v45 = vpop.f32.mrb[36].mxu1  ;;  %v1023_v46 = vpop.f32.mrb[37].mxu0 }
 0x12f   : > { %2130 = vst.msk [vmem:[%s3087_s27 + $0x18c] sm:$0xf] %vm2030_vm3, %v2584_v40  ;;  %2064 = vst.msk [vmem:[%s3087_s27 + $0x84] sm:$0xf] %vm2030_vm3, %v2518_v41  ;;  %v1288_v47 = vadd.f32 %v2785_v45, %v3075_v6  ;;  %v1024_v48 = vadd.f32 %v3075_v6, %v1023_v46  ;;  %v1279_v49 = vpop.f32.mrb[37].mxu1  ;;  %v2722_v50 = vpop.f32.mrb[38].mxu0 }
 0x130   : > { %2128 = vst.msk [vmem:[%s3087_s27 + $0x184] sm:$0xf] %vm2030_vm3, %v2582_v43  ;;  %v1428_v51 = vmax.f32 %v1032_v44, 0.0  ;;  %v1280_v52 = vadd.f32 %v3075_v6, %v1279_v49  ;;  %v1035_v53 = vadd.f32 %v2722_v50, %v3075_v6  ;;  %v2786_v54 = vpop.f32.mrb[38].mxu1  ;;  %v1026_v55 = vpop.f32.mrb[39].mxu0 }
 0x131   : > { %v1492_v56 = vmax.f32 %v1288_v47, 0.0  ;;  %v1426_v57 = vmax.f32 %v1024_v48, 0.0  ;;  %v1291_v58 = vadd.f32 %v2786_v54, %v3075_v6  ;;  %v1027_v59 = vadd.f32 %v3075_v6, %v1026_v55  ;;  %v1282_v60 = vpop.f32.mrb[39].mxu1 }
 0x132   : > { %v2523_v61 = vpack.c.bf16 %v1428_v51, %v1428_v51  ;;  %v1490_v62 = vmax.f32 %v1280_v52, 0.0  ;;  %v1429_v63 = vmax.f32 %v1035_v53, 0.0  ;;  %v1283_v0 = vadd.f32 %v3075_v6, %v1282_v60 }
 0x133   : > { %v2587_v1 = vpack.c.bf16 %v1492_v56, %v1492_v56  ;;  %v2521_v2 = vpack.c.bf16 %v1426_v57, %v1426_v57  ;;  %v1493_v3 = vmax.f32 %v1291_v58, 0.0  ;;  %v1427_v4 = vmax.f32 %v1027_v59, 0.0 }
 0x134   : > { %2069 = vst.msk [vmem:[%s3087_s27 + $0x98] sm:$0xf] %vm2030_vm3, %v2523_v61  ;;  %v2585_v5 = vpack.c.bf16 %v1490_v62, %v1490_v62  ;;  %v2524_v7 = vpack.c.bf16 %v1429_v63, %v1429_v63  ;;  %v1491_v8 = vmax.f32 %v1283_v0, 0.0 }
 0x135   : > { %2133 = vst.msk [vmem:[%s3087_s27 + $0x198] sm:$0xf] %vm2030_vm3, %v2587_v1  ;;  %2067 = vst.msk [vmem:[%s3087_s27 + $0x90] sm:$0xf] %vm2030_vm3, %v2521_v2  ;;  %v2588_v9 = vpack.c.bf16 %v1493_v3, %v1493_v3  ;;  %v2522_v10 = vpack.c.bf16 %v1427_v4, %v1427_v4  ;;  %v2725_v11 = vpop.f32.mrb[40].mxu0 }
 0x136   : > { %2131 = vst.msk [vmem:[%s3087_s27 + $0x190] sm:$0xf] %vm2030_vm3, %v2585_v5  ;;  %2070 = vst.msk [vmem:[%s3087_s27 + $0x9c] sm:$0xf] %vm2030_vm3, %v2524_v7  ;;  %v2586_v12 = vpack.c.bf16 %v1491_v8, %v1491_v8  ;;  %v1048_v13 = vadd.f32 %v2725_v11, %v3075_v6  ;;  %v2789_v14 = vpop.f32.mrb[40].mxu1  ;;  %v1039_v15 = vpop.f32.mrb[41].mxu0 }
 0x137   : > { %2134 = vst.msk [vmem:[%s3087_s27 + $0x19c] sm:$0xf] %vm2030_vm3, %v2588_v9  ;;  %2068 = vst.msk [vmem:[%s3087_s27 + $0x94] sm:$0xf] %vm2030_vm3, %v2522_v10  ;;  %v1304_v16 = vadd.f32 %v2789_v14, %v3075_v6  ;;  %v1040_v17 = vadd.f32 %v3075_v6, %v1039_v15  ;;  %v1295_v18 = vpop.f32.mrb[41].mxu1  ;;  %v2726_v19 = vpop.f32.mrb[42].mxu0 }
 0x138   : > { %2132 = vst.msk [vmem:[%s3087_s27 + $0x194] sm:$0xf] %vm2030_vm3, %v2586_v12  ;;  %v1432_v20 = vmax.f32 %v1048_v13, 0.0  ;;  %v1296_v21 = vadd.f32 %v3075_v6, %v1295_v18  ;;  %v1051_v22 = vadd.f32 %v2726_v19, %v3075_v6  ;;  %v2790_v23 = vpop.f32.mrb[42].mxu1  ;;  %v1042_v24 = vpop.f32.mrb[43].mxu0 }
 0x139   : > { %v1496_v25 = vmax.f32 %v1304_v16, 0.0  ;;  %v1430_v26 = vmax.f32 %v1040_v17, 0.0  ;;  %v1307_v27 = vadd.f32 %v2790_v23, %v3075_v6  ;;  %v1043_v28 = vadd.f32 %v3075_v6, %v1042_v24  ;;  %v1298_v29 = vpop.f32.mrb[43].mxu1 }
 0x13a   : > { %v2527_v30 = vpack.c.bf16 %v1432_v20, %v1432_v20  ;;  %v1494_v31 = vmax.f32 %v1296_v21, 0.0  ;;  %v1433_v32 = vmax.f32 %v1051_v22, 0.0  ;;  %v1299_v33 = vadd.f32 %v3075_v6, %v1298_v29 }
 0x13b   : > { %v2591_v34 = vpack.c.bf16 %v1496_v25, %v1496_v25  ;;  %v2525_v35 = vpack.c.bf16 %v1430_v26, %v1430_v26  ;;  %v1497_v36 = vmax.f32 %v1307_v27, 0.0  ;;  %v1431_v37 = vmax.f32 %v1043_v28, 0.0 }
 0x13c   : > { %2073 = vst.msk [vmem:[%s3087_s27 + $0xa8] sm:$0xf] %vm2030_vm3, %v2527_v30  ;;  %v2589_v38 = vpack.c.bf16 %v1494_v31, %v1494_v31  ;;  %v2528_v39 = vpack.c.bf16 %v1433_v32, %v1433_v32  ;;  %v1495_v40 = vmax.f32 %v1299_v33, 0.0 }
 0x13d   : > { %2137 = vst.msk [vmem:[%s3087_s27 + $0x1a8] sm:$0xf] %vm2030_vm3, %v2591_v34  ;;  %2071 = vst.msk [vmem:[%s3087_s27 + $0xa0] sm:$0xf] %vm2030_vm3, %v2525_v35  ;;  %v2592_v41 = vpack.c.bf16 %v1497_v36, %v1497_v36  ;;  %v2526_v42 = vpack.c.bf16 %v1431_v37, %v1431_v37  ;;  %v2729_v43 = vpop.f32.mrb[44].mxu0 }
 0x13e   : > { %2135 = vst.msk [vmem:[%s3087_s27 + $0x1a0] sm:$0xf] %vm2030_vm3, %v2589_v38  ;;  %2074 = vst.msk [vmem:[%s3087_s27 + $0xac] sm:$0xf] %vm2030_vm3, %v2528_v39  ;;  %v2590_v44 = vpack.c.bf16 %v1495_v40, %v1495_v40  ;;  %v1064_v45 = vadd.f32 %v2729_v43, %v3075_v6  ;;  %v2793_v46 = vpop.f32.mrb[44].mxu1  ;;  %v1055_v47 = vpop.f32.mrb[45].mxu0 }
 0x13f   : > { %2138 = vst.msk [vmem:[%s3087_s27 + $0x1ac] sm:$0xf] %vm2030_vm3, %v2592_v41  ;;  %2072 = vst.msk [vmem:[%s3087_s27 + $0xa4] sm:$0xf] %vm2030_vm3, %v2526_v42  ;;  %v1320_v48 = vadd.f32 %v2793_v46, %v3075_v6  ;;  %v1056_v49 = vadd.f32 %v3075_v6, %v1055_v47  ;;  %v1311_v50 = vpop.f32.mrb[45].mxu1  ;;  %v2730_v51 = vpop.f32.mrb[46].mxu0 }
 0x140   : > { %2136 = vst.msk [vmem:[%s3087_s27 + $0x1a4] sm:$0xf] %vm2030_vm3, %v2590_v44  ;;  %v1436_v52 = vmax.f32 %v1064_v45, 0.0  ;;  %v1312_v53 = vadd.f32 %v3075_v6, %v1311_v50  ;;  %v1067_v54 = vadd.f32 %v2730_v51, %v3075_v6  ;;  %v2794_v55 = vpop.f32.mrb[46].mxu1  ;;  %v1058_v56 = vpop.f32.mrb[47].mxu0 }
 0x141   : > { %v1500_v57 = vmax.f32 %v1320_v48, 0.0  ;;  %v1434_v58 = vmax.f32 %v1056_v49, 0.0  ;;  %v1323_v59 = vadd.f32 %v2794_v55, %v3075_v6  ;;  %v1059_v60 = vadd.f32 %v3075_v6, %v1058_v56  ;;  %v1314_v61 = vpop.f32.mrb[47].mxu1  ;;  %v3393_v45 = vld [vmem:[%s3478_s2] ss:$0 sm:$0xff] }
 0x142   : > { %v2531_v62 = vpack.c.bf16 %v1436_v52, %v1436_v52  ;;  %v1498_v63 = vmax.f32 %v1312_v53, 0.0  ;;  %v1437_v0 = vmax.f32 %v1067_v54, 0.0  ;;  %v1315_v1 = vadd.f32 %v3075_v6, %v1314_v61 }
 0x143   : > { %v2595_v2 = vpack.c.bf16 %v1500_v57, %v1500_v57  ;;  %v2529_v3 = vpack.c.bf16 %v1434_v58, %v1434_v58  ;;  %v1501_v4 = vmax.f32 %v1323_v59, 0.0  ;;  %v1435_v5 = vmax.f32 %v1059_v60, 0.0 }
 0x144   : > { %2077 = vst.msk [vmem:[%s3087_s27 + $0xb8] sm:$0xf] %vm2030_vm3, %v2531_v62  ;;  %v2593_v7 = vpack.c.bf16 %v1498_v63, %v1498_v63  ;;  %v2532_v8 = vpack.c.bf16 %v1437_v0, %v1437_v0  ;;  %v1499_v9 = vmax.f32 %v1315_v1, 0.0 }
 0x145   : > { %2141 = vst.msk [vmem:[%s3087_s27 + $0x1b8] sm:$0xf] %vm2030_vm3, %v2595_v2  ;;  %2075 = vst.msk [vmem:[%s3087_s27 + $0xb0] sm:$0xf] %vm2030_vm3, %v2529_v3  ;;  %v2596_v10 = vpack.c.bf16 %v1501_v4, %v1501_v4  ;;  %v2530_v11 = vpack.c.bf16 %v1435_v5, %v1435_v5  ;;  %v2733_v12 = vpop.f32.mrb[48].mxu0 }
 0x146   : > { %2139 = vst.msk [vmem:[%s3087_s27 + $0x1b0] sm:$0xf] %vm2030_vm3, %v2593_v7  ;;  %2078 = vst.msk [vmem:[%s3087_s27 + $0xbc] sm:$0xf] %vm2030_vm3, %v2532_v8  ;;  %v2594_v13 = vpack.c.bf16 %v1499_v9, %v1499_v9  ;;  %v1080_v14 = vadd.f32 %v2733_v12, %v3075_v6  ;;  %v2797_v15 = vpop.f32.mrb[48].mxu1  ;;  %v1071_v16 = vpop.f32.mrb[49].mxu0 }
 0x147   : > { %2142 = vst.msk [vmem:[%s3087_s27 + $0x1bc] sm:$0xf] %vm2030_vm3, %v2596_v10  ;;  %2076 = vst.msk [vmem:[%s3087_s27 + $0xb4] sm:$0xf] %vm2030_vm3, %v2530_v11  ;;  %v1336_v17 = vadd.f32 %v2797_v15, %v3075_v6  ;;  %v1072_v18 = vadd.f32 %v3075_v6, %v1071_v16  ;;  %v1327_v19 = vpop.f32.mrb[49].mxu1  ;;  %v2734_v20 = vpop.f32.mrb[50].mxu0 }
 0x148   : > { %2140 = vst.msk [vmem:[%s3087_s27 + $0x1b4] sm:$0xf] %vm2030_vm3, %v2594_v13  ;;  %v1440_v21 = vmax.f32 %v1080_v14, 0.0  ;;  %v1328_v22 = vadd.f32 %v3075_v6, %v1327_v19  ;;  %v1083_v23 = vadd.f32 %v2734_v20, %v3075_v6  ;;  %v2798_v24 = vpop.f32.mrb[50].mxu1  ;;  %v1074_v25 = vpop.f32.mrb[51].mxu0 }
 0x149   : > { %v1504_v26 = vmax.f32 %v1336_v17, 0.0  ;;  %v1438_v27 = vmax.f32 %v1072_v18, 0.0  ;;  %v1339_v28 = vadd.f32 %v2798_v24, %v3075_v6  ;;  %v1075_v29 = vadd.f32 %v3075_v6, %v1074_v25  ;;  %v1330_v30 = vpop.f32.mrb[51].mxu1 }
 0x14a   : > { %v2535_v31 = vpack.c.bf16 %v1440_v21, %v1440_v21  ;;  %v1502_v32 = vmax.f32 %v1328_v22, 0.0  ;;  %v1441_v33 = vmax.f32 %v1083_v23, 0.0  ;;  %v1331_v34 = vadd.f32 %v3075_v6, %v1330_v30 }
 0x14b   : > { %v2599_v35 = vpack.c.bf16 %v1504_v26, %v1504_v26  ;;  %v2533_v36 = vpack.c.bf16 %v1438_v27, %v1438_v27  ;;  %v1505_v37 = vmax.f32 %v1339_v28, 0.0  ;;  %v1439_v38 = vmax.f32 %v1075_v29, 0.0 }
 0x14c   : > { %2081 = vst.msk [vmem:[%s3087_s27 + $0xc8] sm:$0xf] %vm2030_vm3, %v2535_v31  ;;  %v2597_v39 = vpack.c.bf16 %v1502_v32, %v1502_v32  ;;  %v2536_v40 = vpack.c.bf16 %v1441_v33, %v1441_v33  ;;  %v1503_v41 = vmax.f32 %v1331_v34, 0.0 }
 0x14d   : > { %2145 = vst.msk [vmem:[%s3087_s27 + $0x1c8] sm:$0xf] %vm2030_vm3, %v2599_v35  ;;  %2079 = vst.msk [vmem:[%s3087_s27 + $0xc0] sm:$0xf] %vm2030_vm3, %v2533_v36  ;;  %v2600_v42 = vpack.c.bf16 %v1505_v37, %v1505_v37  ;;  %v2534_v43 = vpack.c.bf16 %v1439_v38, %v1439_v38  ;;  %v2737_v44 = vpop.f32.mrb[52].mxu0 }
 0x14e   : > { %2143 = vst.msk [vmem:[%s3087_s27 + $0x1c0] sm:$0xf] %vm2030_vm3, %v2597_v39  ;;  %2082 = vst.msk [vmem:[%s3087_s27 + $0xcc] sm:$0xf] %vm2030_vm3, %v2536_v40  ;;  %v2598_v6 = vpack.c.bf16 %v1503_v41, %v1503_v41  ;;  %v1096_v46 = vadd.f32 %v3393_v45, %v2737_v44  ;;  %v2801_v47 = vpop.f32.mrb[52].mxu1  ;;  %v1087_v48 = vpop.f32.mrb[53].mxu0 }
 0x14f   : > { %2146 = vst.msk [vmem:[%s3087_s27 + $0x1cc] sm:$0xf] %vm2030_vm3, %v2600_v42  ;;  %2080 = vst.msk [vmem:[%s3087_s27 + $0xc4] sm:$0xf] %vm2030_vm3, %v2534_v43  ;;  %v1352_v49 = vadd.f32 %v3393_v45, %v2801_v47  ;;  %v1088_v50 = vadd.f32 %v3393_v45, %v1087_v48  ;;  %v1343_v51 = vpop.f32.mrb[53].mxu1  ;;  %v2738_v52 = vpop.f32.mrb[54].mxu0 }
 0x150   : > { %2144 = vst.msk [vmem:[%s3087_s27 + $0x1c4] sm:$0xf] %vm2030_vm3, %v2598_v6  ;;  %v1444_v53 = vmax.f32 %v1096_v46, 0.0  ;;  %v1344_v54 = vadd.f32 %v3393_v45, %v1343_v51  ;;  %v1099_v55 = vadd.f32 %v3393_v45, %v2738_v52  ;;  %v2802_v56 = vpop.f32.mrb[54].mxu1  ;;  %v1090_v57 = vpop.f32.mrb[55].mxu0 }
 0x151   : > { %v1508_v58 = vmax.f32 %v1352_v49, 0.0  ;;  %v1442_v59 = vmax.f32 %v1088_v50, 0.0  ;;  %v1355_v60 = vadd.f32 %v3393_v45, %v2802_v56  ;;  %v1091_v61 = vadd.f32 %v3393_v45, %v1090_v57  ;;  %v1346_v62 = vpop.f32.mrb[55].mxu1 }
 0x152   : > { %v2539_v63 = vpack.c.bf16 %v1444_v53, %v1444_v53  ;;  %v1506_v0 = vmax.f32 %v1344_v54, 0.0  ;;  %v1445_v1 = vmax.f32 %v1099_v55, 0.0  ;;  %v1347_v2 = vadd.f32 %v3393_v45, %v1346_v62 }
 0x153   : > { %v2603_v3 = vpack.c.bf16 %v1508_v58, %v1508_v58  ;;  %v2537_v4 = vpack.c.bf16 %v1442_v59, %v1442_v59  ;;  %v1509_v5 = vmax.f32 %v1355_v60, 0.0  ;;  %v1443_v7 = vmax.f32 %v1091_v61, 0.0 }
 0x154   : > { %2085 = vst.msk [vmem:[%s3087_s27 + $0xd8] sm:$0xf] %vm2030_vm3, %v2539_v63  ;;  %v2601_v8 = vpack.c.bf16 %v1506_v0, %v1506_v0  ;;  %v2540_v9 = vpack.c.bf16 %v1445_v1, %v1445_v1  ;;  %v1507_v10 = vmax.f32 %v1347_v2, 0.0 }
 0x155   : > { %2149 = vst.msk [vmem:[%s3087_s27 + $0x1d8] sm:$0xf] %vm2030_vm3, %v2603_v3  ;;  %2083 = vst.msk [vmem:[%s3087_s27 + $0xd0] sm:$0xf] %vm2030_vm3, %v2537_v4  ;;  %v2604_v11 = vpack.c.bf16 %v1509_v5, %v1509_v5  ;;  %v2538_v12 = vpack.c.bf16 %v1443_v7, %v1443_v7  ;;  %v2741_v13 = vpop.f32.mrb[56].mxu0 }
 0x156   : > { %2147 = vst.msk [vmem:[%s3087_s27 + $0x1d0] sm:$0xf] %vm2030_vm3, %v2601_v8  ;;  %2086 = vst.msk [vmem:[%s3087_s27 + $0xdc] sm:$0xf] %vm2030_vm3, %v2540_v9  ;;  %v2602_v14 = vpack.c.bf16 %v1507_v10, %v1507_v10  ;;  %v1112_v15 = vadd.f32 %v3393_v45, %v2741_v13  ;;  %v2805_v16 = vpop.f32.mrb[56].mxu1  ;;  %v1103_v17 = vpop.f32.mrb[57].mxu0 }
 0x157   : > { %2150 = vst.msk [vmem:[%s3087_s27 + $0x1dc] sm:$0xf] %vm2030_vm3, %v2604_v11  ;;  %2084 = vst.msk [vmem:[%s3087_s27 + $0xd4] sm:$0xf] %vm2030_vm3, %v2538_v12  ;;  %v1368_v18 = vadd.f32 %v3393_v45, %v2805_v16  ;;  %v1104_v19 = vadd.f32 %v3393_v45, %v1103_v17  ;;  %v1359_v20 = vpop.f32.mrb[57].mxu1  ;;  %v2742_v21 = vpop.f32.mrb[58].mxu0 }
 0x158   : > { %2148 = vst.msk [vmem:[%s3087_s27 + $0x1d4] sm:$0xf] %vm2030_vm3, %v2602_v14  ;;  %v1448_v22 = vmax.f32 %v1112_v15, 0.0  ;;  %v1360_v23 = vadd.f32 %v3393_v45, %v1359_v20  ;;  %v1115_v24 = vadd.f32 %v3393_v45, %v2742_v21  ;;  %v2806_v25 = vpop.f32.mrb[58].mxu1  ;;  %v1106_v26 = vpop.f32.mrb[59].mxu0 }
 0x159   : > { %v1512_v27 = vmax.f32 %v1368_v18, 0.0  ;;  %v1446_v28 = vmax.f32 %v1104_v19, 0.0  ;;  %v1371_v29 = vadd.f32 %v3393_v45, %v2806_v25  ;;  %v1107_v30 = vadd.f32 %v3393_v45, %v1106_v26  ;;  %v1362_v31 = vpop.f32.mrb[59].mxu1 }
 0x15a   : > { %v2543_v32 = vpack.c.bf16 %v1448_v22, %v1448_v22  ;;  %v1510_v33 = vmax.f32 %v1360_v23, 0.0  ;;  %v1449_v34 = vmax.f32 %v1115_v24, 0.0  ;;  %v1363_v35 = vadd.f32 %v3393_v45, %v1362_v31 }
 0x15b   : > { %v2607_v36 = vpack.c.bf16 %v1512_v27, %v1512_v27  ;;  %v2541_v37 = vpack.c.bf16 %v1446_v28, %v1446_v28  ;;  %v1513_v38 = vmax.f32 %v1371_v29, 0.0  ;;  %v1447_v39 = vmax.f32 %v1107_v30, 0.0 }
 0x15c   : > { %2089 = vst.msk [vmem:[%s3087_s27 + $0xe8] sm:$0xf] %vm2030_vm3, %v2543_v32  ;;  %v2605_v40 = vpack.c.bf16 %v1510_v33, %v1510_v33  ;;  %v2544_v41 = vpack.c.bf16 %v1449_v34, %v1449_v34  ;;  %v1511_v42 = vmax.f32 %v1363_v35, 0.0 }
 0x15d   : > { %2153 = vst.msk [vmem:[%s3087_s27 + $0x1e8] sm:$0xf] %vm2030_vm3, %v2607_v36  ;;  %2087 = vst.msk [vmem:[%s3087_s27 + $0xe0] sm:$0xf] %vm2030_vm3, %v2541_v37  ;;  %v2608_v43 = vpack.c.bf16 %v1513_v38, %v1513_v38  ;;  %v2542_v44 = vpack.c.bf16 %v1447_v39, %v1447_v39  ;;  %v2745_v6 = vpop.f32.mrb[60].mxu0 }
 0x15e   : > { %2151 = vst.msk [vmem:[%s3087_s27 + $0x1e0] sm:$0xf] %vm2030_vm3, %v2605_v40  ;;  %2090 = vst.msk [vmem:[%s3087_s27 + $0xec] sm:$0xf] %vm2030_vm3, %v2544_v41  ;;  %v2606_v46 = vpack.c.bf16 %v1511_v42, %v1511_v42  ;;  %v1128_v47 = vadd.f32 %v3393_v45, %v2745_v6  ;;  %v2809_v48 = vpop.f32.mrb[60].mxu1  ;;  %v1119_v49 = vpop.f32.mrb[61].mxu0 }
 0x15f   : > { %2154 = vst.msk [vmem:[%s3087_s27 + $0x1ec] sm:$0xf] %vm2030_vm3, %v2608_v43  ;;  %2088 = vst.msk [vmem:[%s3087_s27 + $0xe4] sm:$0xf] %vm2030_vm3, %v2542_v44  ;;  %v1384_v50 = vadd.f32 %v3393_v45, %v2809_v48  ;;  %v1120_v51 = vadd.f32 %v3393_v45, %v1119_v49  ;;  %v1375_v52 = vpop.f32.mrb[61].mxu1  ;;  %v2746_v53 = vpop.f32.mrb[62].mxu0 }
 0x160   : > { %2152 = vst.msk [vmem:[%s3087_s27 + $0x1e4] sm:$0xf] %vm2030_vm3, %v2606_v46  ;;  %v1452_v54 = vmax.f32 %v1128_v47, 0.0  ;;  %v1376_v55 = vadd.f32 %v3393_v45, %v1375_v52  ;;  %v1131_v56 = vadd.f32 %v3393_v45, %v2746_v53  ;;  %v2810_v57 = vpop.f32.mrb[62].mxu1  ;;  %v1122_v58 = vpop.f32.mrb[63].mxu0 }
 0x161   : > { %v1516_v59 = vmax.f32 %v1384_v50, 0.0  ;;  %v1450_v60 = vmax.f32 %v1120_v51, 0.0  ;;  %v1387_v61 = vadd.f32 %v3393_v45, %v2810_v57  ;;  %v1123_v62 = vadd.f32 %v3393_v45, %v1122_v58  ;;  %v1378_v63 = vpop.f32.mrb[63].mxu1 }
 0x162   : > { %v2547_v0 = vpack.c.bf16 %v1452_v54, %v1452_v54  ;;  %v1514_v1 = vmax.f32 %v1376_v55, 0.0  ;;  %v1453_v2 = vmax.f32 %v1131_v56, 0.0  ;;  %v1379_v3 = vadd.f32 %v3393_v45, %v1378_v63 }
 0x163   : > { %v2611_v4 = vpack.c.bf16 %v1516_v59, %v1516_v59  ;;  %v2545_v5 = vpack.c.bf16 %v1450_v60, %v1450_v60  ;;  %v1517_v7 = vmax.f32 %v1387_v61, 0.0  ;;  %v1451_v8 = vmax.f32 %v1123_v62, 0.0 }
 0x164   : > { %2093 = vst.msk [vmem:[%s3087_s27 + $0xf8] sm:$0xf] %vm2030_vm3, %v2547_v0  ;;  %v2609_v9 = vpack.c.bf16 %v1514_v1, %v1514_v1  ;;  %v2548_v10 = vpack.c.bf16 %v1453_v2, %v1453_v2  ;;  %v1515_v11 = vmax.f32 %v1379_v3, 0.0 }
 0x165   : > { %2157 = vst.msk [vmem:[%s3087_s27 + $0x1f8] sm:$0xf] %vm2030_vm3, %v2611_v4  ;;  %2091 = vst.msk [vmem:[%s3087_s27 + $0xf0] sm:$0xf] %vm2030_vm3, %v2545_v5  ;;  %v2612_v12 = vpack.c.bf16 %v1517_v7, %v1517_v7  ;;  %v2546_v13 = vpack.c.bf16 %v1451_v8, %v1451_v8 }
 0x166   : > { %2155 = vst.msk [vmem:[%s3087_s27 + $0x1f0] sm:$0xf] %vm2030_vm3, %v2609_v9  ;;  %2094 = vst.msk [vmem:[%s3087_s27 + $0xfc] sm:$0xf] %vm2030_vm3, %v2548_v10  ;;  %v2610_v45 = vpack.c.bf16 %v1515_v11, %v1515_v11 }
 0x167   : > { %2158 = vst.msk [vmem:[%s3087_s27 + $0x1fc] sm:$0xf] %vm2030_vm3, %v2612_v12  ;;  %2092 = vst.msk [vmem:[%s3087_s27 + $0xf4] sm:$0xf] %vm2030_vm3, %v2546_v13 }
 0x168   : > { %2156 = vst.msk [vmem:[%s3087_s27 + $0x1f4] sm:$0xf] %vm2030_vm3, %v2610_v45 }
 0x169 PF: > { %s13_s12 = sadd.s32 1, %s2897_s12  }
 0x16a   : > { %p10_p4 = scmp.ge.s32.totalorder %s13_s12, 6  }
 0x16c   :  { %12 = sbr.rel (!%p10_p4) target bundleno = 1 (0x1), region = 62 }

// kernel: refnet_forward.11
= control target key start
LH: loop header
LB: loop body
LE: loop exit
PB: predicated region body
PF: predicated region fallthrough
CT: control target
= control target key end

     0   :  { %s1844_s12 = smov 0   ;;  %s2189_s0 = inlined_call_operand.vmem [shape: bf16[1024,144], index: 0, kind: input, shape index: {}]   ;;  %s2190_s1 = inlined_call_operand.vmem [shape: bf16[144,32], index: 1, kind: input, shape index: {}]   ;;  %s2191_s2 = inlined_call_operand.vmem [shape: f32[1,32], index: 2, kind: input, shape index: {}]   ;;  %s2192_s3 = inlined_call_operand.vmem [shape: bf16[1024,32], index: 3, kind: output, shape index: {}]  }
   0x1 LB: > { %s1436_s13 = sadd.s32 4294967295, %s1821_s12   ;;  %p1440_p0 = scmp.ge.s32.totalorder %s1821_s12, 1  ;;  %s1821_s12 = sphi %s1844_s12, %s13_s12  }
   0x2   : > { %p139_p1 = scmp.lt.s32.totalorder %s1821_s12, 3 }
   0x4   : > { %p140_p2 = pnand %p1440_p0, %p139_p1 }
   0x5   : > { %v1710_v0 = vld [vmem:[%s2190_s1] sm:$0xff] (!%p140_p2)   ;;  %v1823_v1 = vmov (!%p140_p2), 0   ;;  %s1441_s16 = sshll.u32 (!%p140_p2), %s1436_s13, 6  ;;  %v1711_v2 = vld [vmem:[%s2190_s1 + $0x8] sm:$0xff] (!%p140_p2)   ;;  %v1712_v3 = vld [vmem:[%s2190_s1 + $0x10] sm:$0xff] (!%p140_p2)   ;;  %vm609_vm0 = vcmask (!%p140_p2), 130048  }
   0x6   : > { %143 = sbr.rel (%p140_p2) target bundleno = 383 (0x17f), region = 32  ;;  %706 = vmatprep.subr.bf16.mxu0 (!%p140_p2), %v1823_v1  ;;  %1683 = vmatprep.subr.bf16.mxu1 (!%p140_p2), %v1823_v1  ;;  %p165_p3 = scmp.lt.s32.totalorder (!%p140_p2), %s1441_s16, 127  ;;  %v1713_v4 = vld [vmem:[%s2190_s1 + $0x18] sm:$0xff] (!%p140_p2)   ;;  %v1714_v7 = vld [vmem:[%s2190_s1 + $0x20] sm:$0xff] (!%p140_p2)   ;;  %v1715_v8 = vld [vmem:[%s2190_s1 + $0x28] sm:$0xff] (!%p140_p2)   ;;  %vm1315_vm1 = vcmask (!%p140_p2), 257024  }
   0x7   : > { %707 = vmatpush1.bf16.msra.mxu0 (!%p140_p2), %v1710_v0  ;;  %1692 = vmatpush1.bf16.msra.mxu1 (!%p140_p2), %v1710_v0  ;;  %v1716_v9 = vld [vmem:[%s2190_s1 + $0x30] sm:$0xff] (!%p140_p2)   ;;  %v1717_v10 = vld [vmem:[%s2190_s1 + $0x38] sm:$0xff] (!%p140_p2)   ;;  %v1718_v11 = vld [vmem:[%s2190_s1 + $0x40] sm:$0xff] (!%p140_p2)  }
   0x8   : > { %708 = vmatprep.subr.bf16.mxu0 (!%p140_p2), %v1823_v1  ;;  %1684 = vmatprep.subr.bf16.mxu1 (!%p140_p2), %v1823_v1 }
   0xb   : > { %709 = vmatpush1.bf16.msra.mxu0 (!%p140_p2), %v1711_v2  ;;  %1693 = vmatpush1.bf16.msra.mxu1 (!%p140_p2), %v1711_v2 }
   0xc   : > { %710 = vmatprep.subr.bf16.mxu0 (!%p140_p2), %v1823_v1  ;;  %1685 = vmatprep.subr.bf16.mxu1 (!%p140_p2), %v1823_v1 }
   0xd   : > { %s2194_s16 = smov (!%p165_p3, %s1441_s16), 127 }
   0xe   : > { %s1618_s21 = sshll.u32 %s2194_s16, 3  ;;  %s1445_s13 = sshll.u32 %s2194_s16, 2 }
   0xf   : > { %s1867_s24 = scalar_lea.vmem %s2189_s0, %s1618_s21  ;;  %711 = vmatpush1.bf16.msra.mxu0 %v1712_v3  ;;  %1694 = vmatpush1.bf16.msra.mxu1 %v1712_v3  ;;  %s1996_s16 = scalar_lea.vmem %s2192_s3, %s1445_s13 }
  0x10   : > { %v1721_v5 = vld [vmem:[%s1867_s24 + $0x4] ss:$8 sps:$4 sm:$0xff]   ;;  %712 = vmatprep.subr.bf16.mxu0 %v1823_v1  ;;  %1686 = vmatprep.subr.bf16.mxu1 %v1823_v1  ;;  %v1719_v12 = vld [vmem:[%s1867_s24] ss:$8 sps:$4 sm:$0xff]   ;;  %v1725_v14 = vld [vmem:[%s1867_s24 + $0x14] ss:$8 sps:$4 sm:$0xff]  }
  0x11   : > { %v1724_v6 = vld [vmem:[%s1867_s24 + $0x104] ss:$8 sps:$4 sm:$0xff]   ;;  %1520 = vmatprep.mubr.msk.bf16.mxu0 %vm609_vm0, %v1721_v5  ;;  %v1722_v13 = vld [vmem:[%s1867_s24 + $0x100] ss:$8 sps:$4 sm:$0xff]   ;;  %v1727_v15 = vld [vmem:[%s1867_s24 + $0x114] ss:$8 sps:$4 sm:$0xff]  }
  0x12   : > { %1536 = vmatprep.mubr.msk.bf16.mxu1 %vm609_vm0, %v1724_v6  ;;  %v1729_v16 = vld [vmem:[%s1867_s24 + $0x10] ss:$8 sps:$4 sm:$0xff]   ;;  %v1731_v18 = vld [vmem:[%s1867_s24 + $0x24] ss:$8 sps:$4 sm:$0xff]   ;;  %v1735_v20 = vld [vmem:[%s1867_s24 + $0x20] ss:$8 sps:$4 sm:$0xff]  }
  0x13   : > { %713 = vmatpush1.bf16.msra.mxu0 %v1713_v4  ;;  %1695 = vmatpush1.bf16.msra.mxu1 %v1713_v4  ;;  %v1730_v17 = vld [vmem:[%s1867_s24 + $0x110] ss:$8 sps:$4 sm:$0xff]   ;;  %v1733_v19 = vld [vmem:[%s1867_s24 + $0x124] ss:$8 sps:$4 sm:$0xff]   ;;  %v1736_v21 = vld [vmem:[%s1867_s24 + $0x120] ss:$8 sps:$4 sm:$0xff]  }
  0x14   : > { %714 = vmatprep.subr.bf16.mxu0 %v1823_v1  ;;  %1687 = vmatprep.subr.bf16.mxu1 %v1823_v1  ;;  %v1737_v22 = vld [vmem:[%s1867_s24 + $0x34] ss:$8 sps:$4 sm:$0xff]   ;;  %v1741_v24 = vld [vmem:[%s1867_s24 + $0x30] ss:$8 sps:$4 sm:$0xff]   ;;  %v1743_v26 = vld [vmem:[%s1867_s24 + $0x44] ss:$8 sps:$4 sm:$0xff]  }
  0x15   : > { %v1739_v23 = vld [vmem:[%s1867_s24 + $0x134] ss:$8 sps:$4 sm:$0xff]   ;;  %v1742_v25 = vld [vmem:[%s1867_s24 + $0x130] ss:$8 sps:$4 sm:$0xff]   ;;  %v1745_v27 = vld [vmem:[%s1867_s24 + $0x144] ss:$8 sps:$4 sm:$0xff]  }
  0x16   : > { %v1747_v28 = vld [vmem:[%s1867_s24 + $0x40] ss:$8 sps:$4 sm:$0xff]   ;;  %v1749_v30 = vld [vmem:[%s1867_s24 + $0x54] ss:$8 sps:$4 sm:$0xff]   ;;  %v1753_v32 = vld [vmem:[%s1867_s24 + $0x50] ss:$8 sps:$4 sm:$0xff]  }
  0x17   : > { %715 = vmatpush1.bf16.msra.mxu0 %v1714_v7  ;;  %1696 = vmatpush1.bf16.msra.mxu1 %v1714_v7  ;;  %v1748_v29 = vld [vmem:[%s1867_s24 + $0x140] ss:$8 sps:$4 sm:$0xff]   ;;  %v1751_v31 = vld [vmem:[%s1867_s24 + $0x154] ss:$8 sps:$4 sm:$0xff]   ;;  %v1754_v33 = vld [vmem:[%s1867_s24 + $0x150] ss:$8 sps:$4 sm:$0xff]  }
  0x18   : > { %716 = vmatprep.subr.bf16.mxu0 %v1823_v1  ;;  %1688 = vmatprep.subr.bf16.mxu1 %v1823_v1  ;;  %v1755_v34 = vld [vmem:[%s1867_s24 + $0x64] ss:$8 sps:$4 sm:$0xff]   ;;  %v1759_v36 = vld [vmem:[%s1867_s24 + $0x60] ss:$8 sps:$4 sm:$0xff]   ;;  %v1761_v38 = vld [vmem:[%s1867_s24 + $0x74] ss:$8 sps:$4 sm:$0xff]  }
  0x19   : > { %v1757_v35 = vld [vmem:[%s1867_s24 + $0x164] ss:$8 sps:$4 sm:$0xff]   ;;  %v1760_v37 = vld [vmem:[%s1867_s24 + $0x160] ss:$8 sps:$4 sm:$0xff]   ;;  %v1763_v39 = vld [vmem:[%s1867_s24 + $0x174] ss:$8 sps:$4 sm:$0xff]  }
  0x1a   : > { %v1765_v40 = vld [vmem:[%s1867_s24 + $0x70] ss:$8 sps:$4 sm:$0xff]   ;;  %v1767_v42 = vld [vmem:[%s1867_s24 + $0x84] ss:$8 sps:$4 sm:$0xff]   ;;  %v1771_v44 = vld [vmem:[%s1867_s24 + $0x80] ss:$8 sps:$4 sm:$0xff]  }
  0x1b   : > { %717 = vmatpush1.bf16.msra.mxu0 %v1715_v8  ;;  %1697 = vmatpush1.bf16.msra.mxu1 %v1715_v8  ;;  %v1766_v41 = vld [vmem:[%s1867_s24 + $0x170] ss:$8 sps:$4 sm:$0xff]   ;;  %v1769_v43 = vld [vmem:[%s1867_s24 + $0x184] ss:$8 sps:$4 sm:$0xff]   ;;  %v1772_v45 = vld [vmem:[%s1867_s24 + $0x180] ss:$8 sps:$4 sm:$0xff]  }
  0x1c   : > { %718 = vmatprep.subr.bf16.mxu0 %v1823_v1  ;;  %1689 = vmatprep.subr.bf16.mxu1 %v1823_v1  ;;  %v1773_v46 = vld [vmem:[%s1867_s24 + $0x94] ss:$8 sps:$4 sm:$0xff]   ;;  %v1777_v48 = vld [vmem:[%s1867_s24 + $0x90] ss:$8 sps:$4 sm:$0xff]   ;;  %v1779_v50 = vld [vmem:[%s1867_s24 + $0xa4] ss:$8 sps:$4 sm:$0xff]  }
  0x1d   : > { %v1775_v47 = vld [vmem:[%s1867_s24 + $0x194] ss:$8 sps:$4 sm:$0xff]   ;;  %v1778_v49 = vld [vmem:[%s1867_s24 + $0x190] ss:$8 sps:$4 sm:$0xff]   ;;  %v1781_v51 = vld [vmem:[%s1867_s24 + $0x1a4] ss:$8 sps:$4 sm:$0xff]  }
  0x1e   : > { %v1783_v52 = vld [vmem:[%s1867_s24 + $0xa0] ss:$8 sps:$4 sm:$0xff]   ;;  %v1785_v54 = vld [vmem:[%s1867_s24 + $0xb4] ss:$8 sps:$4 sm:$0xff]   ;;  %v1789_v56 = vld [vmem:[%s1867_s24 + $0xb0] ss:$8 sps:$4 sm:$0xff]  }
  0x1f   : > { %719 = vmatpush1.bf16.msra.mxu0 %v1716_v9  ;;  %1698 = vmatpush1.bf16.msra.mxu1 %v1716_v9  ;;  %v1784_v53 = vld [vmem:[%s1867_s24 + $0x1a0] ss:$8 sps:$4 sm:$0xff]   ;;  %v1787_v55 = vld [vmem:[%s1867_s24 + $0x1b4] ss:$8 sps:$4 sm:$0xff]   ;;  %v1790_v57 = vld [vmem:[%s1867_s24 + $0x1b0] ss:$8 sps:$4 sm:$0xff]  }
  0x20   : > { %720 = vmatprep.subr.bf16.mxu0 %v1823_v1  ;;  %1690 = vmatprep.subr.bf16.mxu1 %v1823_v1  ;;  %v1791_v58 = vld [vmem:[%s1867_s24 + $0xc4] ss:$8 sps:$4 sm:$0xff]   ;;  %v1795_v60 = vld [vmem:[%s1867_s24 + $0xc0] ss:$8 sps:$4 sm:$0xff]   ;;  %v1797_v62 = vld [vmem:[%s1867_s24 + $0xd4] ss:$8 sps:$4 sm:$0xff]  }
  0x21   : > { %v1793_v59 = vld [vmem:[%s1867_s24 + $0x1c4] ss:$8 sps:$4 sm:$0xff]   ;;  %v1796_v61 = vld [vmem:[%s1867_s24 + $0x1c0] ss:$8 sps:$4 sm:$0xff]   ;;  %v1799_v63 = vld [vmem:[%s1867_s24 + $0x1d4] ss:$8 sps:$4 sm:$0xff]  }
  0x22   : > { %v1801_v0 = vld [vmem:[%s1867_s24 + $0xd0] ss:$8 sps:$4 sm:$0xff]   ;;  %v1803_v2 = vld [vmem:[%s1867_s24 + $0xe4] ss:$8 sps:$4 sm:$0xff]   ;;  %v1807_v4 = vld [vmem:[%s1867_s24 + $0xe0] ss:$8 sps:$4 sm:$0xff]  }
  0x23   : > { %721 = vmatpush1.bf16.msra.mxu0 %v1717_v10  ;;  %1699 = vmatpush1.bf16.msra.mxu1 %v1717_v10  ;;  %v1805_v3 = vld [vmem:[%s1867_s24 + $0x1e4] ss:$8 sps:$4 sm:$0xff]   ;;  %v1808_v5 = vld [vmem:[%s1867_s24 + $0x1e0] ss:$8 sps:$4 sm:$0xff]   ;;  %v1809_v6 = vld [vmem:[%s1867_s24 + $0xf4] ss:$8 sps:$4 sm:$0xff]  }
  0x24   : > { %722 = vmatprep.subr.bf16.mxu0 %v1823_v1  ;;  %1691 = vmatprep.subr.bf16.mxu1 %v1823_v1  ;;  %v1802_v1 = vld [vmem:[%s1867_s24 + $0x1d0] ss:$8 sps:$4 sm:$0xff]   ;;  %v1811_v7 = vld [vmem:[%s1867_s24 + $0x1f4] ss:$8 sps:$4 sm:$0xff]   ;;  %v1986_v10 = vld [vmem:[%s2191_s2] ss:$0 sm:$0xff] }
  0x25   : > { %v1813_v8 = vld [vmem:[%s1867_s24 + $0xf0] ss:$8 sps:$4 sm:$0xff]  }
  0x26   : > { %v1814_v9 = vld [vmem:[%s1867_s24 + $0x1f0] ss:$8 sps:$4 sm:$0xff]  }
  0x27   : > { %723 = vmatpush1.bf16.msra.mxu0 %v1718_v11  ;;  %1700 = vmatpush1.bf16.msra.mxu1 %v1718_v11 }
  0x2a   : > { %739 = vmatmul.mubr.bf16.vlgmr.msra.gmra.mrb[0].mxu0 %v1719_v12  ;;  %867 = vmatmul.mubr.bf16.vlgmr.msra.gmra.mrb[0].mxu1 %v1722_v13 }
  0x2b   : > { %1521 = vmatprep.mubr.msk.bf16.mxu0 %vm609_vm0, %v1725_v14  ;;  %1537 = vmatprep.mubr.msk.bf16.mxu1 %vm609_vm0, %v1727_v15 }
  0x32   : > { %747 = vmatmul.mubr.bf16.gmra.mrb[4].mxu0 %v1729_v16  ;;  %875 = vmatmul.mubr.bf16.gmra.mrb[4].mxu1 %v1730_v17 }
  0x33   : > { %1522 = vmatprep.mubr.msk.bf16.mxu0 %vm609_vm0, %v1731_v18  ;;  %1538 = vmatprep.mubr.msk.bf16.mxu1 %vm609_vm0, %v1733_v19 }
  0x3a   : > { %755 = vmatmul.mubr.bf16.gmra.mrb[8].mxu0 %v1735_v20  ;;  %883 = vmatmul.mubr.bf16.gmra.mrb[8].mxu1 %v1736_v21 }
  0x3b   : > { %1523 = vmatprep.mubr.msk.bf16.mxu0 %vm609_vm0, %v1737_v22  ;;  %1539 = vmatprep.mubr.msk.bf16.mxu1 %vm609_vm0, %v1739_v23 }
  0x42   : > { %763 = vmatmul.mubr.bf16.gmra.mrb[12].mxu0 %v1741_v24  ;;  %891 = vmatmul.mubr.bf16.gmra.mrb[12].mxu1 %v1742_v25 }
  0x43   : > { %1524 = vmatprep.mubr.msk.bf16.mxu0 %vm609_vm0, %v1743_v26  ;;  %1540 = vmatprep.mubr.msk.bf16.mxu1 %vm609_vm0, %v1745_v27 }
  0x4a   : > { %771 = vmatmul.mubr.bf16.gmra.mrb[16].mxu0 %v1747_v28  ;;  %899 = vmatmul.mubr.bf16.gmra.mrb[16].mxu1 %v1748_v29 }
  0x4b   : > { %1525 = vmatprep.mubr.msk.bf16.mxu0 %vm609_vm0, %v1749_v30  ;;  %1541 = vmatprep.mubr.msk.bf16.mxu1 %vm609_vm0, %v1751_v31 }
  0x52   : > { %779 = vmatmul.mubr.bf16.gmra.mrb[20].mxu0 %v1753_v32  ;;  %907 = vmatmul.mubr.bf16.gmra.mrb[20].mxu1 %v1754_v33 }
  0x53   : > { %1526 = vmatprep.mubr.msk.bf16.mxu0 %vm609_vm0, %v1755_v34  ;;  %1542 = vmatprep.mubr.msk.bf16.mxu1 %vm609_vm0, %v1757_v35 }
  0x5a   : > { %787 = vmatmul.mubr.bf16.gmra.mrb[24].mxu0 %v1759_v36  ;;  %915 = vmatmul.mubr.bf16.gmra.mrb[24].mxu1 %v1760_v37 }
  0x5b   : > { %1527 = vmatprep.mubr.msk.bf16.mxu0 %vm609_vm0, %v1761_v38  ;;  %1543 = vmatprep.mubr.msk.bf16.mxu1 %vm609_vm0, %v1763_v39 }
  0x62   : > { %795 = vmatmul.mubr.bf16.gmra.mrb[28].mxu0 %v1765_v40  ;;  %923 = vmatmul.mubr.bf16.gmra.mrb[28].mxu1 %v1766_v41 }
  0x63   : > { %1528 = vmatprep.mubr.msk.bf16.mxu0 %vm609_vm0, %v1767_v42  ;;  %1544 = vmatprep.mubr.msk.bf16.mxu1 %vm609_vm0, %v1769_v43 }
  0x6a   : > { %803 = vmatmul.mubr.bf16.gmra.mrb[32].mxu0 %v1771_v44  ;;  %931 = vmatmul.mubr.bf16.gmra.mrb[32].mxu1 %v1772_v45 }
  0x6b   : > { %1529 = vmatprep.mubr.msk.bf16.mxu0 %vm609_vm0, %v1773_v46  ;;  %1545 = vmatprep.mubr.msk.bf16.mxu1 %vm609_vm0, %v1775_v47 }
  0x72   : > { %811 = vmatmul.mubr.bf16.gmra.mrb[36].mxu0 %v1777_v48  ;;  %939 = vmatmul.mubr.bf16.gmra.mrb[36].mxu1 %v1778_v49 }
  0x73   : > { %1530 = vmatprep.mubr.msk.bf16.mxu0 %vm609_vm0, %v1779_v50  ;;  %1546 = vmatprep.mubr.msk.bf16.mxu1 %vm609_vm0, %v1781_v51 }
  0x7a   : > { %819 = vmatmul.mubr.bf16.gmra.mrb[40].mxu0 %v1783_v52  ;;  %947 = vmatmul.mubr.bf16.gmra.mrb[40].mxu1 %v1784_v53 }
  0x7b   : > { %1531 = vmatprep.mubr.msk.bf16.mxu0 %vm609_vm0, %v1785_v54  ;;  %1547 = vmatprep.mubr.msk.bf16.mxu1 %vm609_vm0, %v1787_v55 }
  0x82   : > { %827 = vmatmul.mubr.bf16.gmra.mrb[44].mxu0 %v1789_v56  ;;  %955 = vmatmul.mubr.bf16.gmra.mrb[44].mxu1 %v1790_v57 }
  0x83   : > { %1532 = vmatprep.mubr.msk.bf16.mxu0 %vm609_vm0, %v1791_v58  ;;  %1548 = vmatprep.mubr.msk.bf16.mxu1 %vm609_vm0, %v1793_v59 }
  0x8a   : > { %835 = vmatmul.mubr.bf16.gmra.mrb[48].mxu0 %v1795_v60  ;;  %963 = vmatmul.mubr.bf16.gmra.mrb[48].mxu1 %v1796_v61 }
  0x8b   : > { %1533 = vmatprep.mubr.msk.bf16.mxu0 %vm609_vm0, %v1797_v62  ;;  %1549 = vmatprep.mubr.msk.bf16.mxu1 %vm609_vm0, %v1799_v63 }
  0x92   : > { %843 = vmatmul.mubr.bf16.gmra.mrb[52].mxu0 %v1801_v0  ;;  %971 = vmatmul.mubr.bf16.gmra.mrb[52].mxu1 %v1802_v1 }
  0x93   : > { %1534 = vmatprep.mubr.msk.bf16.mxu0 %vm609_vm0, %v1803_v2  ;;  %1550 = vmatprep.mubr.msk.bf16.mxu1 %vm609_vm0, %v1805_v3 }
  0x9a   : > { %851 = vmatmul.mubr.bf16.gmra.mrb[56].mxu0 %v1807_v4  ;;  %979 = vmatmul.mubr.bf16.gmra.mrb[56].mxu1 %v1808_v5 }
  0x9b   : > { %1535 = vmatprep.mubr.msk.bf16.mxu0 %vm609_vm0, %v1809_v6  ;;  %1551 = vmatprep.mubr.msk.bf16.mxu1 %vm609_vm0, %v1811_v7 }
  0xa2   : > { %859 = vmatmul.mubr.bf16.gmra.mrb[60].mxu0 %v1813_v8  ;;  %987 = vmatmul.mubr.bf16.gmra.mrb[60].mxu1 %v1814_v9 }
  0xfd   : > { %v740_v11 = vpop.f32.mrb[0].mxu0  ;;  %v868_v12 = vpop.f32.mrb[0].mxu1 }
  0xfe   : > { %v741_v13 = vadd.f32 %v1986_v10, %v740_v11  ;;  %v869_v14 = vadd.f32 %v1986_v10, %v868_v12  ;;  %v742_v15 = vpop.f32.mrb[1].mxu0  ;;  %v870_v16 = vpop.f32.mrb[1].mxu1 }
  0xff   : > { %v743_v17 = vpop.f32.mrb[2].mxu0  ;;  %v871_v18 = vpop.f32.mrb[2].mxu1 }
 0x100   : > { %v995_v19 = vmax.f32 %v741_v13, 0.0  ;;  %v1027_v20 = vmax.f32 %v869_v14, 0.0  ;;  %v744_v21 = vadd.f32 %v1986_v10, %v743_v17  ;;  %v872_v22 = vadd.f32 %v1986_v10, %v871_v18  ;;  %v745_v23 = vpop.f32.mrb[3].mxu0  ;;  %v873_v24 = vpop.f32.mrb[3].mxu1 }
 0x102   : > { %v1619_v25 = vpack.c.bf16 %v995_v19, %v995_v19  ;;  %v1651_v26 = vpack.c.bf16 %v1027_v20, %v1027_v20  ;;  %v996_v27 = vmax.f32 %v744_v21, 0.0  ;;  %v1028_v28 = vmax.f32 %v872_v22, 0.0 }
 0x104   : > { %1316 = vst.msk [vmem:[%s1996_s16] sm:$0xf] %vm1315_vm1, %v1619_v25  ;;  %1348 = vst.msk [vmem:[%s1996_s16 + $0x80] sm:$0xf] %vm1315_vm1, %v1651_v26  ;;  %v1620_v29 = vpack.c.bf16 %v996_v27, %v996_v27  ;;  %v1652_v30 = vpack.c.bf16 %v1028_v28, %v1028_v28 }
 0x105   : > { %v748_v31 = vpop.f32.mrb[4].mxu0  ;;  %v876_v32 = vpop.f32.mrb[4].mxu1 }
 0x106   : > { %1317 = vst.msk [vmem:[%s1996_s16 + $0x4] sm:$0xf] %vm1315_vm1, %v1620_v29  ;;  %1349 = vst.msk [vmem:[%s1996_s16 + $0x84] sm:$0xf] %vm1315_vm1, %v1652_v30  ;;  %v749_v33 = vadd.f32 %v1986_v10, %v748_v31  ;;  %v877_v34 = vadd.f32 %v1986_v10, %v876_v32  ;;  %v750_v35 = vpop.f32.mrb[5].mxu0  ;;  %v878_v36 = vpop.f32.mrb[5].mxu1 }
 0x107   : > { %v751_v37 = vpop.f32.mrb[6].mxu0  ;;  %v879_v38 = vpop.f32.mrb[6].mxu1 }
 0x108   : > { %v997_v39 = vmax.f32 %v749_v33, 0.0  ;;  %v1029_v40 = vmax.f32 %v877_v34, 0.0  ;;  %v752_v41 = vadd.f32 %v1986_v10, %v751_v37  ;;  %v880_v42 = vadd.f32 %v1986_v10, %v879_v38  ;;  %v753_v43 = vpop.f32.mrb[7].mxu0  ;;  %v881_v44 = vpop.f32.mrb[7].mxu1 }
 0x10a   : > { %v1621_v45 = vpack.c.bf16 %v997_v39, %v997_v39  ;;  %v1653_v46 = vpack.c.bf16 %v1029_v40, %v1029_v40  ;;  %v998_v47 = vmax.f32 %v752_v41, 0.0  ;;  %v1030_v48 = vmax.f32 %v880_v42, 0.0 }
 0x10c   : > { %1318 = vst.msk [vmem:[%s1996_s16 + $0x8] sm:$0xf] %vm1315_vm1, %v1621_v45  ;;  %1350 = vst.msk [vmem:[%s1996_s16 + $0x88] sm:$0xf] %vm1315_vm1, %v1653_v46  ;;  %v1622_v49 = vpack.c.bf16 %v998_v47, %v998_v47  ;;  %v1654_v50 = vpack.c.bf16 %v1030_v48, %v1030_v48 }
 0x10d   : > { %v756_v51 = vpop.f32.mrb[8].mxu0  ;;  %v884_v52 = vpop.f32.mrb[8].mxu1 }
 0x10e   : > { %1319 = vst.msk [vmem:[%s1996_s16 + $0xc] sm:$0xf] %vm1315_vm1, %v1622_v49  ;;  %1351 = vst.msk [vmem:[%s1996_s16 + $0x8c] sm:$0xf] %vm1315_vm1, %v1654_v50  ;;  %v757_v53 = vadd.f32 %v1986_v10, %v756_v51  ;;  %v885_v54 = vadd.f32 %v1986_v10, %v884_v52  ;;  %v758_v55 = vpop.f32.mrb[9].mxu0  ;;  %v886_v56 = vpop.f32.mrb[9].mxu1 }
 0x10f   : > { %v759_v57 = vpop.f32.mrb[10].mxu0  ;;  %v887_v58 = vpop.f32.mrb[10].mxu1 }
 0x110   : > { %v999_v59 = vmax.f32 %v757_v53, 0.0  ;;  %v1031_v60 = vmax.f32 %v885_v54, 0.0  ;;  %v760_v61 = vadd.f32 %v1986_v10, %v759_v57  ;;  %v888_v62 = vadd.f32 %v1986_v10, %v887_v58  ;;  %v761_v63 = vpop.f32.mrb[11].mxu0  ;;  %v889_v0 = vpop.f32.mrb[11].mxu1 }
 0x112   : > { %v1623_v1 = vpack.c.bf16 %v999_v59, %v999_v59  ;;  %v1655_v2 = vpack.c.bf16 %v1031_v60, %v1031_v60  ;;  %v1000_v3 = vmax.f32 %v760_v61, 0.0  ;;  %v1032_v4 = vmax.f32 %v888_v62, 0.0 }
 0x114   : > { %1320 = vst.msk [vmem:[%s1996_s16 + $0x10] sm:$0xf] %vm1315_vm1, %v1623_v1  ;;  %1352 = vst.msk [vmem:[%s1996_s16 + $0x90] sm:$0xf] %vm1315_vm1, %v1655_v2  ;;  %v1624_v5 = vpack.c.bf16 %v1000_v3, %v1000_v3  ;;  %v1656_v6 = vpack.c.bf16 %v1032_v4, %v1032_v4 }
 0x115   : > { %v764_v7 = vpop.f32.mrb[12].mxu0  ;;  %v892_v8 = vpop.f32.mrb[12].mxu1 }
 0x116   : > { %1321 = vst.msk [vmem:[%s1996_s16 + $0x14] sm:$0xf] %vm1315_vm1, %v1624_v5  ;;  %1353 = vst.msk [vmem:[%s1996_s16 + $0x94] sm:$0xf] %vm1315_vm1, %v1656_v6  ;;  %v765_v9 = vadd.f32 %v1986_v10, %v764_v7  ;;  %v893_v11 = vadd.f32 %v1986_v10, %v892_v8  ;;  %v766_v12 = vpop.f32.mrb[13].mxu0  ;;  %v894_v13 = vpop.f32.mrb[13].mxu1 }
 0x117   : > { %v767_v14 = vpop.f32.mrb[14].mxu0  ;;  %v895_v15 = vpop.f32.mrb[14].mxu1 }
 0x118   : > { %v1001_v16 = vmax.f32 %v765_v9, 0.0  ;;  %v1033_v17 = vmax.f32 %v893_v11, 0.0  ;;  %v768_v18 = vadd.f32 %v1986_v10, %v767_v14  ;;  %v896_v19 = vadd.f32 %v1986_v10, %v895_v15  ;;  %v769_v20 = vpop.f32.mrb[15].mxu0  ;;  %v897_v21 = vpop.f32.mrb[15].mxu1 }
 0x11a   : > { %v1625_v22 = vpack.c.bf16 %v1001_v16, %v1001_v16  ;;  %v1657_v23 = vpack.c.bf16 %v1033_v17, %v1033_v17  ;;  %v1002_v24 = vmax.f32 %v768_v18, 0.0  ;;  %v1034_v25 = vmax.f32 %v896_v19, 0.0 }
 0x11c   : > { %1322 = vst.msk [vmem:[%s1996_s16 + $0x18] sm:$0xf] %vm1315_vm1, %v1625_v22  ;;  %1354 = vst.msk [vmem:[%s1996_s16 + $0x98] sm:$0xf] %vm1315_vm1, %v1657_v23  ;;  %v1626_v26 = vpack.c.bf16 %v1002_v24, %v1002_v24  ;;  %v1658_v27 = vpack.c.bf16 %v1034_v25, %v1034_v25 }
 0x11d   : > { %v772_v28 = vpop.f32.mrb[16].mxu0  ;;  %v900_v29 = vpop.f32.mrb[16].mxu1 }
 0x11e   : > { %1323 = vst.msk [vmem:[%s1996_s16 + $0x1c] sm:$0xf] %vm1315_vm1, %v1626_v26  ;;  %1355 = vst.msk [vmem:[%s1996_s16 + $0x9c] sm:$0xf] %vm1315_vm1, %v1658_v27  ;;  %v773_v30 = vadd.f32 %v1986_v10, %v772_v28  ;;  %v901_v31 = vadd.f32 %v1986_v10, %v900_v29  ;;  %v774_v32 = vpop.f32.mrb[17].mxu0  ;;  %v902_v33 = vpop.f32.mrb[17].mxu1 }
 0x11f   : > { %v775_v34 = vpop.f32.mrb[18].mxu0  ;;  %v903_v35 = vpop.f32.mrb[18].mxu1 }
 0x120   : > { %v1003_v36 = vmax.f32 %v773_v30, 0.0  ;;  %v1035_v37 = vmax.f32 %v901_v31, 0.0  ;;  %v776_v38 = vadd.f32 %v1986_v10, %v775_v34  ;;  %v904_v39 = vadd.f32 %v1986_v10, %v903_v35  ;;  %v777_v40 = vpop.f32.mrb[19].mxu0  ;;  %v905_v41 = vpop.f32.mrb[19].mxu1 }
 0x122   : > { %v1627_v42 = vpack.c.bf16 %v1003_v36, %v1003_v36  ;;  %v1659_v43 = vpack.c.bf16 %v1035_v37, %v1035_v37  ;;  %v1004_v44 = vmax.f32 %v776_v38, 0.0  ;;  %v1036_v45 = vmax.f32 %v904_v39, 0.0 }
 0x124   : > { %1324 = vst.msk [vmem:[%s1996_s16 + $0x20] sm:$0xf] %vm1315_vm1, %v1627_v42  ;;  %1356 = vst.msk [vmem:[%s1996_s16 + $0xa0] sm:$0xf] %vm1315_vm1, %v1659_v43  ;;  %v1628_v46 = vpack.c.bf16 %v1004_v44, %v1004_v44  ;;  %v1660_v47 = vpack.c.bf16 %v1036_v45, %v1036_v45 }
 0x125   : > { %v780_v48 = vpop.f32.mrb[20].mxu0  ;;  %v908_v49 = vpop.f32.mrb[20].mxu1 }
 0x126   : > { %1325 = vst.msk [vmem:[%s1996_s16 + $0x24] sm:$0xf] %vm1315_vm1, %v1628_v46  ;;  %1357 = vst.msk [vmem:[%s1996_s16 + $0xa4] sm:$0xf] %vm1315_vm1, %v1660_v47  ;;  %v781_v50 = vadd.f32 %v1986_v10, %v780_v48  ;;  %v909_v51 = vadd.f32 %v1986_v10, %v908_v49  ;;  %v782_v52 = vpop.f32.mrb[21].mxu0  ;;  %v910_v53 = vpop.f32.mrb[21].mxu1 }
 0x127   : > { %v783_v54 = vpop.f32.mrb[22].mxu0  ;;  %v911_v55 = vpop.f32.mrb[22].mxu1 }
 0x128   : > { %v1005_v56 = vmax.f32 %v781_v50, 0.0  ;;  %v1037_v57 = vmax.f32 %v909_v51, 0.0  ;;  %v784_v58 = vadd.f32 %v1986_v10, %v783_v54  ;;  %v912_v59 = vadd.f32 %v1986_v10, %v911_v55  ;;  %v785_v60 = vpop.f32.mrb[23].mxu0  ;;  %v913_v61 = vpop.f32.mrb[23].mxu1 }
 0x12a   : > { %v1629_v62 = vpack.c.bf16 %v1005_v56, %v1005_v56  ;;  %v1661_v63 = vpack.c.bf16 %v1037_v57, %v1037_v57  ;;  %v1006_v0 = vmax.f32 %v784_v58, 0.0  ;;  %v1038_v1 = vmax.f32 %v912_v59, 0.0 }
 0x12c   : > { %1326 = vst.msk [vmem:[%s1996_s16 + $0x28] sm:$0xf] %vm1315_vm1, %v1629_v62  ;;  %1358 = vst.msk [vmem:[%s1996_s16 + $0xa8] sm:$0xf] %vm1315_vm1, %v1661_v63  ;;  %v1630_v2 = vpack.c.bf16 %v1006_v0, %v1006_v0  ;;  %v1662_v3 = vpack.c.bf16 %v1038_v1, %v1038_v1 }
 0x12d   : > { %v788_v4 = vpop.f32.mrb[24].mxu0  ;;  %v916_v5 = vpop.f32.mrb[24].mxu1 }
 0x12e   : > { %1327 = vst.msk [vmem:[%s1996_s16 + $0x2c] sm:$0xf] %vm1315_vm1, %v1630_v2  ;;  %1359 = vst.msk [vmem:[%s1996_s16 + $0xac] sm:$0xf] %vm1315_vm1, %v1662_v3  ;;  %v789_v6 = vadd.f32 %v1986_v10, %v788_v4  ;;  %v917_v7 = vadd.f32 %v1986_v10, %v916_v5  ;;  %v790_v8 = vpop.f32.mrb[25].mxu0  ;;  %v918_v9 = vpop.f32.mrb[25].mxu1 }
 0x12f   : > { %v791_v11 = vpop.f32.mrb[26].mxu0  ;;  %v919_v12 = vpop.f32.mrb[26].mxu1 }
 0x130   : > { %v1007_v13 = vmax.f32 %v789_v6, 0.0  ;;  %v1039_v14 = vmax.f32 %v917_v7, 0.0  ;;  %v792_v15 = vadd.f32 %v1986_v10, %v791_v11  ;;  %v920_v16 = vadd.f32 %v1986_v10, %v919_v12  ;;  %v793_v17 = vpop.f32.mrb[27].mxu0  ;;  %v921_v18 = vpop.f32.mrb[27].mxu1 }
 0x132   : > { %v1631_v19 = vpack.c.bf16 %v1007_v13, %v1007_v13  ;;  %v1663_v20 = vpack.c.bf16 %v1039_v14, %v1039_v14  ;;  %v1008_v21 = vmax.f32 %v792_v15, 0.0  ;;  %v1040_v22 = vmax.f32 %v920_v16, 0.0 }
 0x134   : > { %1328 = vst.msk [vmem:[%s1996_s16 + $0x30] sm:$0xf] %vm1315_vm1, %v1631_v19  ;;  %1360 = vst.msk [vmem:[%s1996_s16 + $0xb0] sm:$0xf] %vm1315_vm1, %v1663_v20  ;;  %v1632_v23 = vpack.c.bf16 %v1008_v21, %v1008_v21  ;;  %v1664_v24 = vpack.c.bf16 %v1040_v22, %v1040_v22 }
 0x135   : > { %v796_v25 = vpop.f32.mrb[28].mxu0  ;;  %v924_v26 = vpop.f32.mrb[28].mxu1 }
 0x136   : > { %1329 = vst.msk [vmem:[%s1996_s16 + $0x34] sm:$0xf] %vm1315_vm1, %v1632_v23  ;;  %1361 = vst.msk [vmem:[%s1996_s16 + $0xb4] sm:$0xf] %vm1315_vm1, %v1664_v24  ;;  %v797_v27 = vadd.f32 %v1986_v10, %v796_v25  ;;  %v925_v28 = vadd.f32 %v1986_v10, %v924_v26  ;;  %v798_v29 = vpop.f32.mrb[29].mxu0  ;;  %v926_v30 = vpop.f32.mrb[29].mxu1 }
 0x137   : > { %v799_v31 = vpop.f32.mrb[30].mxu0  ;;  %v927_v32 = vpop.f32.mrb[30].mxu1 }
 0x138   : > { %v1009_v33 = vmax.f32 %v797_v27, 0.0  ;;  %v1041_v34 = vmax.f32 %v925_v28, 0.0  ;;  %v800_v35 = vadd.f32 %v1986_v10, %v799_v31  ;;  %v928_v36 = vadd.f32 %v1986_v10, %v927_v32  ;;  %v801_v37 = vpop.f32.mrb[31].mxu0  ;;  %v929_v38 = vpop.f32.mrb[31].mxu1 }
 0x13a   : > { %v1633_v39 = vpack.c.bf16 %v1009_v33, %v1009_v33  ;;  %v1665_v40 = vpack.c.bf16 %v1041_v34, %v1041_v34  ;;  %v1010_v41 = vmax.f32 %v800_v35, 0.0  ;;  %v1042_v42 = vmax.f32 %v928_v36, 0.0 }
 0x13c   : > { %1330 = vst.msk [vmem:[%s1996_s16 + $0x38] sm:$0xf] %vm1315_vm1, %v1633_v39  ;;  %1362 = vst.msk [vmem:[%s1996_s16 + $0xb8] sm:$0xf] %vm1315_vm1, %v1665_v40  ;;  %v1634_v43 = vpack.c.bf16 %v1010_v41, %v1010_v41  ;;  %v1666_v44 = vpack.c.bf16 %v1042_v42, %v1042_v42 }
 0x13d   : > { %v804_v45 = vpop.f32.mrb[32].mxu0  ;;  %v932_v46 = vpop.f32.mrb[32].mxu1 }
 0x13e   : > { %1331 = vst.msk [vmem:[%s1996_s16 + $0x3c] sm:$0xf] %vm1315_vm1, %v1634_v43  ;;  %1363 = vst.msk [vmem:[%s1996_s16 + $0xbc] sm:$0xf] %vm1315_vm1, %v1666_v44  ;;  %v805_v47 = vadd.f32 %v1986_v10, %v804_v45  ;;  %v933_v48 = vadd.f32 %v1986_v10, %v932_v46  ;;  %v806_v49 = vpop.f32.mrb[33].mxu0  ;;  %v934_v50 = vpop.f32.mrb[33].mxu1 }
 0x13f   : > { %v807_v51 = vpop.f32.mrb[34].mxu0  ;;  %v935_v52 = vpop.f32.mrb[34].mxu1 }
 0x140   : > { %v1011_v53 = vmax.f32 %v805_v47, 0.0  ;;  %v1043_v54 = vmax.f32 %v933_v48, 0.0  ;;  %v808_v55 = vadd.f32 %v1986_v10, %v807_v51  ;;  %v936_v56 = vadd.f32 %v1986_v10, %v935_v52  ;;  %v809_v57 = vpop.f32.mrb[35].mxu0  ;;  %v937_v58 = vpop.f32.mrb[35].mxu1 }
 0x142   : > { %v1635_v59 = vpack.c.bf16 %v1011_v53, %v1011_v53  ;;  %v1667_v60 = vpack.c.bf16 %v1043_v54, %v1043_v54  ;;  %v1012_v61 = vmax.f32 %v808_v55, 0.0  ;;  %v1044_v62 = vmax.f32 %v936_v56, 0.0 }
 0x144   : > { %1332 = vst.msk [vmem:[%s1996_s16 + $0x40] sm:$0xf] %vm1315_vm1, %v1635_v59  ;;  %1364 = vst.msk [vmem:[%s1996_s16 + $0xc0] sm:$0xf] %vm1315_vm1, %v1667_v60  ;;  %v1636_v63 = vpack.c.bf16 %v1012_v61, %v1012_v61  ;;  %v1668_v0 = vpack.c.bf16 %v1044_v62, %v1044_v62 }
 0x145   : > { %v812_v1 = vpop.f32.mrb[36].mxu0  ;;  %v940_v2 = vpop.f32.mrb[36].mxu1 }
 0x146   : > { %1333 = vst.msk [vmem:[%s1996_s16 + $0x44] sm:$0xf] %vm1315_vm1, %v1636_v63  ;;  %1365 = vst.msk [vmem:[%s1996_s16 + $0xc4] sm:$0xf] %vm1315_vm1, %v1668_v0  ;;  %v813_v3 = vadd.f32 %v1986_v10, %v812_v1  ;;  %v941_v4 = vadd.f32 %v1986_v10, %v940_v2  ;;  %v814_v5 = vpop.f32.mrb[37].mxu0  ;;  %v942_v6 = vpop.f32.mrb[37].mxu1 }
 0x147   : > { %v815_v7 = vpop.f32.mrb[38].mxu0  ;;  %v943_v8 = vpop.f32.mrb[38].mxu1 }
 0x148   : > { %v1013_v9 = vmax.f32 %v813_v3, 0.0  ;;  %v1045_v11 = vmax.f32 %v941_v4, 0.0  ;;  %v816_v12 = vadd.f32 %v1986_v10, %v815_v7  ;;  %v944_v13 = vadd.f32 %v1986_v10, %v943_v8  ;;  %v817_v14 = vpop.f32.mrb[39].mxu0  ;;  %v945_v15 = vpop.f32.mrb[39].mxu1 }
 0x14a   : > { %v1637_v16 = vpack.c.bf16 %v1013_v9, %v1013_v9  ;;  %v1669_v17 = vpack.c.bf16 %v1045_v11, %v1045_v11  ;;  %v1014_v18 = vmax.f32 %v816_v12, 0.0  ;;  %v1046_v19 = vmax.f32 %v944_v13, 0.0 }
 0x14c   : > { %1334 = vst.msk [vmem:[%s1996_s16 + $0x48] sm:$0xf] %vm1315_vm1, %v1637_v16  ;;  %1366 = vst.msk [vmem:[%s1996_s16 + $0xc8] sm:$0xf] %vm1315_vm1, %v1669_v17  ;;  %v1638_v20 = vpack.c.bf16 %v1014_v18, %v1014_v18  ;;  %v1670_v21 = vpack.c.bf16 %v1046_v19, %v1046_v19 }
 0x14d   : > { %v820_v22 = vpop.f32.mrb[40].mxu0  ;;  %v948_v23 = vpop.f32.mrb[40].mxu1 }
 0x14e   : > { %1335 = vst.msk [vmem:[%s1996_s16 + $0x4c] sm:$0xf] %vm1315_vm1, %v1638_v20  ;;  %1367 = vst.msk [vmem:[%s1996_s16 + $0xcc] sm:$0xf] %vm1315_vm1, %v1670_v21  ;;  %v821_v24 = vadd.f32 %v1986_v10, %v820_v22  ;;  %v949_v25 = vadd.f32 %v1986_v10, %v948_v23  ;;  %v822_v26 = vpop.f32.mrb[41].mxu0  ;;  %v950_v27 = vpop.f32.mrb[41].mxu1 }
 0x14f   : > { %v823_v28 = vpop.f32.mrb[42].mxu0  ;;  %v951_v29 = vpop.f32.mrb[42].mxu1 }
 0x150   : > { %v1015_v30 = vmax.f32 %v821_v24, 0.0  ;;  %v1047_v31 = vmax.f32 %v949_v25, 0.0  ;;  %v824_v32 = vadd.f32 %v1986_v10, %v823_v28  ;;  %v952_v33 = vadd.f32 %v1986_v10, %v951_v29  ;;  %v825_v34 = vpop.f32.mrb[43].mxu0  ;;  %v953_v35 = vpop.f32.mrb[43].mxu1 }
 0x152   : > { %v1639_v36 = vpack.c.bf16 %v1015_v30, %v1015_v30  ;;  %v1671_v37 = vpack.c.bf16 %v1047_v31, %v1047_v31  ;;  %v1016_v38 = vmax.f32 %v824_v32, 0.0  ;;  %v1048_v39 = vmax.f32 %v952_v33, 0.0 }
 0x154   : > { %1336 = vst.msk [vmem:[%s1996_s16 + $0x50] sm:$0xf] %vm1315_vm1, %v1639_v36  ;;  %1368 = vst.msk [vmem:[%s1996_s16 + $0xd0] sm:$0xf] %vm1315_vm1, %v1671_v37  ;;  %v1640_v40 = vpack.c.bf16 %v1016_v38, %v1016_v38  ;;  %v1672_v41 = vpack.c.bf16 %v1048_v39, %v1048_v39 }
 0x155   : > { %v828_v42 = vpop.f32.mrb[44].mxu0  ;;  %v956_v43 = vpop.f32.mrb[44].mxu1 }
 0x156   : > { %1337 = vst.msk [vmem:[%s1996_s16 + $0x54] sm:$0xf] %vm1315_vm1, %v1640_v40  ;;  %1369 = vst.msk [vmem:[%s1996_s16 + $0xd4] sm:$0xf] %vm1315_vm1, %v1672_v41  ;;  %v829_v44 = vadd.f32 %v1986_v10, %v828_v42  ;;  %v957_v45 = vadd.f32 %v1986_v10, %v956_v43  ;;  %v830_v46 = vpop.f32.mrb[45].mxu0  ;;  %v958_v47 = vpop.f32.mrb[45].mxu1 }
 0x157   : > { %v831_v48 = vpop.f32.mrb[46].mxu0  ;;  %v959_v49 = vpop.f32.mrb[46].mxu1 }
 0x158   : > { %v1017_v50 = vmax.f32 %v829_v44, 0.0  ;;  %v1049_v51 = vmax.f32 %v957_v45, 0.0  ;;  %v832_v52 = vadd.f32 %v1986_v10, %v831_v48  ;;  %v960_v53 = vadd.f32 %v1986_v10, %v959_v49  ;;  %v833_v54 = vpop.f32.mrb[47].mxu0  ;;  %v961_v55 = vpop.f32.mrb[47].mxu1 }
 0x15a   : > { %v1641_v56 = vpack.c.bf16 %v1017_v50, %v1017_v50  ;;  %v1673_v57 = vpack.c.bf16 %v1049_v51, %v1049_v51  ;;  %v1018_v58 = vmax.f32 %v832_v52, 0.0  ;;  %v1050_v59 = vmax.f32 %v960_v53, 0.0 }
 0x15c   : > { %1338 = vst.msk [vmem:[%s1996_s16 + $0x58] sm:$0xf] %vm1315_vm1, %v1641_v56  ;;  %1370 = vst.msk [vmem:[%s1996_s16 + $0xd8] sm:$0xf] %vm1315_vm1, %v1673_v57  ;;  %v1642_v60 = vpack.c.bf16 %v1018_v58, %v1018_v58  ;;  %v1674_v61 = vpack.c.bf16 %v1050_v59, %v1050_v59 }
 0x15d   : > { %v836_v62 = vpop.f32.mrb[48].mxu0  ;;  %v964_v63 = vpop.f32.mrb[48].mxu1 }
 0x15e   : > { %1339 = vst.msk [vmem:[%s1996_s16 + $0x5c] sm:$0xf] %vm1315_vm1, %v1642_v60  ;;  %1371 = vst.msk [vmem:[%s1996_s16 + $0xdc] sm:$0xf] %vm1315_vm1, %v1674_v61  ;;  %v837_v0 = vadd.f32 %v1986_v10, %v836_v62  ;;  %v965_v1 = vadd.f32 %v1986_v10, %v964_v63  ;;  %v838_v2 = vpop.f32.mrb[49].mxu0  ;;  %v966_v3 = vpop.f32.mrb[49].mxu1 }
 0x15f   : > { %v839_v4 = vpop.f32.mrb[50].mxu0  ;;  %v967_v5 = vpop.f32.mrb[50].mxu1 }
 0x160   : > { %v1019_v6 = vmax.f32 %v837_v0, 0.0  ;;  %v1051_v7 = vmax.f32 %v965_v1, 0.0  ;;  %v840_v8 = vadd.f32 %v1986_v10, %v839_v4  ;;  %v968_v9 = vadd.f32 %v1986_v10, %v967_v5  ;;  %v841_v11 = vpop.f32.mrb[51].mxu0  ;;  %v969_v12 = vpop.f32.mrb[51].mxu1 }
 0x162   : > { %v1643_v13 = vpack.c.bf16 %v1019_v6, %v1019_v6  ;;  %v1675_v14 = vpack.c.bf16 %v1051_v7, %v1051_v7  ;;  %v1020_v15 = vmax.f32 %v840_v8, 0.0  ;;  %v1052_v16 = vmax.f32 %v968_v9, 0.0 }
 0x164   : > { %1340 = vst.msk [vmem:[%s1996_s16 + $0x60] sm:$0xf] %vm1315_vm1, %v1643_v13  ;;  %1372 = vst.msk [vmem:[%s1996_s16 + $0xe0] sm:$0xf] %vm1315_vm1, %v1675_v14  ;;  %v1644_v17 = vpack.c.bf16 %v1020_v15, %v1020_v15  ;;  %v1676_v18 = vpack.c.bf16 %v1052_v16, %v1052_v16 }
 0x165   : > { %v844_v19 = vpop.f32.mrb[52].mxu0  ;;  %v972_v20 = vpop.f32.mrb[52].mxu1 }
 0x166   : > { %1341 = vst.msk [vmem:[%s1996_s16 + $0x64] sm:$0xf] %vm1315_vm1, %v1644_v17  ;;  %1373 = vst.msk [vmem:[%s1996_s16 + $0xe4] sm:$0xf] %vm1315_vm1, %v1676_v18  ;;  %v845_v21 = vadd.f32 %v1986_v10, %v844_v19  ;;  %v973_v22 = vadd.f32 %v1986_v10, %v972_v20  ;;  %v846_v23 = vpop.f32.mrb[53].mxu0  ;;  %v974_v24 = vpop.f32.mrb[53].mxu1 }
 0x167   : > { %v847_v25 = vpop.f32.mrb[54].mxu0  ;;  %v975_v26 = vpop.f32.mrb[54].mxu1 }
 0x168   : > { %v1021_v27 = vmax.f32 %v845_v21, 0.0  ;;  %v1053_v28 = vmax.f32 %v973_v22, 0.0  ;;  %v848_v29 = vadd.f32 %v1986_v10, %v847_v25  ;;  %v976_v30 = vadd.f32 %v1986_v10, %v975_v26  ;;  %v849_v31 = vpop.f32.mrb[55].mxu0  ;;  %v977_v32 = vpop.f32.mrb[55].mxu1 }
 0x16a   : > { %v1645_v33 = vpack.c.bf16 %v1021_v27, %v1021_v27  ;;  %v1677_v34 = vpack.c.bf16 %v1053_v28, %v1053_v28  ;;  %v1022_v35 = vmax.f32 %v848_v29, 0.0  ;;  %v1054_v36 = vmax.f32 %v976_v30, 0.0 }
 0x16c   : > { %1342 = vst.msk [vmem:[%s1996_s16 + $0x68] sm:$0xf] %vm1315_vm1, %v1645_v33  ;;  %1374 = vst.msk [vmem:[%s1996_s16 + $0xe8] sm:$0xf] %vm1315_vm1, %v1677_v34  ;;  %v1646_v37 = vpack.c.bf16 %v1022_v35, %v1022_v35  ;;  %v1678_v38 = vpack.c.bf16 %v1054_v36, %v1054_v36 }
 0x16d   : > { %v852_v39 = vpop.f32.mrb[56].mxu0  ;;  %v980_v40 = vpop.f32.mrb[56].mxu1 }
 0x16e   : > { %1343 = vst.msk [vmem:[%s1996_s16 + $0x6c] sm:$0xf] %vm1315_vm1, %v1646_v37  ;;  %1375 = vst.msk [vmem:[%s1996_s16 + $0xec] sm:$0xf] %vm1315_vm1, %v1678_v38  ;;  %v853_v41 = vadd.f32 %v1986_v10, %v852_v39  ;;  %v981_v42 = vadd.f32 %v1986_v10, %v980_v40  ;;  %v854_v43 = vpop.f32.mrb[57].mxu0  ;;  %v982_v44 = vpop.f32.mrb[57].mxu1 }
 0x16f   : > { %v855_v45 = vpop.f32.mrb[58].mxu0  ;;  %v983_v46 = vpop.f32.mrb[58].mxu1 }
 0x170   : > { %v1023_v47 = vmax.f32 %v853_v41, 0.0  ;;  %v1055_v48 = vmax.f32 %v981_v42, 0.0  ;;  %v856_v49 = vadd.f32 %v1986_v10, %v855_v45  ;;  %v984_v50 = vadd.f32 %v1986_v10, %v983_v46  ;;  %v857_v51 = vpop.f32.mrb[59].mxu0  ;;  %v985_v52 = vpop.f32.mrb[59].mxu1 }
 0x172   : > { %v1647_v53 = vpack.c.bf16 %v1023_v47, %v1023_v47  ;;  %v1679_v54 = vpack.c.bf16 %v1055_v48, %v1055_v48  ;;  %v1024_v55 = vmax.f32 %v856_v49, 0.0  ;;  %v1056_v56 = vmax.f32 %v984_v50, 0.0 }
 0x174   : > { %1344 = vst.msk [vmem:[%s1996_s16 + $0x70] sm:$0xf] %vm1315_vm1, %v1647_v53  ;;  %1376 = vst.msk [vmem:[%s1996_s16 + $0xf0] sm:$0xf] %vm1315_vm1, %v1679_v54  ;;  %v1648_v57 = vpack.c.bf16 %v1024_v55, %v1024_v55  ;;  %v1680_v58 = vpack.c.bf16 %v1056_v56, %v1056_v56 }
 0x175   : > { %v860_v59 = vpop.f32.mrb[60].mxu0  ;;  %v988_v60 = vpop.f32.mrb[60].mxu1 }
 0x176   : > { %1345 = vst.msk [vmem:[%s1996_s16 + $0x74] sm:$0xf] %vm1315_vm1, %v1648_v57  ;;  %1377 = vst.msk [vmem:[%s1996_s16 + $0xf4] sm:$0xf] %vm1315_vm1, %v1680_v58  ;;  %v861_v61 = vadd.f32 %v1986_v10, %v860_v59  ;;  %v989_v62 = vadd.f32 %v1986_v10, %v988_v60  ;;  %v862_v63 = vpop.f32.mrb[61].mxu0  ;;  %v990_v0 = vpop.f32.mrb[61].mxu1 }
 0x177   : > { %v863_v1 = vpop.f32.mrb[62].mxu0  ;;  %v991_v2 = vpop.f32.mrb[62].mxu1 }
 0x178   : > { %v1025_v3 = vmax.f32 %v861_v61, 0.0  ;;  %v1057_v4 = vmax.f32 %v989_v62, 0.0  ;;  %v864_v5 = vadd.f32 %v1986_v10, %v863_v1  ;;  %v992_v6 = vadd.f32 %v1986_v10, %v991_v2  ;;  %v865_v7 = vpop.f32.mrb[63].mxu0  ;;  %v993_v8 = vpop.f32.mrb[63].mxu1 }
 0x17a   : > { %v1649_v9 = vpack.c.bf16 %v1025_v3, %v1025_v3  ;;  %v1681_v11 = vpack.c.bf16 %v1057_v4, %v1057_v4  ;;  %v1026_v12 = vmax.f32 %v864_v5, 0.0  ;;  %v1058_v13 = vmax.f32 %v992_v6, 0.0 }
 0x17c   : > { %1346 = vst.msk [vmem:[%s1996_s16 + $0x78] sm:$0xf] %vm1315_vm1, %v1649_v9  ;;  %1378 = vst.msk [vmem:[%s1996_s16 + $0xf8] sm:$0xf] %vm1315_vm1, %v1681_v11  ;;  %v1650_v14 = vpack.c.bf16 %v1026_v12, %v1026_v12  ;;  %v1682_v15 = vpack.c.bf16 %v1058_v13, %v1058_v13 }
 0x17e   : > { %1347 = vst.msk [vmem:[%s1996_s16 + $0x7c] sm:$0xf] %vm1315_vm1, %v1650_v14  ;;  %1379 = vst.msk [vmem:[%s1996_s16 + $0xfc] sm:$0xf] %vm1315_vm1, %v1682_v15 }
 0x17f PF: > { %s13_s12 = sadd.s32 1, %s1821_s12  }
 0x180   : > { %p10_p4 = scmp.ge.s32.totalorder %s13_s12, 4  }
 0x182   :  { %12 = sbr.rel (!%p10_p4) target bundleno = 1 (0x1), region = 62 }

// kernel: refnet_forward.12
= control target key start
LH: loop header
LB: loop body
LE: loop exit
PB: predicated region body
PF: predicated region fallthrough
CT: control target
= control target key end

     0   :  { %vm470_vm0 = vcmask 261120   ;;  %vm1001_vm1 = vcmask 257024   ;;  %s1878_s1 = inlined_call_operand.vmem [shape: bf16[288,32], index: 1, kind: input, shape index: {}]   ;;  %s1879_s0 = inlined_call_operand.vmem [shape: bf16[256,288], index: 0, kind: input, shape index: {}]   ;;  %s1880_s2 = inlined_call_operand.vmem [shape: f32[1,32], index: 2, kind: input, shape index: {}]   ;;  %s1881_s3 = inlined_call_operand.vmem [shape: bf16[256,32], index: 3, kind: output, shape index: {}]  }
   0x1   :  { %v1367_v0 = vld [vmem:[%s1878_s1 + $0x40] sm:$0xff]   ;;  %v1369_v2 = vld [vmem:[%s1878_s1 + $0x48] sm:$0xff]   ;;  %v1371_v4 = vld [vmem:[%s1878_s1 + $0x50] sm:$0xff]  }
   0x2   :  { %v1368_v1 = vld [vmem:[%s1878_s1] sm:$0xff]   ;;  %1185 = vmatprep.subr.bf16.mxu0 %v1367_v0  ;;  %1351 = vmatprep.subr.bf16.mxu1 %v1367_v0  ;;  %v1370_v3 = vld [vmem:[%s1878_s1 + $0x8] sm:$0xff]   ;;  %v1372_v5 = vld [vmem:[%s1878_s1 + $0x10] sm:$0xff]  }
   0x3   :  { %1186 = vmatpush3.bf16.msra.mxu0 %v1368_v1  ;;  %1359 = vmatpush3.bf16.msra.mxu1 %v1368_v1  ;;  %v1373_v6 = vld [vmem:[%s1878_s1 + $0x58] sm:$0xff]   ;;  %v1375_v8 = vld [vmem:[%s1878_s1 + $0x60] sm:$0xff]   ;;  %v1377_v10 = vld [vmem:[%s1878_s1 + $0x68] sm:$0xff]  }
   0x4   :  { %1187 = vmatprep.subr.bf16.mxu0 %v1369_v2  ;;  %1352 = vmatprep.subr.bf16.mxu1 %v1369_v2  ;;  %v1374_v7 = vld [vmem:[%s1878_s1 + $0x18] sm:$0xff]   ;;  %v1376_v9 = vld [vmem:[%s1878_s1 + $0x20] sm:$0xff]   ;;  %v1378_v13 = vld [vmem:[%s1878_s1 + $0x28] sm:$0xff]  }
   0x5   :  { %v1385_v11 = vld [vmem:[%s1879_s0 + $0x4] ss:$12 sps:$4 sm:$0xff]   ;;  %v1381_v16 = vld [vmem:[%s1878_s1 + $0x78] sm:$0xff]   ;;  %v1383_v19 = vld [vmem:[%s1879_s0] ss:$12 sps:$4 sm:$0xff]  }
   0x6   :  { %v1388_v12 = vld [vmem:[%s1879_s0 + $0x124] ss:$12 sps:$4 sm:$0xff]   ;;  %551 = vmatprep.mubr.bf16.mxu0 %v1385_v11  ;;  %v1382_v17 = vld [vmem:[%s1878_s1 + $0x38] sm:$0xff]   ;;  %v1386_v20 = vld [vmem:[%s1879_s0 + $0x120] ss:$12 sps:$4 sm:$0xff]  }
   0x7   :  { %1188 = vmatpush3.bf16.msra.mxu0 %v1370_v3  ;;  %1360 = vmatpush3.bf16.msra.mxu1 %v1370_v3  ;;  %v1379_v14 = vld [vmem:[%s1878_s1 + $0x70] sm:$0xff]   ;;  %v1389_v18 = vld [vmem:[%s1878_s1 + $0x80] sm:$0xff]   ;;  %v1390_v21 = vld [vmem:[%s1879_s0 + $0x1c] ss:$12 sps:$4 sm:$0xff]  }
   0x8   :  { %1189 = vmatprep.subr.bf16.mxu0 %v1371_v4  ;;  %1353 = vmatprep.subr.bf16.mxu1 %v1371_v4  ;;  %v1380_v15 = vld [vmem:[%s1878_s1 + $0x30] sm:$0xff]   ;;  %v1392_v22 = vld [vmem:[%s1879_s0 + $0x13c] ss:$12 sps:$4 sm:$0xff]   ;;  %v1394_v24 = vld [vmem:[%s1879_s0 + $0x18] ss:$12 sps:$4 sm:$0xff]  }
   0x9   :  { %647 = vmatprep.mubr.bf16.mxu1 %v1388_v12  ;;  %v1402_v23 = vld [vmem:[%s1878_s1 + $0x88] sm:$0xff]   ;;  %v1395_v25 = vld [vmem:[%s1879_s0 + $0x138] ss:$12 sps:$4 sm:$0xff]   ;;  %v1396_v26 = vld [vmem:[%s1879_s0 + $0x34] ss:$12 sps:$4 sm:$0xff]  }
   0xa   :  { %v1398_v27 = vld [vmem:[%s1879_s0 + $0x154] ss:$12 sps:$4 sm:$0xff]   ;;  %v1400_v28 = vld [vmem:[%s1879_s0 + $0x30] ss:$12 sps:$4 sm:$0xff]   ;;  %v1403_v30 = vld [vmem:[%s1879_s0 + $0x4c] ss:$12 sps:$4 sm:$0xff]  }
   0xb   :  { %1190 = vmatpush3.bf16.msra.mxu0 %v1372_v5  ;;  %1361 = vmatpush3.bf16.msra.mxu1 %v1372_v5  ;;  %v1401_v29 = vld [vmem:[%s1879_s0 + $0x150] ss:$12 sps:$4 sm:$0xff]   ;;  %v1405_v31 = vld [vmem:[%s1879_s0 + $0x16c] ss:$12 sps:$4 sm:$0xff]   ;;  %v1407_v32 = vld [vmem:[%s1879_s0 + $0x48] ss:$12 sps:$4 sm:$0xff]  }
   0xc   :  { %1191 = vmatprep.subr.bf16.mxu0 %v1373_v6  ;;  %1354 = vmatprep.subr.bf16.mxu1 %v1373_v6  ;;  %v1408_v33 = vld [vmem:[%s1879_s0 + $0x168] ss:$12 sps:$4 sm:$0xff]   ;;  %v1409_v34 = vld [vmem:[%s1879_s0 + $0x64] ss:$12 sps:$4 sm:$0xff]   ;;  %v1412_v36 = vld [vmem:[%s1879_s0 + $0x60] ss:$12 sps:$4 sm:$0xff]  }
   0xd   :  { %v1411_v35 = vld [vmem:[%s1879_s0 + $0x8] ss:$12 sps:$4 sm:$0xff]   ;;  %v1413_v37 = vld [vmem:[%s1879_s0 + $0x20] ss:$12 sps:$4 sm:$0xff]   ;;  %v1416_v39 = vld [vmem:[%s1879_s0 + $0x38] ss:$12 sps:$4 sm:$0xff]  }
   0xe   :  { %v1414_v38 = vld [vmem:[%s1879_s0 + $0x7c] ss:$12 sps:$4 sm:$0xff]   ;;  %v1417_v40 = vld [vmem:[%s1879_s0 + $0x78] ss:$12 sps:$4 sm:$0xff]   ;;  %v1419_v42 = vld [vmem:[%s1879_s0 + $0x94] ss:$12 sps:$4 sm:$0xff]  }
   0xf   :  { %1192 = vmatpush3.bf16.msra.mxu0 %v1374_v7  ;;  %1362 = vmatpush3.bf16.msra.mxu1 %v1374_v7  ;;  %v1418_v41 = vld [vmem:[%s1879_s0 + $0x50] ss:$12 sps:$4 sm:$0xff]   ;;  %v1421_v43 = vld [vmem:[%s1879_s0 + $0x68] ss:$12 sps:$4 sm:$0xff]   ;;  %v1423_v45 = vld [vmem:[%s1879_s0 + $0x80] ss:$12 sps:$4 sm:$0xff]  }
  0x10   :  { %1193 = vmatprep.subr.bf16.mxu0 %v1375_v8  ;;  %1355 = vmatprep.subr.bf16.mxu1 %v1375_v8  ;;  %v1422_v44 = vld [vmem:[%s1879_s0 + $0x90] ss:$12 sps:$4 sm:$0xff]   ;;  %v1424_v46 = vld [vmem:[%s1879_s0 + $0xac] ss:$12 sps:$4 sm:$0xff]   ;;  %v1427_v48 = vld [vmem:[%s1879_s0 + $0xa8] ss:$12 sps:$4 sm:$0xff]  }
  0x11   :  { %v1426_v47 = vld [vmem:[%s1879_s0 + $0x98] ss:$12 sps:$4 sm:$0xff]   ;;  %v1428_v49 = vld [vmem:[%s1879_s0 + $0xb0] ss:$12 sps:$4 sm:$0xff]   ;;  %v1431_v51 = vld [vmem:[%s1879_s0 + $0xc8] ss:$12 sps:$4 sm:$0xff]  }
  0x12   :  { %v1429_v50 = vld [vmem:[%s1879_s0 + $0xc4] ss:$12 sps:$4 sm:$0xff]   ;;  %v1432_v52 = vld [vmem:[%s1879_s0 + $0xc0] ss:$12 sps:$4 sm:$0xff]   ;;  %v1434_v54 = vld [vmem:[%s1879_s0 + $0xdc] ss:$12 sps:$4 sm:$0xff]  }
  0x13   :  { %1194 = vmatpush3.bf16.msra.mxu0 %v1376_v9  ;;  %1363 = vmatpush3.bf16.msra.mxu1 %v1376_v9  ;;  %v1433_v53 = vld [vmem:[%s1879_s0 + $0xe0] ss:$12 sps:$4 sm:$0xff]   ;;  %v1436_v55 = vld [vmem:[%s1879_s0 + $0xf8] ss:$12 sps:$4 sm:$0xff]   ;;  %v1438_v57 = vld [vmem:[%s1879_s0 + $0x110] ss:$12 sps:$4 sm:$0xff]  }
  0x14   :  { %1195 = vmatprep.subr.bf16.mxu0 %v1377_v10  ;;  %1356 = vmatprep.subr.bf16.mxu1 %v1377_v10  ;;  %v1437_v56 = vld [vmem:[%s1879_s0 + $0xd8] ss:$12 sps:$4 sm:$0xff]   ;;  %v1439_v58 = vld [vmem:[%s1879_s0 + $0xf4] ss:$12 sps:$4 sm:$0xff]   ;;  %v1442_v60 = vld [vmem:[%s1879_s0 + $0xf0] ss:$12 sps:$4 sm:$0xff]  }
  0x15   :  { %v1441_v59 = vld [vmem:[%s1879_s0 + $0x128] ss:$12 sps:$4 sm:$0xff]   ;;  %v1443_v61 = vld [vmem:[%s1879_s0 + $0x140] ss:$12 sps:$4 sm:$0xff]   ;;  %v1446_v63 = vld [vmem:[%s1879_s0 + $0x158] ss:$12 sps:$4 sm:$0xff]  }
  0x16   :  { %v1444_v62 = vld [vmem:[%s1879_s0 + $0x10c] ss:$12 sps:$4 sm:$0xff]   ;;  %v1447_v0 = vld [vmem:[%s1879_s0 + $0x108] ss:$12 sps:$4 sm:$0xff]   ;;  %v1448_v1 = vld [vmem:[%s1879_s0 + $0x170] ss:$12 sps:$4 sm:$0xff]  }
  0x17   :  { %1196 = vmatpush3.bf16.msra.mxu0 %v1378_v13  ;;  %1364 = vmatpush3.bf16.msra.mxu1 %v1378_v13 }
  0x18   :  { %1197 = vmatprep.subr.bf16.mxu0 %v1379_v14  ;;  %1357 = vmatprep.subr.bf16.mxu1 %v1379_v14 }
  0x1b   :  { %1198 = vmatpush3.bf16.msra.mxu0 %v1380_v15  ;;  %1365 = vmatpush3.bf16.msra.mxu1 %v1380_v15 }
  0x1c   :  { %1199 = vmatprep.subr.bf16.mxu0 %v1381_v16  ;;  %1358 = vmatprep.subr.bf16.mxu1 %v1381_v16 }
  0x1f   :  { %1200 = vmatpush3.bf16.msra.mxu0 %v1382_v17  ;;  %1366 = vmatpush3.bf16.msra.mxu1 %v1382_v17 }
  0x20   :  { %1315 = vmatprep.subr.bf16.mxu1 %v1389_v18 }
  0x22   :  { %552 = vmatmul.mubr.bf16.vlgmr.msra.gmra.mrb[0].mxu0 %v1383_v19  ;;  %648 = vmatmul.mubr.bf16.vlgmr.msra.gmra.mrb[0].mxu1 %v1386_v20 }
  0x23   :  { %1316 = vmatpush3.bf16.msra.mxu1 %v1389_v18  ;;  %559 = vmatprep.mubr.bf16.mxu0 %v1390_v21 }
  0x24   :  { %655 = vmatprep.mubr.bf16.mxu1 %v1392_v22  ;;  %1317 = vmatprep.subr.bf16.mxu1 %v1402_v23 }
  0x27   :  { %1318 = vmatpush3.bf16.msra.mxu1 %v1402_v23 }
  0x2a   :  { %560 = vmatmul.mubr.bf16.gmra.mrb[4].mxu0 %v1394_v24  ;;  %656 = vmatmul.mubr.bf16.gmra.mrb[4].mxu1 %v1395_v25 }
  0x2b   :  { %567 = vmatprep.mubr.bf16.mxu0 %v1396_v26  ;;  %663 = vmatprep.mubr.bf16.mxu1 %v1398_v27 }
  0x32   :  { %568 = vmatmul.mubr.bf16.gmra.mrb[8].mxu0 %v1400_v28  ;;  %664 = vmatmul.mubr.bf16.gmra.mrb[8].mxu1 %v1401_v29 }
  0x33   :  { %575 = vmatprep.mubr.bf16.mxu0 %v1403_v30  ;;  %671 = vmatprep.mubr.bf16.mxu1 %v1405_v31 }
  0x3a   :  { %576 = vmatmul.mubr.bf16.gmra.mrb[12].mxu0 %v1407_v32  ;;  %672 = vmatmul.mubr.bf16.gmra.mrb[12].mxu1 %v1408_v33 }
  0x3b   :  { %583 = vmatprep.mubr.bf16.mxu0 %v1409_v34  ;;  %1319 = vmatprep.mubr.msk.bf16.mxu1 %vm470_vm0, %v1411_v35 }
  0x42   :  { %584 = vmatmul.mubr.bf16.gmra.mrb[16].mxu0 %v1412_v36  ;;  %1320 = vmatmul.mubr.msk.bf16.vlgmr.msra.gmra.mrb[16].mxu1 %vm470_vm0, %v1413_v37 }
  0x43   :  { %591 = vmatprep.mubr.bf16.mxu0 %v1414_v38  ;;  %1323 = vmatprep.mubr.msk.bf16.mxu1 %vm470_vm0, %v1416_v39 }
  0x4a   :  { %592 = vmatmul.mubr.bf16.gmra.mrb[20].mxu0 %v1417_v40  ;;  %1324 = vmatmul.mubr.msk.bf16.gmra.mrb[20].mxu1 %vm470_vm0, %v1418_v41 }
  0x4b   :  { %599 = vmatprep.mubr.bf16.mxu0 %v1419_v42  ;;  %1327 = vmatprep.mubr.msk.bf16.mxu1 %vm470_vm0, %v1421_v43 }
  0x52   :  { %600 = vmatmul.mubr.bf16.gmra.mrb[24].mxu0 %v1422_v44  ;;  %1328 = vmatmul.mubr.msk.bf16.gmra.mrb[24].mxu1 %vm470_vm0, %v1423_v45 }
  0x53   :  { %607 = vmatprep.mubr.bf16.mxu0 %v1424_v46  ;;  %1331 = vmatprep.mubr.msk.bf16.mxu1 %vm470_vm0, %v1426_v47 }
  0x5a   :  { %608 = vmatmul.mubr.bf16.gmra.mrb[28].mxu0 %v1427_v48  ;;  %1332 = vmatmul.mubr.msk.bf16.gmra.mrb[28].mxu1 %vm470_vm0, %v1428_v49 }
  0x5b   :  { %615 = vmatprep.mubr.bf16.mxu0 %v1429_v50  ;;  %1335 = vmatprep.mubr.msk.bf16.mxu1 %vm470_vm0, %v1431_v51  ;;  %v1702_v50 = vld [vmem:[%s1880_s2] ss:$0 sm:$0xff] }
  0x62   :  { %616 = vmatmul.mubr.bf16.gmra.mrb[32].mxu0 %v1432_v52  ;;  %1336 = vmatmul.mubr.msk.bf16.gmra.mrb[32].mxu1 %vm470_vm0, %v1433_v53 }
  0x63   :  { %623 = vmatprep.mubr.bf16.mxu0 %v1434_v54  ;;  %1339 = vmatprep.mubr.msk.bf16.mxu1 %vm470_vm0, %v1436_v55 }
  0x6a   :  { %624 = vmatmul.mubr.bf16.gmra.mrb[36].mxu0 %v1437_v56  ;;  %1340 = vmatmul.mubr.msk.bf16.gmra.mrb[36].mxu1 %vm470_vm0, %v1438_v57 }
  0x6b   :  { %631 = vmatprep.mubr.bf16.mxu0 %v1439_v58  ;;  %1343 = vmatprep.mubr.msk.bf16.mxu1 %vm470_vm0, %v1441_v59 }
  0x72   :  { %632 = vmatmul.mubr.bf16.gmra.mrb[40].mxu0 %v1442_v60  ;;  %1344 = vmatmul.mubr.msk.bf16.gmra.mrb[40].mxu1 %vm470_vm0, %v1443_v61 }
  0x73   :  { %639 = vmatprep.mubr.bf16.mxu0 %v1444_v62  ;;  %1347 = vmatprep.mubr.msk.bf16.mxu1 %vm470_vm0, %v1446_v63 }
  0x7a   :  { %640 = vmatmul.mubr.bf16.gmra.mrb[44].mxu0 %v1447_v0  ;;  %1348 = vmatmul.mubr.msk.bf16.gmra.mrb[44].mxu1 %vm470_vm0, %v1448_v1 }
  0xf5   :  { %v1201_v2 = vpop.f32.mrb[0].mxu0  ;;  %v1273_v3 = vpop.f32.mrb[0].mxu1 }
  0xf6   :  { %v1202_v4 = vpop.f32.mrb[1].mxu0  ;;  %v1274_v5 = vpop.f32.mrb[1].mxu1 }
  0xf7   :  { %v1203_v6 = vadd.f32 %v1202_v4, %v1201_v2  ;;  %v1204_v7 = vpop.f32.mrb[2].mxu0  ;;  %v1683_v8 = vadd.f32 %v1274_v5, %v1273_v3  ;;  %v1276_v9 = vpop.f32.mrb[2].mxu1 }
  0xf8   :  { %v1205_v10 = vpop.f32.mrb[3].mxu0  ;;  %v1277_v11 = vpop.f32.mrb[3].mxu1 }
  0xf9   :  { %v1206_v12 = vadd.f32 %v1205_v10, %v1204_v7  ;;  %v1685_v13 = vadd.f32 %v1277_v11, %v1276_v9  ;;  %v554_v54 = vadd.f32 %v1203_v6, %v1702_v50 }
  0xfb   :  { %v557_v63 = vadd.f32 %v1206_v12, %v1702_v50 }
  0xfd   :  { %v1207_v14 = vpop.f32.mrb[4].mxu0  ;;  %v1279_v15 = vpop.f32.mrb[4].mxu1 }
  0xfe   :  { %v1208_v16 = vpop.f32.mrb[5].mxu0  ;;  %v1280_v17 = vpop.f32.mrb[5].mxu1 }
  0xff   :  { %v1209_v18 = vadd.f32 %v1208_v16, %v1207_v14  ;;  %v1210_v19 = vpop.f32.mrb[6].mxu0  ;;  %v1687_v20 = vadd.f32 %v1280_v17, %v1279_v15  ;;  %v1282_v21 = vpop.f32.mrb[6].mxu1 }
 0x100   :  { %v1211_v22 = vpop.f32.mrb[7].mxu0  ;;  %v1283_v23 = vpop.f32.mrb[7].mxu1 }
 0x101   :  { %v1212_v24 = vadd.f32 %v1211_v22, %v1210_v19  ;;  %v1689_v25 = vadd.f32 %v1283_v23, %v1282_v21  ;;  %v562_v51 = vadd.f32 %v1209_v18, %v1702_v50 }
 0x103   :  { %v565_v58 = vadd.f32 %v1212_v24, %v1702_v50 }
 0x105   :  { %v1213_v26 = vpop.f32.mrb[8].mxu0  ;;  %v1285_v27 = vpop.f32.mrb[8].mxu1 }
 0x106   :  { %v1214_v28 = vpop.f32.mrb[9].mxu0  ;;  %v1286_v29 = vpop.f32.mrb[9].mxu1 }
 0x107   :  { %v1215_v30 = vadd.f32 %v1214_v28, %v1213_v26  ;;  %v1216_v31 = vpop.f32.mrb[10].mxu0  ;;  %v1691_v32 = vadd.f32 %v1286_v29, %v1285_v27  ;;  %v1288_v33 = vpop.f32.mrb[10].mxu1 }
 0x108   :  { %v1217_v34 = vpop.f32.mrb[11].mxu0  ;;  %v1289_v35 = vpop.f32.mrb[11].mxu1 }
 0x109   :  { %v1218_v36 = vadd.f32 %v1217_v34, %v1216_v31  ;;  %v1693_v37 = vadd.f32 %v1289_v35, %v1288_v33  ;;  %v570_v18 = vadd.f32 %v1215_v30, %v1702_v50 }
 0x10b   :  { %v573_v29 = vadd.f32 %v1218_v36, %v1702_v50 }
 0x10d   :  { %v1219_v38 = vpop.f32.mrb[12].mxu0  ;;  %v1291_v39 = vpop.f32.mrb[12].mxu1 }
 0x10e   :  { %v1220_v40 = vpop.f32.mrb[13].mxu0  ;;  %v1292_v41 = vpop.f32.mrb[13].mxu1 }
 0x10f   :  { %v1221_v42 = vadd.f32 %v1220_v40, %v1219_v38  ;;  %v1222_v43 = vpop.f32.mrb[14].mxu0  ;;  %v1695_v44 = vadd.f32 %v1292_v41, %v1291_v39  ;;  %v1294_v45 = vpop.f32.mrb[14].mxu1 }
 0x110   :  { %v1223_v46 = vpop.f32.mrb[15].mxu0  ;;  %v1295_v47 = vpop.f32.mrb[15].mxu1 }
 0x111   :  { %v1224_v48 = vadd.f32 %v1223_v46, %v1222_v43  ;;  %v1697_v49 = vadd.f32 %v1295_v47, %v1294_v45  ;;  %v578_v12 = vadd.f32 %v1221_v42, %v1702_v50 }
 0x113   :  { %v581_v23 = vadd.f32 %v1224_v48, %v1702_v50 }
 0x115   :  { %v1225_v52 = vpop.f32.mrb[16].mxu0  ;;  %v1321_v53 = vpop.f32.mrb[16].mxu1 }
 0x116   :  { %v723_v55 = vadd.f32 %v1321_v53, %v562_v51  ;;  %v1226_v56 = vpop.f32.mrb[17].mxu0  ;;  %v714_v57 = vpop.f32.mrb[17].mxu1 }
 0x117   :  { %v1227_v59 = vadd.f32 %v1226_v56, %v1225_v52  ;;  %v715_v60 = vadd.f32 %v714_v57, %v554_v54  ;;  %v1228_v61 = vpop.f32.mrb[18].mxu0  ;;  %v1322_v62 = vpop.f32.mrb[18].mxu1 }
 0x118   :  { %v843_v0 = vmax.f32 %v723_v55, 0.0  ;;  %v726_v1 = vadd.f32 %v1322_v62, %v565_v58  ;;  %v1229_v2 = vpop.f32.mrb[19].mxu0  ;;  %v717_v3 = vpop.f32.mrb[19].mxu1 }
 0x119   :  { %v841_v4 = vmax.f32 %v715_v60, 0.0  ;;  %v1230_v5 = vadd.f32 %v1229_v2, %v1228_v61  ;;  %v718_v7 = vadd.f32 %v717_v3, %v557_v63  ;;  %v586_v51 = vadd.f32 %v1227_v59, %v1702_v50 }
 0x11a   :  { %v1155_v6 = vpack.c.bf16 %v843_v0, %v843_v0  ;;  %v844_v9 = vmax.f32 %v726_v1, 0.0 }
 0x11b   :  { %v1153_v10 = vpack.c.bf16 %v841_v4, %v841_v4  ;;  %v842_v11 = vmax.f32 %v718_v7, 0.0  ;;  %v589_v59 = vadd.f32 %v1230_v5, %v1702_v50 }
 0x11c   :  { %1004 = vst.msk [vmem:[%s1881_s3 + $0x8] sm:$0xf] %vm1001_vm1, %v1155_v6  ;;  %v1156_v14 = vpack.c.bf16 %v844_v9, %v844_v9 }
 0x11d   :  { %1002 = vst.msk [vmem:[%s1881_s3] sm:$0xf] %vm1001_vm1, %v1153_v10  ;;  %v1154_v15 = vpack.c.bf16 %v842_v11, %v842_v11  ;;  %v1231_v16 = vpop.f32.mrb[20].mxu0  ;;  %v1325_v17 = vpop.f32.mrb[20].mxu1 }
 0x11e   :  { %1005 = vst.msk [vmem:[%s1881_s3 + $0xc] sm:$0xf] %vm1001_vm1, %v1156_v14  ;;  %v739_v19 = vadd.f32 %v1325_v17, %v578_v12  ;;  %v1232_v21 = vpop.f32.mrb[21].mxu0  ;;  %v730_v22 = vpop.f32.mrb[21].mxu1 }
 0x11f   :  { %1003 = vst.msk [vmem:[%s1881_s3 + $0x4] sm:$0xf] %vm1001_vm1, %v1154_v15  ;;  %v1233_v24 = vadd.f32 %v1232_v21, %v1231_v16  ;;  %v731_v26 = vadd.f32 %v730_v22, %v570_v18  ;;  %v1234_v27 = vpop.f32.mrb[22].mxu0  ;;  %v1326_v28 = vpop.f32.mrb[22].mxu1 }
 0x120   :  { %v847_v30 = vmax.f32 %v739_v19, 0.0  ;;  %v742_v31 = vadd.f32 %v1326_v28, %v581_v23  ;;  %v1235_v33 = vpop.f32.mrb[23].mxu0  ;;  %v733_v34 = vpop.f32.mrb[23].mxu1 }
 0x121   :  { %v845_v35 = vmax.f32 %v731_v26, 0.0  ;;  %v1236_v38 = vadd.f32 %v1235_v33, %v1234_v27  ;;  %v734_v39 = vadd.f32 %v733_v34, %v573_v29  ;;  %v594_v46 = vadd.f32 %v1233_v24, %v1702_v50 }
 0x122   :  { %v1159_v40 = vpack.c.bf16 %v847_v30, %v847_v30  ;;  %v848_v41 = vmax.f32 %v742_v31, 0.0 }
 0x123   :  { %v1157_v42 = vpack.c.bf16 %v845_v35, %v845_v35  ;;  %v846_v43 = vmax.f32 %v734_v39, 0.0  ;;  %v597_v55 = vadd.f32 %v1236_v38, %v1702_v50 }
 0x124   :  { %1008 = vst.msk [vmem:[%s1881_s3 + $0x18] sm:$0xf] %vm1001_vm1, %v1159_v40  ;;  %v1160_v45 = vpack.c.bf16 %v848_v41, %v848_v41 }
 0x125   :  { %1006 = vst.msk [vmem:[%s1881_s3 + $0x10] sm:$0xf] %vm1001_vm1, %v1157_v42  ;;  %v1158_v36 = vpack.c.bf16 %v846_v43, %v846_v43  ;;  %v1237_v47 = vpop.f32.mrb[24].mxu0  ;;  %v1329_v48 = vpop.f32.mrb[24].mxu1 }
 0x126   :  { %1009 = vst.msk [vmem:[%s1881_s3 + $0x1c] sm:$0xf] %vm1001_vm1, %v1160_v45  ;;  %v755_v52 = vadd.f32 %v1329_v48, %v594_v46  ;;  %v1238_v53 = vpop.f32.mrb[25].mxu0  ;;  %v746_v54 = vpop.f32.mrb[25].mxu1 }
 0x127   :  { %1007 = vst.msk [vmem:[%s1881_s3 + $0x14] sm:$0xf] %vm1001_vm1, %v1158_v36  ;;  %v1239_v56 = vadd.f32 %v1238_v53, %v1237_v47  ;;  %v747_v57 = vadd.f32 %v746_v54, %v586_v51  ;;  %v1240_v58 = vpop.f32.mrb[26].mxu0  ;;  %v1330_v60 = vpop.f32.mrb[26].mxu1 }
 0x128   :  { %v851_v61 = vmax.f32 %v755_v52, 0.0  ;;  %v758_v62 = vadd.f32 %v1330_v60, %v597_v55  ;;  %v1241_v63 = vpop.f32.mrb[27].mxu0  ;;  %v749_v0 = vpop.f32.mrb[27].mxu1 }
 0x129   :  { %v849_v1 = vmax.f32 %v747_v57, 0.0  ;;  %v1242_v2 = vadd.f32 %v1241_v63, %v1240_v58  ;;  %v750_v3 = vadd.f32 %v749_v0, %v589_v59  ;;  %v602_v12 = vadd.f32 %v1239_v56, %v1702_v50 }
 0x12a   :  { %v1163_v4 = vpack.c.bf16 %v851_v61, %v851_v61  ;;  %v852_v7 = vmax.f32 %v758_v62, 0.0 }
 0x12b   :  { %v1161_v6 = vpack.c.bf16 %v849_v1, %v849_v1  ;;  %v850_v9 = vmax.f32 %v750_v3, 0.0  ;;  %v605_v22 = vadd.f32 %v1242_v2, %v1702_v50 }
 0x12c   :  { %1012 = vst.msk [vmem:[%s1881_s3 + $0x28] sm:$0xf] %vm1001_vm1, %v1163_v4  ;;  %v1164_v10 = vpack.c.bf16 %v852_v7, %v852_v7 }
 0x12d   :  { %1010 = vst.msk [vmem:[%s1881_s3 + $0x20] sm:$0xf] %vm1001_vm1, %v1161_v6  ;;  %v1162_v5 = vpack.c.bf16 %v850_v9, %v850_v9  ;;  %v1243_v11 = vpop.f32.mrb[28].mxu0  ;;  %v1333_v14 = vpop.f32.mrb[28].mxu1 }
 0x12e   :  { %1013 = vst.msk [vmem:[%s1881_s3 + $0x2c] sm:$0xf] %vm1001_vm1, %v1164_v10  ;;  %v1244_v15 = vpop.f32.mrb[29].mxu0  ;;  %v762_v16 = vpop.f32.mrb[29].mxu1 }
 0x12f   :  { %1011 = vst.msk [vmem:[%s1881_s3 + $0x24] sm:$0xf] %vm1001_vm1, %v1162_v5  ;;  %v1245_v17 = vadd.f32 %v1244_v15, %v1243_v11  ;;  %v763_v18 = vadd.f32 %v762_v16, %v602_v12  ;;  %v1246_v19 = vpop.f32.mrb[30].mxu0  ;;  %v1334_v21 = vpop.f32.mrb[30].mxu1  ;;  %v658_v12 = vadd.f32 %v1687_v20, %v1702_v50 }
 0x130   :  { %v1247_v23 = vpop.f32.mrb[31].mxu0  ;;  %v765_v24 = vpop.f32.mrb[31].mxu1 }
 0x131   :  { %v610_v26 = vadd.f32 %v1245_v17, %v1702_v50  ;;  %v853_v27 = vmax.f32 %v763_v18, 0.0  ;;  %v1248_v28 = vadd.f32 %v1247_v23, %v1246_v19  ;;  %v766_v29 = vadd.f32 %v765_v24, %v605_v22 }
 0x132   :  { %v650_v19 = vadd.f32 %v1683_v8, %v1702_v50  ;;  %v661_v24 = vadd.f32 %v1689_v25, %v1702_v50 }
 0x133   :  { %v771_v30 = vadd.f32 %v1333_v14, %v610_v26  ;;  %v1165_v31 = vpack.c.bf16 %v853_v27, %v853_v27  ;;  %v613_v33 = vadd.f32 %v1248_v28, %v1702_v50  ;;  %v854_v34 = vmax.f32 %v766_v29, 0.0 }
 0x135   :  { %v855_v35 = vmax.f32 %v771_v30, 0.0  ;;  %1014 = vst.msk [vmem:[%s1881_s3 + $0x30] sm:$0xf] %vm1001_vm1, %v1165_v31  ;;  %v774_v38 = vadd.f32 %v1334_v21, %v613_v33  ;;  %v1166_v39 = vpack.c.bf16 %v854_v34, %v854_v34  ;;  %v1249_v40 = vpop.f32.mrb[32].mxu0  ;;  %v1337_v41 = vpop.f32.mrb[32].mxu1 }
 0x136   :  { %v1250_v42 = vpop.f32.mrb[33].mxu0  ;;  %v778_v43 = vpop.f32.mrb[33].mxu1 }
 0x137   :  { %v1167_v45 = vpack.c.bf16 %v855_v35, %v855_v35  ;;  %v856_v46 = vmax.f32 %v774_v38, 0.0  ;;  %1015 = vst.msk [vmem:[%s1881_s3 + $0x34] sm:$0xf] %vm1001_vm1, %v1166_v39  ;;  %v1251_v36 = vadd.f32 %v1250_v42, %v1249_v40  ;;  %v1252_v47 = vpop.f32.mrb[34].mxu0  ;;  %v1338_v48 = vpop.f32.mrb[34].mxu1  ;;  %v653_v35 = vadd.f32 %v1685_v13, %v1702_v50 }
 0x138   :  { %v1253_v51 = vpop.f32.mrb[35].mxu0  ;;  %v781_v52 = vpop.f32.mrb[35].mxu1 }
 0x139   :  { %1016 = vst.msk [vmem:[%s1881_s3 + $0x38] sm:$0xf] %vm1001_vm1, %v1167_v45  ;;  %v1168_v53 = vpack.c.bf16 %v856_v46, %v856_v46  ;;  %v618_v54 = vadd.f32 %v1251_v36, %v1702_v50  ;;  %v1254_v55 = vadd.f32 %v1253_v51, %v1252_v47 }
 0x13b   :  { %1017 = vst.msk [vmem:[%s1881_s3 + $0x3c] sm:$0xf] %vm1001_vm1, %v1168_v53  ;;  %v779_v56 = vadd.f32 %v778_v43, %v618_v54  ;;  %v621_v57 = vadd.f32 %v1254_v55, %v1702_v50  ;;  %v666_v55 = vadd.f32 %v1691_v32, %v1702_v50 }
 0x13d   :  { %v857_v58 = vmax.f32 %v779_v56, 0.0  ;;  %v782_v60 = vadd.f32 %v781_v52, %v621_v57  ;;  %v1255_v59 = vpop.f32.mrb[36].mxu0  ;;  %v1786_v61 = vpop.f32.mrb[36].mxu1 }
 0x13e   :  { %v1256_v62 = vpop.f32.mrb[37].mxu0  ;;  %v794_v63 = vpop.f32.mrb[37].mxu1 }
 0x13f   :  { %v1169_v0 = vpack.c.bf16 %v857_v58, %v857_v58  ;;  %v858_v1 = vmax.f32 %v782_v60, 0.0  ;;  %v1257_v2 = vadd.f32 %v1256_v62, %v1255_v59  ;;  %v1258_v3 = vpop.f32.mrb[38].mxu0  ;;  %v1788_v4 = vpop.f32.mrb[38].mxu1  ;;  %v677_v60 = vadd.f32 %v1697_v49, %v1702_v50 }
 0x140   :  { %v1259_v7 = vpop.f32.mrb[39].mxu0  ;;  %v797_v6 = vpop.f32.mrb[39].mxu1 }
 0x141   :  { %1018 = vst.msk [vmem:[%s1881_s3 + $0x40] sm:$0xf] %vm1001_vm1, %v1169_v0  ;;  %v1170_v9 = vpack.c.bf16 %v858_v1, %v858_v1  ;;  %v626_v10 = vadd.f32 %v1257_v2, %v1702_v50  ;;  %v1260_v5 = vadd.f32 %v1259_v7, %v1258_v3 }
 0x143   :  { %1019 = vst.msk [vmem:[%s1881_s3 + $0x44] sm:$0xf] %vm1001_vm1, %v1170_v9  ;;  %v787_v11 = vadd.f32 %v1337_v41, %v626_v10  ;;  %v629_v14 = vadd.f32 %v1260_v5, %v1702_v50 }
 0x145   :  { %v859_v15 = vmax.f32 %v787_v11, 0.0  ;;  %v790_v16 = vadd.f32 %v1338_v48, %v629_v14  ;;  %v1261_v17 = vpop.f32.mrb[40].mxu0  ;;  %v1345_v18 = vpop.f32.mrb[40].mxu1  ;;  %v674_v48 = vadd.f32 %v1695_v44, %v1702_v50 }
 0x146   :  { %v819_v21 = vadd.f32 %v1345_v18, %v658_v12  ;;  %v1262_v22 = vpop.f32.mrb[41].mxu0  ;;  %v810_v23 = vpop.f32.mrb[41].mxu1 }
 0x147   :  { %v1171_v26 = vpack.c.bf16 %v859_v15, %v859_v15  ;;  %v860_v27 = vmax.f32 %v790_v16, 0.0  ;;  %v1263_v28 = vadd.f32 %v1262_v22, %v1261_v17  ;;  %v811_v29 = vadd.f32 %v810_v23, %v650_v19  ;;  %v1264_v30 = vpop.f32.mrb[42].mxu0  ;;  %v1346_v31 = vpop.f32.mrb[42].mxu1 }
 0x148   :  { %v867_v20 = vmax.f32 %v819_v21, 0.0  ;;  %v822_v33 = vadd.f32 %v1346_v31, %v661_v24  ;;  %v1265_v34 = vpop.f32.mrb[43].mxu0  ;;  %v813_v38 = vpop.f32.mrb[43].mxu1 }
 0x149   :  { %1020 = vst.msk [vmem:[%s1881_s3 + $0x48] sm:$0xf] %vm1001_vm1, %v1171_v26  ;;  %v1172_v8 = vpack.c.bf16 %v860_v27, %v860_v27  ;;  %v634_v25 = vadd.f32 %v1263_v28, %v1702_v50  ;;  %v865_v39 = vmax.f32 %v811_v29, 0.0  ;;  %v1266_v40 = vadd.f32 %v1265_v34, %v1264_v30 }
 0x14a   :  { %v1179_v41 = vpack.c.bf16 %v867_v20, %v867_v20  ;;  %v868_v42 = vmax.f32 %v822_v33, 0.0  ;;  %v814_v43 = vadd.f32 %v813_v38, %v653_v35 }
 0x14b   :  { %1021 = vst.msk [vmem:[%s1881_s3 + $0x4c] sm:$0xf] %vm1001_vm1, %v1172_v8  ;;  %v795_v13 = vadd.f32 %v794_v63, %v634_v25  ;;  %v1177_v45 = vpack.c.bf16 %v865_v39, %v865_v39  ;;  %v637_v46 = vadd.f32 %v1266_v40, %v1702_v50 }
 0x14c   :  { %1028 = vst.msk [vmem:[%s1881_s3 + $0x68] sm:$0xf] %vm1001_vm1, %v1179_v41  ;;  %v1180_v36 = vpack.c.bf16 %v868_v42, %v868_v42  ;;  %v866_v47 = vmax.f32 %v814_v43, 0.0 }
 0x14d   :  { %v861_v51 = vmax.f32 %v795_v13, 0.0  ;;  %1026 = vst.msk [vmem:[%s1881_s3 + $0x60] sm:$0xf] %vm1001_vm1, %v1177_v45  ;;  %v798_v52 = vadd.f32 %v797_v6, %v637_v46  ;;  %v1267_v53 = vpop.f32.mrb[44].mxu0  ;;  %v1349_v54 = vpop.f32.mrb[44].mxu1  ;;  %v669_v6 = vadd.f32 %v1693_v37, %v1702_v50 }
 0x14e   :  { %1029 = vst.msk [vmem:[%s1881_s3 + $0x6c] sm:$0xf] %vm1001_vm1, %v1180_v36  ;;  %v1178_v56 = vpack.c.bf16 %v866_v47, %v866_v47  ;;  %v835_v57 = vadd.f32 %v1349_v54, %v674_v48  ;;  %v1268_v44 = vpop.f32.mrb[45].mxu0  ;;  %v826_v58 = vpop.f32.mrb[45].mxu1 }
 0x14f   :  { %v1173_v59 = vpack.c.bf16 %v861_v51, %v861_v51  ;;  %v862_v62 = vmax.f32 %v798_v52, 0.0  ;;  %v1269_v63 = vadd.f32 %v1268_v44, %v1267_v53  ;;  %v827_v0 = vadd.f32 %v826_v58, %v666_v55  ;;  %v1270_v1 = vpop.f32.mrb[46].mxu0  ;;  %v1350_v2 = vpop.f32.mrb[46].mxu1 }
 0x150   :  { %1027 = vst.msk [vmem:[%s1881_s3 + $0x64] sm:$0xf] %vm1001_vm1, %v1178_v56  ;;  %v871_v32 = vmax.f32 %v835_v57, 0.0  ;;  %v838_v3 = vadd.f32 %v1350_v2, %v677_v60  ;;  %v1271_v7 = vpop.f32.mrb[47].mxu0  ;;  %v829_v9 = vpop.f32.mrb[47].mxu1 }
 0x151   :  { %1022 = vst.msk [vmem:[%s1881_s3 + $0x50] sm:$0xf] %vm1001_vm1, %v1173_v59  ;;  %v1174_v49 = vpack.c.bf16 %v862_v62, %v862_v62  ;;  %v642_v10 = vadd.f32 %v1269_v63, %v1702_v50  ;;  %v869_v5 = vmax.f32 %v827_v0, 0.0  ;;  %v1272_v11 = vadd.f32 %v1271_v7, %v1270_v1 }
 0x152   :  { %v1183_v14 = vpack.c.bf16 %v871_v32, %v871_v32  ;;  %v872_v12 = vmax.f32 %v838_v3, 0.0  ;;  %v830_v15 = vadd.f32 %v829_v9, %v669_v6 }
 0x153   :  { %1023 = vst.msk [vmem:[%s1881_s3 + $0x54] sm:$0xf] %vm1001_vm1, %v1174_v49  ;;  %v803_v37 = vadd.f32 %v1786_v61, %v642_v10  ;;  %v1181_v16 = vpack.c.bf16 %v869_v5, %v869_v5  ;;  %v645_v17 = vadd.f32 %v1272_v11, %v1702_v50 }
 0x154   :  { %1032 = vst.msk [vmem:[%s1881_s3 + $0x78] sm:$0xf] %vm1001_vm1, %v1183_v14  ;;  %v1184_v18 = vpack.c.bf16 %v872_v12, %v872_v12  ;;  %v870_v19 = vmax.f32 %v830_v15, 0.0 }
 0x155   :  { %v863_v21 = vmax.f32 %v803_v37, 0.0  ;;  %1030 = vst.msk [vmem:[%s1881_s3 + $0x70] sm:$0xf] %vm1001_vm1, %v1181_v16  ;;  %v806_v22 = vadd.f32 %v1788_v4, %v645_v17 }
 0x156   :  { %1033 = vst.msk [vmem:[%s1881_s3 + $0x7c] sm:$0xf] %vm1001_vm1, %v1184_v18  ;;  %v1182_v50 = vpack.c.bf16 %v870_v19, %v870_v19 }
 0x157   :  { %v1175_v61 = vpack.c.bf16 %v863_v21, %v863_v21  ;;  %v864_v23 = vmax.f32 %v806_v22, 0.0 }
 0x158   :  { %1031 = vst.msk [vmem:[%s1881_s3 + $0x74] sm:$0xf] %vm1001_vm1, %v1182_v50 }
 0x159   :  { %1024 = vst.msk [vmem:[%s1881_s3 + $0x58] sm:$0xf] %vm1001_vm1, %v1175_v61  ;;  %v1176_v24 = vpack.c.bf16 %v864_v23, %v864_v23 }
 0x15b   :  { %1025 = vst.msk [vmem:[%s1881_s3 + $0x5c] sm:$0xf] %vm1001_vm1, %v1176_v24 }

// kernel: refnet_forward.13
= control target key start
LH: loop header
LB: loop body
LE: loop exit
PB: predicated region body
PF: predicated region fallthrough
CT: control target
= control target key end

     0   :  { %vm242_vm0 = vcmask 261120   ;;  %vm425_vm1 = vcmask 257024   ;;  %s746_s1 = inlined_call_operand.vmem [shape: bf16[288,32], index: 1, kind: input, shape index: {}]   ;;  %s747_s0 = inlined_call_operand.vmem [shape: bf16[64,288], index: 0, kind: input, shape index: {}]   ;;  %s748_s2 = inlined_call_operand.vmem [shape: f32[1,32], index: 2, kind: input, shape index: {}]   ;;  %s749_s3 = inlined_call_operand.vmem [shape: bf16[64,32], index: 3, kind: output, shape index: {}]  }
   0x1   :  { %v563_v0 = vld [vmem:[%s746_s1 + $0x40] sm:$0xff]   ;;  %v565_v2 = vld [vmem:[%s746_s1 + $0x48] sm:$0xff]   ;;  %v567_v4 = vld [vmem:[%s746_s1 + $0x50] sm:$0xff]  }
   0x2   :  { %v564_v1 = vld [vmem:[%s746_s1] sm:$0xff]   ;;  %489 = vmatprep.subr.bf16.mxu0 %v563_v0  ;;  %547 = vmatprep.subr.bf16.mxu1 %v563_v0  ;;  %v566_v3 = vld [vmem:[%s746_s1 + $0x8] sm:$0xff]   ;;  %v568_v5 = vld [vmem:[%s746_s1 + $0x10] sm:$0xff]  }
   0x3   :  { %490 = vmatpush3.bf16.msra.mxu0 %v564_v1  ;;  %555 = vmatpush3.bf16.msra.mxu1 %v564_v1  ;;  %v569_v6 = vld [vmem:[%s746_s1 + $0x58] sm:$0xff]   ;;  %v571_v8 = vld [vmem:[%s746_s1 + $0x60] sm:$0xff]   ;;  %v573_v10 = vld [vmem:[%s746_s1 + $0x68] sm:$0xff]  }
   0x4   :  { %491 = vmatprep.subr.bf16.mxu0 %v565_v2  ;;  %548 = vmatprep.subr.bf16.mxu1 %v565_v2  ;;  %v570_v7 = vld [vmem:[%s746_s1 + $0x18] sm:$0xff]   ;;  %v572_v9 = vld [vmem:[%s746_s1 + $0x20] sm:$0xff]   ;;  %v574_v13 = vld [vmem:[%s746_s1 + $0x28] sm:$0xff]  }
   0x5   :  { %v581_v11 = vld [vmem:[%s747_s0 + $0x4] ss:$12 sps:$4 sm:$0xff]   ;;  %v584_v12 = vld [vmem:[%s747_s0 + $0x4c] ss:$12 sps:$4 sm:$0xff]   ;;  %v582_v20 = vld [vmem:[%s747_s0 + $0x48] ss:$12 sps:$4 sm:$0xff]  }
   0x6   :  { %v575_v14 = vld [vmem:[%s746_s1 + $0x70] sm:$0xff]   ;;  %287 = vmatprep.mubr.bf16.mxu0 %v581_v11  ;;  %311 = vmatprep.mubr.bf16.mxu1 %v584_v12  ;;  %v577_v16 = vld [vmem:[%s746_s1 + $0x78] sm:$0xff]   ;;  %v585_v18 = vld [vmem:[%s746_s1 + $0x80] sm:$0xff]  }
   0x7   :  { %492 = vmatpush3.bf16.msra.mxu0 %v566_v3  ;;  %556 = vmatpush3.bf16.msra.mxu1 %v566_v3  ;;  %v576_v15 = vld [vmem:[%s746_s1 + $0x30] sm:$0xff]   ;;  %v578_v17 = vld [vmem:[%s746_s1 + $0x38] sm:$0xff]   ;;  %v579_v19 = vld [vmem:[%s747_s0] ss:$12 sps:$4 sm:$0xff]  }
   0x8   :  { %493 = vmatprep.subr.bf16.mxu0 %v567_v4  ;;  %549 = vmatprep.subr.bf16.mxu1 %v567_v4  ;;  %v587_v21 = vld [vmem:[%s747_s0 + $0x1c] ss:$12 sps:$4 sm:$0xff]   ;;  %v590_v24 = vld [vmem:[%s747_s0 + $0x18] ss:$12 sps:$4 sm:$0xff]   ;;  %v591_v25 = vld [vmem:[%s747_s0 + $0x20] ss:$12 sps:$4 sm:$0xff]  }
   0x9   :  { %v586_v22 = vld [vmem:[%s746_s1 + $0x88] sm:$0xff]   ;;  %v592_v26 = vld [vmem:[%s747_s0 + $0x34] ss:$12 sps:$4 sm:$0xff]   ;;  %v594_v27 = vld [vmem:[%s747_s0 + $0x38] ss:$12 sps:$4 sm:$0xff]  }
   0xa   :  { %v589_v23 = vld [vmem:[%s747_s0 + $0x8] ss:$12 sps:$4 sm:$0xff]   ;;  %v595_v28 = vld [vmem:[%s747_s0 + $0x30] ss:$12 sps:$4 sm:$0xff]   ;;  %v438_v42 = vld [vmem:[%s748_s2] ss:$0 sm:$0xff] }
   0xb   :  { %494 = vmatpush3.bf16.msra.mxu0 %v568_v5  ;;  %557 = vmatpush3.bf16.msra.mxu1 %v568_v5  ;;  %v596_v29 = vld [vmem:[%s747_s0 + $0x50] ss:$12 sps:$4 sm:$0xff]  }
   0xc   :  { %495 = vmatprep.subr.bf16.mxu0 %v569_v6  ;;  %550 = vmatprep.subr.bf16.mxu1 %v569_v6 }
   0xf   :  { %496 = vmatpush3.bf16.msra.mxu0 %v570_v7  ;;  %558 = vmatpush3.bf16.msra.mxu1 %v570_v7 }
  0x10   :  { %497 = vmatprep.subr.bf16.mxu0 %v571_v8  ;;  %551 = vmatprep.subr.bf16.mxu1 %v571_v8 }
  0x13   :  { %498 = vmatpush3.bf16.msra.mxu0 %v572_v9  ;;  %559 = vmatpush3.bf16.msra.mxu1 %v572_v9 }
  0x14   :  { %499 = vmatprep.subr.bf16.mxu0 %v573_v10  ;;  %552 = vmatprep.subr.bf16.mxu1 %v573_v10 }
  0x17   :  { %500 = vmatpush3.bf16.msra.mxu0 %v574_v13  ;;  %560 = vmatpush3.bf16.msra.mxu1 %v574_v13 }
  0x18   :  { %501 = vmatprep.subr.bf16.mxu0 %v575_v14  ;;  %553 = vmatprep.subr.bf16.mxu1 %v575_v14 }
  0x1b   :  { %502 = vmatpush3.bf16.msra.mxu0 %v576_v15  ;;  %561 = vmatpush3.bf16.msra.mxu1 %v576_v15 }
  0x1c   :  { %503 = vmatprep.subr.bf16.mxu0 %v577_v16  ;;  %554 = vmatprep.subr.bf16.mxu1 %v577_v16 }
  0x1f   :  { %504 = vmatpush3.bf16.msra.mxu0 %v578_v17  ;;  %562 = vmatpush3.bf16.msra.mxu1 %v578_v17 }
  0x20   :  { %535 = vmatprep.subr.bf16.mxu1 %v585_v18 }
  0x22   :  { %288 = vmatmul.mubr.bf16.vlgmr.msra.gmra.mrb[0].mxu0 %v579_v19  ;;  %312 = vmatmul.mubr.bf16.vlgmr.msra.gmra.mrb[0].mxu1 %v582_v20 }
  0x23   :  { %536 = vmatpush3.bf16.msra.mxu1 %v585_v18  ;;  %295 = vmatprep.mubr.bf16.mxu0 %v587_v21 }
  0x24   :  { %537 = vmatprep.subr.bf16.mxu1 %v586_v22  ;;  %539 = vmatprep.mubr.msk.bf16.mxu1 %vm242_vm0, %v589_v23 }
  0x27   :  { %538 = vmatpush3.bf16.msra.mxu1 %v586_v22 }
  0x2a   :  { %296 = vmatmul.mubr.bf16.gmra.mrb[4].mxu0 %v590_v24  ;;  %540 = vmatmul.mubr.msk.bf16.vlgmr.msra.gmra.mrb[4].mxu1 %vm242_vm0, %v591_v25 }
  0x2b   :  { %303 = vmatprep.mubr.bf16.mxu0 %v592_v26  ;;  %543 = vmatprep.mubr.msk.bf16.mxu1 %vm242_vm0, %v594_v27 }
  0x32   :  { %304 = vmatmul.mubr.bf16.gmra.mrb[8].mxu0 %v595_v28  ;;  %544 = vmatmul.mubr.msk.bf16.gmra.mrb[8].mxu1 %vm242_vm0, %v596_v29 }
  0xf5   :  { %v505_v30 = vpop.f32.mrb[0].mxu0  ;;  %v523_v31 = vpop.f32.mrb[0].mxu1 }
  0xf6   :  { %v506_v32 = vpop.f32.mrb[1].mxu0  ;;  %v524_v33 = vpop.f32.mrb[1].mxu1 }
  0xf7   :  { %v507_v34 = vadd.f32 %v506_v32, %v505_v30  ;;  %v508_v35 = vpop.f32.mrb[2].mxu0  ;;  %v525_v36 = vadd.f32 %v524_v33, %v523_v31  ;;  %v526_v37 = vpop.f32.mrb[2].mxu1 }
  0xf8   :  { %v509_v38 = vpop.f32.mrb[3].mxu0  ;;  %v527_v39 = vpop.f32.mrb[3].mxu1 }
  0xf9   :  { %v510_v40 = vadd.f32 %v509_v38, %v508_v35  ;;  %v528_v41 = vadd.f32 %v527_v39, %v526_v37  ;;  %v290_v45 = vadd.f32 %v507_v34, %v438_v42  ;;  %v314_v63 = vadd.f32 %v525_v36, %v438_v42 }
  0xfb   :  { %v293_v52 = vadd.f32 %v510_v40, %v438_v42  ;;  %v317_v8 = vadd.f32 %v528_v41, %v438_v42 }
  0xfd   :  { %v511_v43 = vpop.f32.mrb[4].mxu0  ;;  %v541_v44 = vpop.f32.mrb[4].mxu1 }
  0xfe   :  { %v512_v46 = vpop.f32.mrb[5].mxu0  ;;  %v354_v47 = vpop.f32.mrb[5].mxu1 }
  0xff   :  { %v513_v48 = vadd.f32 %v512_v46, %v511_v43  ;;  %v355_v49 = vadd.f32 %v354_v47, %v290_v45  ;;  %v514_v50 = vpop.f32.mrb[6].mxu0  ;;  %v542_v51 = vpop.f32.mrb[6].mxu1 }
 0x100   :  { %v515_v53 = vpop.f32.mrb[7].mxu0  ;;  %v357_v54 = vpop.f32.mrb[7].mxu1 }
 0x101   :  { %v298_v55 = vadd.f32 %v513_v48, %v438_v42  ;;  %v385_v56 = vmax.f32 %v355_v49, 0.0  ;;  %v516_v57 = vadd.f32 %v515_v53, %v514_v50  ;;  %v358_v58 = vadd.f32 %v357_v54, %v293_v52 }
 0x103   :  { %v363_v59 = vadd.f32 %v541_v44, %v298_v55  ;;  %v481_v60 = vpack.c.bf16 %v385_v56, %v385_v56  ;;  %v301_v61 = vadd.f32 %v516_v57, %v438_v42  ;;  %v386_v62 = vmax.f32 %v358_v58, 0.0 }
 0x105   :  { %v387_v0 = vmax.f32 %v363_v59, 0.0  ;;  %426 = vst.msk [vmem:[%s749_s3] sm:$0xf] %vm425_vm1, %v481_v60  ;;  %v366_v1 = vadd.f32 %v542_v51, %v301_v61  ;;  %v482_v2 = vpack.c.bf16 %v386_v62, %v386_v62  ;;  %v517_v3 = vpop.f32.mrb[8].mxu0  ;;  %v545_v4 = vpop.f32.mrb[8].mxu1 }
 0x106   :  { %v379_v5 = vadd.f32 %v545_v4, %v314_v63  ;;  %v518_v6 = vpop.f32.mrb[9].mxu0  ;;  %v370_v7 = vpop.f32.mrb[9].mxu1 }
 0x107   :  { %v483_v9 = vpack.c.bf16 %v387_v0, %v387_v0  ;;  %v388_v10 = vmax.f32 %v366_v1, 0.0  ;;  %427 = vst.msk [vmem:[%s749_s3 + $0x4] sm:$0xf] %vm425_vm1, %v482_v2  ;;  %v519_v11 = vadd.f32 %v518_v6, %v517_v3  ;;  %v520_v12 = vpop.f32.mrb[10].mxu0  ;;  %v546_v13 = vpop.f32.mrb[10].mxu1 }
 0x108   :  { %v391_v14 = vmax.f32 %v379_v5, 0.0  ;;  %v382_v15 = vadd.f32 %v546_v13, %v317_v8  ;;  %v521_v16 = vpop.f32.mrb[11].mxu0  ;;  %v373_v17 = vpop.f32.mrb[11].mxu1 }
 0x109   :  { %428 = vst.msk [vmem:[%s749_s3 + $0x8] sm:$0xf] %vm425_vm1, %v483_v9  ;;  %v484_v18 = vpack.c.bf16 %v388_v10, %v388_v10  ;;  %v306_v19 = vadd.f32 %v519_v11, %v438_v42  ;;  %v522_v20 = vadd.f32 %v521_v16, %v520_v12 }
 0x10a   :  { %v487_v21 = vpack.c.bf16 %v391_v14, %v391_v14  ;;  %v392_v22 = vmax.f32 %v382_v15, 0.0 }
 0x10b   :  { %429 = vst.msk [vmem:[%s749_s3 + $0xc] sm:$0xf] %vm425_vm1, %v484_v18  ;;  %v371_v23 = vadd.f32 %v370_v7, %v306_v19  ;;  %v309_v24 = vadd.f32 %v522_v20, %v438_v42 }
 0x10c   :  { %432 = vst.msk [vmem:[%s749_s3 + $0x18] sm:$0xf] %vm425_vm1, %v487_v21  ;;  %v488_v25 = vpack.c.bf16 %v392_v22, %v392_v22 }
 0x10d   :  { %v389_v26 = vmax.f32 %v371_v23, 0.0  ;;  %v374_v27 = vadd.f32 %v373_v17, %v309_v24 }
 0x10e   :  { %433 = vst.msk [vmem:[%s749_s3 + $0x1c] sm:$0xf] %vm425_vm1, %v488_v25 }
 0x10f   :  { %v485_v28 = vpack.c.bf16 %v389_v26, %v389_v26  ;;  %v390_v29 = vmax.f32 %v374_v27, 0.0 }
 0x111   :  { %430 = vst.msk [vmem:[%s749_s3 + $0x10] sm:$0xf] %vm425_vm1, %v485_v28  ;;  %v486_v30 = vpack.c.bf16 %v390_v29, %v390_v29 }
 0x113   :  { %431 = vst.msk [vmem:[%s749_s3 + $0x14] sm:$0xf] %vm425_vm1, %v486_v30 }

// kernel: refnet_forward.14
= control target key start
LH: loop header
LB: loop body
LE: loop exit
PB: predicated region body
PF: predicated region fallthrough
CT: control target
= control target key end

     0   :  { %v372_v1 = vmov 0.0   ;;  %vm373_vm0 = vmmov 0   ;;  %vm185_vm1 = vcmask 261120   ;;  %vm281_vm2 = vcmask 257024   ;;  %s466_s1 = inlined_call_operand.vmem [shape: bf16[288,32], index: 1, kind: input, shape index: {}]   ;;  %s467_s0 = inlined_call_operand.vmem [shape: bf16[16,288], index: 0, kind: input, shape index: {}]   ;;  %s468_s2 = inlined_call_operand.vmem [shape: f32[1,32], index: 2, kind: input, shape index: {}]   ;;  %s469_s3 = inlined_call_operand.vmem [shape: bf16[16,32], index: 3, kind: output, shape index: {}]  }
   0x1   :  { %v350_v0 = vld [vmem:[%s466_s1 + $0x40] sm:$0xff]   ;;  %340 = vmatprep.subr.bf16.mxu1 %v372_v1  ;;  %344 = vmatprep.mubr.msk.bf16.mxu1 %vm373_vm0, %v372_v1  ;;  %v352_v3 = vld [vmem:[%s466_s1 + $0x48] sm:$0xff]   ;;  %v354_v5 = vld [vmem:[%s466_s1 + $0x50] sm:$0xff]  }
   0x2   :  { %v351_v2 = vld [vmem:[%s466_s1] sm:$0xff]   ;;  %315 = vmatprep.subr.bf16.mxu0 %v350_v0  ;;  %v353_v4 = vld [vmem:[%s466_s1 + $0x8] sm:$0xff]   ;;  %v355_v6 = vld [vmem:[%s466_s1 + $0x10] sm:$0xff]  }
   0x3   :  { %316 = vmatpush3.bf16.msra.mxu0 %v351_v2  ;;  %v356_v7 = vld [vmem:[%s466_s1 + $0x58] sm:$0xff]   ;;  %v358_v9 = vld [vmem:[%s466_s1 + $0x60] sm:$0xff]   ;;  %v360_v12 = vld [vmem:[%s466_s1 + $0x68] sm:$0xff]  }
   0x4   :  { %317 = vmatprep.subr.bf16.mxu0 %v352_v3  ;;  %v357_v8 = vld [vmem:[%s466_s1 + $0x18] sm:$0xff]   ;;  %v364_v10 = vld [vmem:[%s466_s1 + $0x80] sm:$0xff]   ;;  %v361_v13 = vld [vmem:[%s466_s1 + $0x28] sm:$0xff]  }
   0x5   :  { %v359_v11 = vld [vmem:[%s466_s1 + $0x20] sm:$0xff]   ;;  %341 = vmatpush3.bf16.msra.mxu1 %v364_v10  ;;  %v370_v15 = vld [vmem:[%s466_s1 + $0x88] sm:$0xff]   ;;  %v362_v16 = vld [vmem:[%s466_s1 + $0x70] sm:$0xff]  }
   0x6   :  { %342 = vmatprep.subr.bf16.mxu1 %v372_v1  ;;  %v369_v14 = vld [vmem:[%s467_s0 + $0x4] ss:$12 sps:$4 sm:$0xff]   ;;  %v371_v17 = vld [vmem:[%s467_s0 + $0x8] ss:$12 sps:$4 sm:$0xff]   ;;  %v365_v19 = vld [vmem:[%s466_s1 + $0x78] sm:$0xff]  }
   0x7   :  { %318 = vmatpush3.bf16.msra.mxu0 %v353_v4  ;;  %221 = vmatprep.mubr.bf16.mxu0 %v369_v14  ;;  %v363_v18 = vld [vmem:[%s466_s1 + $0x30] sm:$0xff]   ;;  %v366_v20 = vld [vmem:[%s466_s1 + $0x38] sm:$0xff]   ;;  %v367_v21 = vld [vmem:[%s467_s0] ss:$12 sps:$4 sm:$0xff]  }
   0x8   :  { %319 = vmatprep.subr.bf16.mxu0 %v354_v5  ;;  %v288_v28 = vld [vmem:[%s468_s2] ss:$0 sm:$0xff] }
   0x9   :  { %343 = vmatpush3.bf16.msra.mxu1 %v370_v15 }
   0xb   :  { %320 = vmatpush3.bf16.msra.mxu0 %v355_v6 }
   0xc   :  { %321 = vmatprep.subr.bf16.mxu0 %v356_v7  ;;  %345 = vmatmul.mubr.msk.bf16.vlgmr.msra.gmra.mrb[0].mxu1 %vm185_vm1, %v371_v17 }
   0xf   :  { %322 = vmatpush3.bf16.msra.mxu0 %v357_v8 }
  0x10   :  { %323 = vmatprep.subr.bf16.mxu0 %v358_v9 }
  0x13   :  { %324 = vmatpush3.bf16.msra.mxu0 %v359_v11 }
  0x14   :  { %325 = vmatprep.subr.bf16.mxu0 %v360_v12 }
  0x17   :  { %326 = vmatpush3.bf16.msra.mxu0 %v361_v13 }
  0x18   :  { %327 = vmatprep.subr.bf16.mxu0 %v362_v16 }
  0x1b   :  { %328 = vmatpush3.bf16.msra.mxu0 %v363_v18 }
  0x1c   :  { %329 = vmatprep.subr.bf16.mxu0 %v365_v19 }
  0x1f   :  { %330 = vmatpush3.bf16.msra.mxu0 %v366_v20 }
  0x22   :  { %222 = vmatmul.mubr.bf16.vlgmr.msra.gmra.mrb[0].mxu0 %v367_v21 }
  0xdf   :  { %v264_v22 = vpop.f32.mrb[0].mxu1 }
  0xe0   :  { %v346_v23 = vpop.f32.mrb[1].mxu1 }
  0xe1   :  { %v267_v24 = vpop.f32.mrb[2].mxu1 }
  0xe2   :  { %v347_v25 = vpop.f32.mrb[3].mxu1 }
  0xf5   :  { %v331_v26 = vpop.f32.mrb[0].mxu0 }
  0xf6   :  { %v332_v27 = vpop.f32.mrb[1].mxu0 }
  0xf7   :  { %v333_v29 = vadd.f32 %v332_v27, %v331_v26  ;;  %v334_v30 = vpop.f32.mrb[2].mxu0 }
  0xf8   :  { %v335_v31 = vpop.f32.mrb[3].mxu0 }
  0xf9   :  { %v224_v32 = vadd.f32 %v333_v29, %v288_v28  ;;  %v336_v33 = vadd.f32 %v335_v31, %v334_v30 }
  0xfb   :  { %v265_v34 = vadd.f32 %v264_v22, %v224_v32  ;;  %v227_v35 = vadd.f32 %v336_v33, %v288_v28 }
  0xfd   :  { %v271_v36 = vmax.f32 %v265_v34, 0.0  ;;  %v268_v37 = vadd.f32 %v267_v24, %v227_v35 }
  0xff   :  { %v313_v38 = vpack.c.bf16 %v271_v36, %v271_v36  ;;  %v272_v39 = vmax.f32 %v268_v37, 0.0 }
 0x101   :  { %282 = vst.msk [vmem:[%s469_s3] sm:$0xf] %vm281_vm2, %v313_v38  ;;  %v314_v40 = vpack.c.bf16 %v272_v39, %v272_v39 }
 0x103   :  { %283 = vst.msk [vmem:[%s469_s3 + $0x4] sm:$0xf] %vm281_vm2, %v314_v40 }

// kernel: refnet_forward.19
= control target key start
LH: loop header
LB: loop body
LE: loop exit
PB: predicated region body
PF: predicated region fallthrough
CT: control target
= control target key end

     0   :  { %v351_v1 = vmov 0.0   ;;  %vm352_vm0 = vmmov 0   ;;  %vm185_vm1 = vcmask 261120   ;;  %vm269_vm2 = vcmask 121856   ;;  %s450_s2 = inlined_call_operand.vmem [shape: bf16[288,15], index: 2, kind: input, shape index: {}]   ;;  %s451_s0 = inlined_call_operand.vmem [shape: bf16[8,288], index: 0, kind: input, shape index: {}]   ;;  %s452_s1 = inlined_call_operand.vmem [shape: bf16[8,288], index: 1, kind: input, shape index: {}]   ;;  %s453_s3 = inlined_call_operand.vmem [shape: f32[1,15], index: 3, kind: input, shape index: {}]   ;;  %s454_s4 = inlined_call_operand.vmem [shape: f32[8,15], index: 4, kind: output, shape index: {}]  }
   0x1   :  { %v333_v0 = vld [vmem:[%s450_s2 + $0x40] sm:$0xff]   ;;  %323 = vmatprep.subr.bf16.mxu1 %v351_v1  ;;  %327 = vmatprep.mubr.msk.bf16.mxu1 %vm352_vm0, %v351_v1  ;;  %v335_v3 = vld [vmem:[%s450_s2 + $0x48] sm:$0xff]   ;;  %v337_v5 = vld [vmem:[%s450_s2 + $0x50] sm:$0xff]  }
   0x2   :  { %v334_v2 = vld [vmem:[%s450_s2] sm:$0xff]   ;;  %298 = vmatprep.subr.bf16.mxu0 %v333_v0  ;;  %v336_v4 = vld [vmem:[%s450_s2 + $0x8] sm:$0xff]   ;;  %v338_v6 = vld [vmem:[%s450_s2 + $0x10] sm:$0xff]  }
   0x3   :  { %299 = vmatpush3.bf16.msra.mxu0 %v334_v2  ;;  %v339_v7 = vld [vmem:[%s450_s2 + $0x58] sm:$0xff]   ;;  %v341_v9 = vld [vmem:[%s450_s2 + $0x60] sm:$0xff]   ;;  %v343_v12 = vld [vmem:[%s450_s2 + $0x68] sm:$0xff]  }
   0x4   :  { %300 = vmatprep.subr.bf16.mxu0 %v335_v3  ;;  %v340_v8 = vld [vmem:[%s450_s2 + $0x18] sm:$0xff]   ;;  %v347_v10 = vld [vmem:[%s450_s2 + $0x80] sm:$0xff]   ;;  %v19_v14 = vld [vmem:[%s451_s0 + $0x8] sm:$0xf] }
   0x5   :  { %v342_v11 = vld [vmem:[%s450_s2 + $0x20] sm:$0xff]   ;;  %324 = vmatpush3.bf16.msra.mxu1 %v347_v10  ;;  %v21_v16 = vld [vmem:[%s452_s1 + $0x8] sm:$0xf]  ;;  %v345_v21 = vld [vmem:[%s450_s2 + $0x70] sm:$0xff]  }
   0x6   :  { %325 = vmatprep.subr.bf16.mxu1 %v351_v1  ;;  %v18_v13 = vld [vmem:[%s451_s0] sm:$0xff]  ;;  %v344_v18 = vld [vmem:[%s450_s2 + $0x28] sm:$0xff]   ;;  %v23_v19 = vsub.bf16 %v19_v14, %v21_v16  ;;  %v346_v24 = vld [vmem:[%s450_s2 + $0x30] sm:$0xff]  }
   0x7   :  { %301 = vmatpush3.bf16.msra.mxu0 %v336_v4  ;;  %v20_v15 = vld [vmem:[%s452_s1] sm:$0xff]  ;;  %v350_v20 = vld [vmem:[%s450_s2 + $0x88] sm:$0xff]   ;;  %v348_v25 = vld [vmem:[%s450_s2 + $0x78] sm:$0xff]  }
   0x8   :  { %302 = vmatprep.subr.bf16.mxu0 %v337_v5  ;;  %v22_v17 = vsub.bf16 %v18_v13, %v20_v15  ;;  %v278_v23 = vcombine.low %v23_v19, %v23_v19  ;;  %v349_v26 = vld [vmem:[%s450_s2 + $0x38] sm:$0xff]   ;;  %v275_v34 = vld [vmem:[%s453_s3] ss:$0 sm:$0xff] }
   0x9   :  { %326 = vmatpush3.bf16.msra.mxu1 %v350_v20 }
   0xa   :  { %v277_v22 = vcombine.high %v22_v17, %v22_v17  ;;  %v276_v27 = vcombine.low %v22_v17, %v22_v17 }
   0xb   :  { %303 = vmatpush3.bf16.msra.mxu0 %v338_v6 }
   0xc   :  { %304 = vmatprep.subr.bf16.mxu0 %v339_v7  ;;  %221 = vmatprep.mubr.bf16.mxu0 %v277_v22 }
   0xd   :  { %328 = vmatmul.mubr.msk.bf16.vlgmr.msra.gmra.mrb[0].mxu1 %vm185_vm1, %v278_v23 }
   0xf   :  { %305 = vmatpush3.bf16.msra.mxu0 %v340_v8 }
  0x10   :  { %306 = vmatprep.subr.bf16.mxu0 %v341_v9 }
  0x13   :  { %307 = vmatpush3.bf16.msra.mxu0 %v342_v11 }
  0x14   :  { %308 = vmatprep.subr.bf16.mxu0 %v343_v12 }
  0x17   :  { %309 = vmatpush3.bf16.msra.mxu0 %v344_v18 }
  0x18   :  { %310 = vmatprep.subr.bf16.mxu0 %v345_v21 }
  0x1b   :  { %311 = vmatpush3.bf16.msra.mxu0 %v346_v24 }
  0x1c   :  { %312 = vmatprep.subr.bf16.mxu0 %v348_v25 }
  0x1f   :  { %313 = vmatpush3.bf16.msra.mxu0 %v349_v26 }
  0x22   :  { %222 = vmatmul.mubr.bf16.vlgmr.msra.gmra.mrb[0].mxu0 %v276_v27 }
  0xe0   :  { %v263_v28 = vpop.f32.mrb[0].mxu1 }
  0xe1   :  { %v329_v29 = vpop.f32.mrb[1].mxu1 }
  0xe2   :  { %v266_v30 = vpop.f32.mrb[2].mxu1 }
  0xe3   :  { %v330_v31 = vpop.f32.mrb[3].mxu1 }
  0xf5   :  { %v314_v32 = vpop.f32.mrb[0].mxu0 }
  0xf6   :  { %v315_v33 = vpop.f32.mrb[1].mxu0 }
  0xf7   :  { %v316_v35 = vadd.f32 %v315_v33, %v314_v32  ;;  %v317_v36 = vpop.f32.mrb[2].mxu0 }
  0xf8   :  { %v318_v37 = vpop.f32.mrb[3].mxu0 }
  0xf9   :  { %v224_v38 = vadd.f32 %v316_v35, %v275_v34 }
  0xfb   :  { %v264_v39 = vadd.f32 %v263_v28, %v224_v38 }
  0xfd   :  { %270 = vst.msk [vmem:[%s454_s4] sm:$0xff] %vm269_vm2, %v264_v39 }

// kernel: refnet_forward.17
= control target key start
LH: loop header
LB: loop body
LE: loop exit
PB: predicated region body
PF: predicated region fallthrough
CT: control target
= control target key end

     0   :  { %vm223_vm0 = vcmask 261120   ;;  %vm328_vm1 = vcmask 121856   ;;  %s568_s2 = inlined_call_operand.vmem [shape: bf16[288,15], index: 2, kind: input, shape index: {}]   ;;  %s569_s0 = inlined_call_operand.vmem [shape: bf16[32,288], index: 0, kind: input, shape index: {}]   ;;  %s570_s1 = inlined_call_operand.vmem [shape: bf16[32,288], index: 1, kind: input, shape index: {}]   ;;  %s571_s3 = inlined_call_operand.vmem [shape: f32[1,15], index: 3, kind: input, shape index: {}]   ;;  %s572_s4 = inlined_call_operand.vmem [shape: f32[32,15], index: 4, kind: output, shape index: {}]  }
   0x1   :  { %v404_v0 = vld [vmem:[%s568_s2 + $0x40] sm:$0xff]   ;;  %v406_v2 = vld [vmem:[%s568_s2 + $0x48] sm:$0xff]   ;;  %v408_v4 = vld [vmem:[%s568_s2 + $0x50] sm:$0xff]  }
   0x2   :  { %v405_v1 = vld [vmem:[%s568_s2] sm:$0xff]   ;;  %364 = vmatprep.subr.bf16.mxu0 %v404_v0  ;;  %v407_v3 = vld [vmem:[%s568_s2 + $0x8] sm:$0xff]   ;;  %v409_v5 = vld [vmem:[%s568_s2 + $0x10] sm:$0xff]  }
   0x3   :  { %365 = vmatpush3.bf16.msra.mxu0 %v405_v1  ;;  %v410_v6 = vld [vmem:[%s568_s2 + $0x58] sm:$0xff]   ;;  %v412_v8 = vld [vmem:[%s568_s2 + $0x60] sm:$0xff]   ;;  %v414_v11 = vld [vmem:[%s568_s2 + $0x68] sm:$0xff]  }
   0x4   :  { %366 = vmatprep.subr.bf16.mxu0 %v406_v2  ;;  %v411_v7 = vld [vmem:[%s568_s2 + $0x18] sm:$0xff]   ;;  %v413_v9 = vld [vmem:[%s568_s2 + $0x20] sm:$0xff]   ;;  %v415_v12 = vld [vmem:[%s568_s2 + $0x28] sm:$0xff]  }
   0x5   :  { %v419_v10 = vld [vmem:[%s568_s2 + $0x80] sm:$0xff]   ;;  %v20_v14 = vld [vmem:[%s569_s0 + $0xc] sm:$0xff]  ;;  %v19_v21 = vld [vmem:[%s569_s0 + $0x8] sm:$0xf] }
   0x6   :  { %396 = vmatprep.subr.bf16.mxu1 %v419_v10  ;;  %v18_v13 = vld [vmem:[%s569_s0] sm:$0xff]  ;;  %v416_v16 = vld [vmem:[%s568_s2 + $0x70] sm:$0xff]   ;;  %v421_v20 = vld [vmem:[%s568_s2 + $0x88] sm:$0xff]  }
   0x7   :  { %367 = vmatpush3.bf16.msra.mxu0 %v407_v3  ;;  %v26_v15 = vld [vmem:[%s570_s1] sm:$0xff]  ;;  %397 = vmatpush3.bf16.msra.mxu1 %v419_v10  ;;  %v28_v17 = vld [vmem:[%s570_s1 + $0xc] sm:$0xff]  ;;  %v21_v22 = vld [vmem:[%s569_s0 + $0x14] sm:$0xf] }
   0x8   :  { %368 = vmatprep.subr.bf16.mxu0 %v408_v4  ;;  %v34_v18 = vsub.bf16 %v18_v13, %v26_v15  ;;  %v36_v19 = vsub.bf16 %v20_v14, %v28_v17  ;;  %v27_v23 = vld [vmem:[%s570_s1 + $0x8] sm:$0xf]  ;;  %v29_v24 = vld [vmem:[%s570_s1 + $0x14] sm:$0xf]  ;;  %v23_v25 = vld [vmem:[%s569_s0 + $0x20] sm:$0xf]  ;;  %398 = vmatprep.subr.bf16.mxu1 %v421_v20 }
   0x9   :  { %v35_v27 = vsub.bf16 %v19_v21, %v27_v23  ;;  %v37_v28 = vsub.bf16 %v21_v22, %v29_v24  ;;  %v25_v29 = vld [vmem:[%s569_s0 + $0x2c] sm:$0xf]  ;;  %v31_v30 = vld [vmem:[%s570_s1 + $0x20] sm:$0xf]  ;;  %v417_v34 = vld [vmem:[%s568_s2 + $0x30] sm:$0xff]  }
   0xa   :  { %v339_v26 = vcombine.high %v34_v18, %v36_v19  ;;  %v33_v31 = vld [vmem:[%s570_s1 + $0x2c] sm:$0xf]  ;;  %v39_v32 = vsub.bf16 %v23_v25, %v31_v30  ;;  %v418_v35 = vld [vmem:[%s568_s2 + $0x78] sm:$0xff]   ;;  %v24_v39 = vld [vmem:[%s569_s0 + $0x24] sm:$0xff]  ;;  %v338_v45 = vcombine.low %v34_v18, %v36_v19 }
   0xb   :  { %369 = vmatpush3.bf16.msra.mxu0 %v409_v5  ;;  %399 = vmatpush3.bf16.msra.mxu1 %v421_v20  ;;  %v41_v33 = vsub.bf16 %v25_v29, %v33_v31  ;;  %v340_v36 = vcombine.low %v35_v27, %v37_v28  ;;  %v22_v37 = vld [vmem:[%s569_s0 + $0x18] sm:$0xff]  ;;  %v32_v41 = vld [vmem:[%s570_s1 + $0x24] sm:$0xff]  ;;  %v337_v54 = vld [vmem:[%s571_s3] ss:$0 sm:$0xff] }
   0xc   :  { %370 = vmatprep.subr.bf16.mxu0 %v410_v6  ;;  %262 = vmatprep.mubr.bf16.mxu0 %v339_v26  ;;  %v30_v40 = vld [vmem:[%s570_s1 + $0x18] sm:$0xff]  ;;  %v40_v44 = vsub.bf16 %v24_v39, %v32_v41 }
   0xd   :  { %v343_v38 = vcombine.low %v39_v32, %v41_v33  ;;  %400 = vmatprep.mubr.msk.bf16.mxu1 %vm223_vm0, %v340_v36  ;;  %v420_v42 = vld [vmem:[%s568_s2 + $0x38] sm:$0xff]   ;;  %v38_v43 = vsub.bf16 %v22_v37, %v30_v40 }
   0xf   :  { %371 = vmatpush3.bf16.msra.mxu0 %v411_v7  ;;  %401 = vmatmul.mubr.msk.bf16.vlgmr.msra.gmra.mrb[0].mxu1 %vm223_vm0, %v343_v38  ;;  %v342_v46 = vcombine.high %v38_v43, %v40_v44  ;;  %v341_v47 = vcombine.low %v38_v43, %v40_v44 }
  0x10   :  { %372 = vmatprep.subr.bf16.mxu0 %v412_v8 }
  0x13   :  { %373 = vmatpush3.bf16.msra.mxu0 %v413_v9 }
  0x14   :  { %374 = vmatprep.subr.bf16.mxu0 %v414_v11 }
  0x17   :  { %375 = vmatpush3.bf16.msra.mxu0 %v415_v12 }
  0x18   :  { %376 = vmatprep.subr.bf16.mxu0 %v416_v16 }
  0x1b   :  { %377 = vmatpush3.bf16.msra.mxu0 %v417_v34 }
  0x1c   :  { %378 = vmatprep.subr.bf16.mxu0 %v418_v35 }
  0x1f   :  { %379 = vmatpush3.bf16.msra.mxu0 %v420_v42 }
  0x22   :  { %263 = vmatmul.mubr.bf16.vlgmr.msra.gmra.mrb[0].mxu0 %v338_v45 }
  0x23   :  { %270 = vmatprep.mubr.bf16.mxu0 %v342_v46 }
  0x2a   :  { %271 = vmatmul.mubr.bf16.gmra.mrb[4].mxu0 %v341_v47 }
  0xe2   :  { %v402_v48 = vpop.f32.mrb[0].mxu1 }
  0xe3   :  { %v313_v49 = vpop.f32.mrb[1].mxu1 }
  0xe4   :  { %v403_v50 = vpop.f32.mrb[2].mxu1 }
  0xe5   :  { %v316_v51 = vpop.f32.mrb[3].mxu1 }
  0xf5   :  { %v380_v52 = vpop.f32.mrb[0].mxu0 }
  0xf6   :  { %v381_v53 = vpop.f32.mrb[1].mxu0 }
  0xf7   :  { %v382_v55 = vadd.f32 %v381_v53, %v380_v52  ;;  %v383_v56 = vpop.f32.mrb[2].mxu0 }
  0xf8   :  { %v384_v57 = vpop.f32.mrb[3].mxu0 }
  0xf9   :  { %v385_v58 = vadd.f32 %v384_v57, %v383_v56  ;;  %v265_v59 = vadd.f32 %v382_v55, %v337_v54 }
  0xfb   :  { %v314_v60 = vadd.f32 %v313_v49, %v265_v59  ;;  %v268_v61 = vadd.f32 %v385_v58, %v337_v54 }
  0xfd   :  { %329 = vst.msk [vmem:[%s572_s4] sm:$0xff] %vm328_vm1, %v314_v60  ;;  %v317_v62 = vadd.f32 %v316_v51, %v268_v61  ;;  %v386_v63 = vpop.f32.mrb[4].mxu0 }
  0xfe   :  { %v387_v0 = vpop.f32.mrb[5].mxu0 }
  0xff   :  { %330 = vst.msk [vmem:[%s572_s4 + $0x8] sm:$0xff] %vm328_vm1, %v317_v62  ;;  %v388_v1 = vadd.f32 %v387_v0, %v386_v63  ;;  %v389_v2 = vpop.f32.mrb[6].mxu0 }
 0x100   :  { %v390_v3 = vpop.f32.mrb[7].mxu0 }
 0x101   :  { %v273_v4 = vadd.f32 %v388_v1, %v337_v54  ;;  %v391_v5 = vadd.f32 %v390_v3, %v389_v2 }
 0x103   :  { %v322_v6 = vadd.f32 %v402_v48, %v273_v4  ;;  %v276_v7 = vadd.f32 %v391_v5, %v337_v54 }
 0x105   :  { %331 = vst.msk [vmem:[%s572_s4 + $0x10] sm:$0xff] %vm328_vm1, %v322_v6  ;;  %v325_v8 = vadd.f32 %v403_v50, %v276_v7 }
 0x107   :  { %332 = vst.msk [vmem:[%s572_s4 + $0x18] sm:$0xff] %vm328_vm1, %v325_v8 }

// kernel: refnet_forward.16
= control target key start
LH: loop header
LB: loop body
LE: loop exit
PB: predicated region body
PF: predicated region fallthrough
CT: control target
= control target key end

     0   :  { %vm385_vm0 = vcmask 261120   ;;  %vm604_vm1 = vcmask 162816   ;;  %s1180_s2 = inlined_call_operand.vmem [shape: bf16[288,20], index: 2, kind: input, shape index: {}]   ;;  %s1181_s0 = inlined_call_operand.vmem [shape: bf16[128,288], index: 0, kind: input, shape index: {}]   ;;  %s1182_s1 = inlined_call_operand.vmem [shape: bf16[128,288], index: 1, kind: input, shape index: {}]   ;;  %s1183_s3 = inlined_call_operand.vmem [shape: f32[1,20], index: 3, kind: input, shape index: {}]   ;;  %s1184_s4 = inlined_call_operand.vmem [shape: f32[128,20], index: 4, kind: output, shape index: {}]  }
   0x1   :  { %v786_v0 = vld [vmem:[%s1180_s2 + $0x40] sm:$0xff]   ;;  %v788_v2 = vld [vmem:[%s1180_s2 + $0x48] sm:$0xff]   ;;  %v790_v4 = vld [vmem:[%s1180_s2 + $0x50] sm:$0xff]  }
   0x2   :  { %v787_v1 = vld [vmem:[%s1180_s2] sm:$0xff]   ;;  %676 = vmatprep.subr.bf16.mxu0 %v786_v0  ;;  %770 = vmatprep.subr.bf16.mxu1 %v786_v0  ;;  %v789_v3 = vld [vmem:[%s1180_s2 + $0x8] sm:$0xff]   ;;  %v791_v5 = vld [vmem:[%s1180_s2 + $0x10] sm:$0xff]  }
   0x3   :  { %677 = vmatpush3.bf16.msra.mxu0 %v787_v1  ;;  %778 = vmatpush3.bf16.msra.mxu1 %v787_v1  ;;  %v792_v6 = vld [vmem:[%s1180_s2 + $0x58] sm:$0xff]   ;;  %v794_v8 = vld [vmem:[%s1180_s2 + $0x60] sm:$0xff]   ;;  %v796_v10 = vld [vmem:[%s1180_s2 + $0x68] sm:$0xff]  }
   0x4   :  { %678 = vmatprep.subr.bf16.mxu0 %v788_v2  ;;  %771 = vmatprep.subr.bf16.mxu1 %v788_v2  ;;  %v793_v7 = vld [vmem:[%s1180_s2 + $0x18] sm:$0xff]   ;;  %v795_v9 = vld [vmem:[%s1180_s2 + $0x20] sm:$0xff]   ;;  %v20_v12 = vld [vmem:[%s1181_s0 + $0xc] sm:$0xff] }
   0x5   :  { %v18_v11 = vld [vmem:[%s1181_s0] sm:$0xff]  ;;  %v52_v14 = vld [vmem:[%s1182_s1 + $0xc] sm:$0xff]  ;;  %v800_v28 = vld [vmem:[%s1180_s2 + $0x78] sm:$0xff]  }
   0x6   :  { %v50_v13 = vld [vmem:[%s1182_s1] sm:$0xff]  ;;  %v42_v16 = vld [vmem:[%s1181_s0 + $0x90] sm:$0xff]  ;;  %v84_v18 = vsub.bf16 %v20_v12, %v52_v14  ;;  %v797_v21 = vld [vmem:[%s1180_s2 + $0x28] sm:$0xff]  }
   0x7   :  { %679 = vmatpush3.bf16.msra.mxu0 %v789_v3  ;;  %779 = vmatpush3.bf16.msra.mxu1 %v789_v3  ;;  %v82_v15 = vsub.bf16 %v18_v11, %v50_v13  ;;  %v44_v17 = vld [vmem:[%s1181_s0 + $0x9c] sm:$0xff]  ;;  %v74_v19 = vld [vmem:[%s1182_s1 + $0x90] sm:$0xff]  ;;  %v24_v30 = vld [vmem:[%s1181_s0 + $0x24] sm:$0xff] }
   0x8   :  { %680 = vmatprep.subr.bf16.mxu0 %v790_v4  ;;  %772 = vmatprep.subr.bf16.mxu1 %v790_v4  ;;  %v76_v20 = vld [vmem:[%s1182_s1 + $0x9c] sm:$0xff]  ;;  %v106_v22 = vsub.bf16 %v42_v16, %v74_v19  ;;  %v798_v24 = vld [vmem:[%s1180_s2 + $0x70] sm:$0xff]   ;;  %v56_v32 = vld [vmem:[%s1182_s1 + $0x24] sm:$0xff] }
   0x9   :  { %v108_v23 = vsub.bf16 %v44_v17, %v76_v20  ;;  %v627_v25 = vcombine.high %v82_v15, %v84_v18  ;;  %v799_v27 = vld [vmem:[%s1180_s2 + $0x30] sm:$0xff]   ;;  %v22_v29 = vld [vmem:[%s1181_s0 + $0x18] sm:$0xff]  ;;  %v46_v33 = vld [vmem:[%s1181_s0 + $0xa8] sm:$0xff]  ;;  %v88_v39 = vsub.bf16 %v24_v30, %v56_v32  ;;  %v626_v43 = vcombine.low %v82_v15, %v84_v18 }
   0xa   :  { %v54_v31 = vld [vmem:[%s1182_s1 + $0x18] sm:$0xff]  ;;  %v78_v35 = vld [vmem:[%s1182_s1 + $0xa8] sm:$0xff]  ;;  %v802_v40 = vld [vmem:[%s1180_s2 + $0x80] sm:$0xff]  }
   0xb   :  { %681 = vmatpush3.bf16.msra.mxu0 %v791_v5  ;;  %780 = vmatpush3.bf16.msra.mxu1 %v791_v5  ;;  %v645_v26 = vcombine.high %v106_v22, %v108_v23  ;;  %v48_v34 = vld [vmem:[%s1181_s0 + $0xb4] sm:$0xff]  ;;  %v86_v38 = vsub.bf16 %v22_v29, %v54_v31  ;;  %v110_v41 = vsub.bf16 %v46_v33, %v78_v35  ;;  %v803_v45 = vld [vmem:[%s1180_s2 + $0x88] sm:$0xff]   ;;  %v28_v47 = vld [vmem:[%s1181_s0 + $0x3c] sm:$0xff] }
   0xc   :  { %682 = vmatprep.subr.bf16.mxu0 %v792_v6  ;;  %773 = vmatprep.subr.bf16.mxu1 %v792_v6  ;;  %v80_v36 = vld [vmem:[%s1182_s1 + $0xb4] sm:$0xff]  ;;  %v644_v44 = vcombine.low %v106_v22, %v108_v23  ;;  %v60_v50 = vld [vmem:[%s1182_s1 + $0x3c] sm:$0xff]  ;;  %v19_v51 = vld [vmem:[%s1181_s0 + $0x8] sm:$0xf] }
   0xd   :  { %442 = vmatprep.mubr.bf16.mxu0 %v627_v25  ;;  %490 = vmatprep.mubr.bf16.mxu1 %v645_v26  ;;  %v801_v37 = vld [vmem:[%s1180_s2 + $0x38] sm:$0xff]   ;;  %v112_v42 = vsub.bf16 %v48_v34, %v80_v36  ;;  %v26_v46 = vld [vmem:[%s1181_s0 + $0x30] sm:$0xff]  ;;  %v630_v48 = vcombine.high %v86_v38, %v88_v39  ;;  %v51_v54 = vld [vmem:[%s1182_s1 + $0x8] sm:$0xf]  ;;  %v92_v57 = vsub.bf16 %v28_v47, %v60_v50 }
   0xe   :  { %v58_v49 = vld [vmem:[%s1182_s1 + $0x30] sm:$0xff]  ;;  %v83_v58 = vsub.bf16 %v19_v51, %v51_v54  ;;  %v23_v60 = vld [vmem:[%s1181_s0 + $0x20] sm:$0xf]  ;;  %v25_v61 = vld [vmem:[%s1181_s0 + $0x2c] sm:$0xf]  ;;  %v629_v63 = vcombine.low %v86_v38, %v88_v39 }
   0xf   :  { %683 = vmatpush3.bf16.msra.mxu0 %v793_v7  ;;  %781 = vmatpush3.bf16.msra.mxu1 %v793_v7  ;;  %v648_v52 = vcombine.high %v110_v41, %v112_v42  ;;  %v21_v53 = vld [vmem:[%s1181_s0 + $0x14] sm:$0xf]  ;;  %v90_v56 = vsub.bf16 %v26_v46, %v58_v49  ;;  %v55_v62 = vld [vmem:[%s1182_s1 + $0x20] sm:$0xf]  ;;  %v647_v0 = vcombine.low %v110_v41, %v112_v42  ;;  %v57_v1 = vld [vmem:[%s1182_s1 + $0x2c] sm:$0xf] }
  0x10   :  { %684 = vmatprep.subr.bf16.mxu0 %v794_v8  ;;  %774 = vmatprep.subr.bf16.mxu1 %v794_v8  ;;  %v53_v55 = vld [vmem:[%s1182_s1 + $0x14] sm:$0xf]  ;;  %v30_v2 = vld [vmem:[%s1181_s0 + $0x48] sm:$0xff]  ;;  %v27_v8 = vld [vmem:[%s1181_s0 + $0x38] sm:$0xf]  ;;  %v87_v12 = vsub.bf16 %v23_v60, %v55_v62  ;;  %v89_v13 = vsub.bf16 %v25_v61, %v57_v1 }
  0x11   :  { %v85_v59 = vsub.bf16 %v21_v53, %v53_v55  ;;  %v32_v3 = vld [vmem:[%s1181_s0 + $0x54] sm:$0xff]  ;;  %v633_v4 = vcombine.high %v90_v56, %v92_v57  ;;  %v62_v6 = vld [vmem:[%s1182_s1 + $0x48] sm:$0xff]  ;;  %v61_v11 = vld [vmem:[%s1182_s1 + $0x44] sm:$0xf] }
  0x12   :  { %v64_v7 = vld [vmem:[%s1182_s1 + $0x54] sm:$0xff]  ;;  %v94_v14 = vsub.bf16 %v30_v2, %v62_v6  ;;  %v31_v18 = vld [vmem:[%s1181_s0 + $0x50] sm:$0xf]  ;;  %v33_v19 = vld [vmem:[%s1181_s0 + $0x5c] sm:$0xf]  ;;  %v631_v22 = vcombine.low %v87_v12, %v89_v13 }
  0x13   :  { %685 = vmatpush3.bf16.msra.mxu0 %v795_v9  ;;  %782 = vmatpush3.bf16.msra.mxu1 %v795_v9  ;;  %v628_v5 = vcombine.low %v83_v58, %v85_v59  ;;  %v29_v9 = vld [vmem:[%s1181_s0 + $0x44] sm:$0xf]  ;;  %v96_v15 = vsub.bf16 %v32_v3, %v64_v7  ;;  %v63_v20 = vld [vmem:[%s1182_s1 + $0x50] sm:$0xf]  ;;  %v65_v23 = vld [vmem:[%s1182_s1 + $0x5c] sm:$0xf] }
  0x14   :  { %686 = vmatprep.subr.bf16.mxu0 %v796_v10  ;;  %775 = vmatprep.subr.bf16.mxu1 %v796_v10  ;;  %v59_v10 = vld [vmem:[%s1182_s1 + $0x38] sm:$0xf]  ;;  %v93_v17 = vsub.bf16 %v29_v9, %v61_v11  ;;  %v36_v25 = vld [vmem:[%s1181_s0 + $0x6c] sm:$0xff]  ;;  %v35_v30 = vld [vmem:[%s1181_s0 + $0x68] sm:$0xf]  ;;  %v95_v34 = vsub.bf16 %v31_v18, %v63_v20  ;;  %v97_v35 = vsub.bf16 %v33_v19, %v65_v23 }
  0x15   :  { %v91_v16 = vsub.bf16 %v27_v8, %v59_v10  ;;  %v636_v26 = vcombine.high %v94_v14, %v96_v15  ;;  %v68_v29 = vld [vmem:[%s1182_s1 + $0x6c] sm:$0xff]  ;;  %v37_v31 = vld [vmem:[%s1181_s0 + $0x74] sm:$0xf]  ;;  %v67_v32 = vld [vmem:[%s1182_s1 + $0x68] sm:$0xf] }
  0x16   :  { %v69_v33 = vld [vmem:[%s1182_s1 + $0x74] sm:$0xf]  ;;  %v99_v38 = vsub.bf16 %v35_v30, %v67_v32  ;;  %v41_v41 = vld [vmem:[%s1181_s0 + $0x8c] sm:$0xf]  ;;  %v71_v42 = vld [vmem:[%s1182_s1 + $0x80] sm:$0xf] }
  0x17   :  { %687 = vmatpush3.bf16.msra.mxu0 %v797_v21  ;;  %783 = vmatpush3.bf16.msra.mxu1 %v797_v21  ;;  %v632_v21 = vcombine.low %v90_v56, %v92_v57  ;;  %v101_v39 = vsub.bf16 %v37_v31, %v69_v33  ;;  %v38_v46 = vld [vmem:[%s1181_s0 + $0x78] sm:$0xff]  ;;  %v40_v47 = vld [vmem:[%s1181_s0 + $0x84] sm:$0xff] }
  0x18   :  { %688 = vmatprep.subr.bf16.mxu0 %v798_v24  ;;  %776 = vmatprep.subr.bf16.mxu1 %v798_v24  ;;  %v34_v24 = vld [vmem:[%s1181_s0 + $0x60] sm:$0xff]  ;;  %v70_v50 = vld [vmem:[%s1182_s1 + $0x78] sm:$0xff] }
  0x19   :  { %v640_v49 = vcombine.low %v99_v38, %v101_v39  ;;  %v72_v51 = vld [vmem:[%s1182_s1 + $0x84] sm:$0xff]  ;;  %v75_v54 = vld [vmem:[%s1182_s1 + $0x98] sm:$0xf]  ;;  %v102_v58 = vsub.bf16 %v38_v46, %v70_v50  ;;  %v49_v3 = vld [vmem:[%s1181_s0 + $0xbc] sm:$0xf] }
  0x1a   :  { %v45_v53 = vld [vmem:[%s1181_s0 + $0xa4] sm:$0xf]  ;;  %v104_v59 = vsub.bf16 %v40_v47, %v72_v51 }
  0x1b   :  { %689 = vmatpush3.bf16.msra.mxu0 %v799_v27  ;;  %784 = vmatpush3.bf16.msra.mxu1 %v799_v27  ;;  %v634_v27 = vcombine.low %v91_v16, %v93_v17  ;;  %v77_v55 = vld [vmem:[%s1182_s1 + $0xa4] sm:$0xf] }
  0x1c   :  { %690 = vmatprep.subr.bf16.mxu0 %v800_v28  ;;  %777 = vmatprep.subr.bf16.mxu1 %v800_v28  ;;  %v66_v28 = vld [vmem:[%s1182_s1 + $0x60] sm:$0xff]  ;;  %v109_v61 = vsub.bf16 %v45_v53, %v77_v55  ;;  %v642_v1 = vcombine.high %v102_v58, %v104_v59  ;;  %v641_v8 = vcombine.low %v102_v58, %v104_v59 }
  0x1d   :  { %v98_v36 = vsub.bf16 %v34_v24, %v66_v28 }
  0x1f   :  { %691 = vmatpush3.bf16.msra.mxu0 %v801_v37  ;;  %785 = vmatpush3.bf16.msra.mxu1 %v801_v37  ;;  %v100_v37 = vsub.bf16 %v36_v25, %v68_v29 }
  0x20   :  { %750 = vmatprep.subr.bf16.mxu1 %v802_v40 }
  0x21   :  { %v638_v62 = vcombine.low %v98_v36, %v100_v37 }
  0x22   :  { %443 = vmatmul.mubr.bf16.vlgmr.msra.gmra.mrb[0].mxu0 %v626_v43  ;;  %491 = vmatmul.mubr.bf16.vlgmr.msra.gmra.mrb[0].mxu1 %v644_v44  ;;  %v635_v43 = vcombine.low %v94_v14, %v96_v15  ;;  %v637_v44 = vcombine.low %v95_v34, %v97_v35  ;;  %v1094_v34 = vld [vmem:[%s1183_s3] ss:$0 sm:$0xff] }
  0x23   :  { %751 = vmatpush3.bf16.msra.mxu1 %v802_v40  ;;  %450 = vmatprep.mubr.bf16.mxu0 %v630_v48  ;;  %v39_v40 = vld [vmem:[%s1181_s0 + $0x80] sm:$0xf]  ;;  %v639_v48 = vcombine.high %v98_v36, %v100_v37 }
  0x24   :  { %498 = vmatprep.mubr.bf16.mxu1 %v648_v52  ;;  %752 = vmatprep.subr.bf16.mxu1 %v803_v45  ;;  %v43_v52 = vld [vmem:[%s1181_s0 + $0x98] sm:$0xf]  ;;  %v103_v56 = vsub.bf16 %v39_v40, %v71_v42 }
  0x25   :  { %v107_v60 = vsub.bf16 %v43_v52, %v75_v54 }
  0x27   :  { %753 = vmatpush3.bf16.msra.mxu1 %v803_v45  ;;  %v73_v45 = vld [vmem:[%s1182_s1 + $0x8c] sm:$0xf]  ;;  %v646_v2 = vcombine.low %v107_v60, %v109_v61 }
  0x28   :  { %v105_v57 = vsub.bf16 %v41_v41, %v73_v45 }
  0x2a   :  { %451 = vmatmul.mubr.bf16.gmra.mrb[4].mxu0 %v629_v63  ;;  %499 = vmatmul.mubr.bf16.gmra.mrb[4].mxu1 %v647_v0  ;;  %v643_v63 = vcombine.low %v103_v56, %v105_v57  ;;  %v47_v0 = vld [vmem:[%s1181_s0 + $0xb0] sm:$0xf] }
  0x2b   :  { %458 = vmatprep.mubr.bf16.mxu0 %v633_v4  ;;  %754 = vmatprep.mubr.msk.bf16.mxu1 %vm385_vm0, %v628_v5  ;;  %v79_v4 = vld [vmem:[%s1182_s1 + $0xb0] sm:$0xf]  ;;  %v81_v5 = vld [vmem:[%s1182_s1 + $0xbc] sm:$0xf] }
  0x2c   :  { %v111_v6 = vsub.bf16 %v47_v0, %v79_v4  ;;  %v113_v7 = vsub.bf16 %v49_v3, %v81_v5 }
  0x2e   :  { %v649_v9 = vcombine.low %v111_v6, %v113_v7 }
  0x32   :  { %459 = vmatmul.mubr.bf16.gmra.mrb[8].mxu0 %v632_v21  ;;  %755 = vmatmul.mubr.msk.bf16.vlgmr.msra.gmra.mrb[8].mxu1 %vm385_vm0, %v631_v22 }
  0x33   :  { %466 = vmatprep.mubr.bf16.mxu0 %v636_v26  ;;  %758 = vmatprep.mubr.msk.bf16.mxu1 %vm385_vm0, %v634_v27 }
  0x3a   :  { %467 = vmatmul.mubr.bf16.gmra.mrb[12].mxu0 %v635_v43  ;;  %759 = vmatmul.mubr.msk.bf16.gmra.mrb[12].mxu1 %vm385_vm0, %v637_v44 }
  0x3b   :  { %474 = vmatprep.mubr.bf16.mxu0 %v639_v48  ;;  %762 = vmatprep.mubr.msk.bf16.mxu1 %vm385_vm0, %v640_v49 }
  0x42   :  { %475 = vmatmul.mubr.bf16.gmra.mrb[16].mxu0 %v638_v62  ;;  %763 = vmatmul.mubr.msk.bf16.gmra.mrb[16].mxu1 %vm385_vm0, %v643_v63 }
  0x43   :  { %482 = vmatprep.mubr.bf16.mxu0 %v642_v1  ;;  %766 = vmatprep.mubr.msk.bf16.mxu1 %vm385_vm0, %v646_v2 }
  0x4a   :  { %483 = vmatmul.mubr.bf16.gmra.mrb[20].mxu0 %v641_v8  ;;  %767 = vmatmul.mubr.msk.bf16.gmra.mrb[20].mxu1 %vm385_vm0, %v649_v9 }
  0xf5   :  { %v692_v10 = vpop.f32.mrb[0].mxu0  ;;  %v728_v11 = vpop.f32.mrb[0].mxu1 }
  0xf6   :  { %v693_v12 = vpop.f32.mrb[1].mxu0  ;;  %v729_v13 = vpop.f32.mrb[1].mxu1 }
  0xf7   :  { %v694_v14 = vadd.f32 %v693_v12, %v692_v10  ;;  %v695_v15 = vpop.f32.mrb[2].mxu0  ;;  %v1083_v16 = vadd.f32 %v729_v13, %v728_v11  ;;  %v731_v17 = vpop.f32.mrb[2].mxu1 }
  0xf8   :  { %v696_v18 = vpop.f32.mrb[3].mxu0  ;;  %v732_v19 = vpop.f32.mrb[3].mxu1 }
  0xf9   :  { %v697_v20 = vadd.f32 %v696_v18, %v695_v15  ;;  %v1085_v21 = vadd.f32 %v732_v19, %v731_v17  ;;  %v445_v38 = vadd.f32 %v694_v14, %v1094_v34 }
  0xfb   :  { %v448_v47 = vadd.f32 %v697_v20, %v1094_v34 }
  0xfd   :  { %v698_v22 = vpop.f32.mrb[4].mxu0  ;;  %v734_v23 = vpop.f32.mrb[4].mxu1 }
  0xfe   :  { %v699_v24 = vpop.f32.mrb[5].mxu0  ;;  %v735_v25 = vpop.f32.mrb[5].mxu1 }
  0xff   :  { %v700_v26 = vadd.f32 %v699_v24, %v698_v22  ;;  %v701_v27 = vpop.f32.mrb[6].mxu0  ;;  %v1087_v28 = vadd.f32 %v735_v25, %v734_v23  ;;  %v737_v29 = vpop.f32.mrb[6].mxu1 }
 0x100   :  { %v702_v30 = vpop.f32.mrb[7].mxu0  ;;  %v738_v31 = vpop.f32.mrb[7].mxu1 }
 0x101   :  { %v703_v32 = vadd.f32 %v702_v30, %v701_v27  ;;  %v1089_v33 = vadd.f32 %v738_v31, %v737_v29  ;;  %v453_v35 = vadd.f32 %v700_v26, %v1094_v34  ;;  %v501_v22 = vadd.f32 %v1087_v28, %v1094_v34 }
 0x102   :  { %v493_v26 = vadd.f32 %v1083_v16, %v1094_v34 }
 0x103   :  { %v456_v42 = vadd.f32 %v703_v32, %v1094_v34  ;;  %v504_v31 = vadd.f32 %v1089_v33, %v1094_v34 }
 0x105   :  { %v704_v36 = vpop.f32.mrb[8].mxu0  ;;  %v756_v37 = vpop.f32.mrb[8].mxu1 }
 0x106   :  { %v550_v39 = vadd.f32 %v756_v37, %v453_v35  ;;  %v705_v40 = vpop.f32.mrb[9].mxu0  ;;  %v541_v41 = vpop.f32.mrb[9].mxu1  ;;  %v496_v37 = vadd.f32 %v1085_v21, %v1094_v34 }
 0x107   :  { %v706_v43 = vadd.f32 %v705_v40, %v704_v36  ;;  %v542_v44 = vadd.f32 %v541_v41, %v445_v38  ;;  %v707_v45 = vpop.f32.mrb[10].mxu0  ;;  %v757_v46 = vpop.f32.mrb[10].mxu1 }
 0x108   :  { %607 = vst.msk [vmem:[%s1184_s4 + $0x10] sm:$0xff] %vm604_vm1, %v550_v39  ;;  %v553_v48 = vadd.f32 %v757_v46, %v456_v42  ;;  %v708_v49 = vpop.f32.mrb[11].mxu0  ;;  %v544_v50 = vpop.f32.mrb[11].mxu1 }
 0x109   :  { %605 = vst.msk [vmem:[%s1184_s4] sm:$0xff] %vm604_vm1, %v542_v44  ;;  %v709_v51 = vadd.f32 %v708_v49, %v707_v45  ;;  %v545_v52 = vadd.f32 %v544_v50, %v448_v47  ;;  %v461_v55 = vadd.f32 %v706_v43, %v1094_v34 }
 0x10a   :  { %608 = vst.msk [vmem:[%s1184_s4 + $0x18] sm:$0xff] %vm604_vm1, %v553_v48 }
 0x10b   :  { %606 = vst.msk [vmem:[%s1184_s4 + $0x8] sm:$0xff] %vm604_vm1, %v545_v52  ;;  %v464_v62 = vadd.f32 %v709_v51, %v1094_v34 }
 0x10d   :  { %v710_v53 = vpop.f32.mrb[12].mxu0  ;;  %v760_v54 = vpop.f32.mrb[12].mxu1 }
 0x10e   :  { %v711_v56 = vpop.f32.mrb[13].mxu0  ;;  %v557_v57 = vpop.f32.mrb[13].mxu1 }
 0x10f   :  { %v712_v58 = vadd.f32 %v711_v56, %v710_v53  ;;  %v558_v59 = vadd.f32 %v557_v57, %v461_v55  ;;  %v713_v60 = vpop.f32.mrb[14].mxu0  ;;  %v761_v61 = vpop.f32.mrb[14].mxu1 }
 0x110   :  { %v714_v63 = vpop.f32.mrb[15].mxu0  ;;  %v560_v0 = vpop.f32.mrb[15].mxu1 }
 0x111   :  { %v469_v1 = vadd.f32 %v712_v58, %v1094_v34  ;;  %609 = vst.msk [vmem:[%s1184_s4 + $0x20] sm:$0xff] %vm604_vm1, %v558_v59  ;;  %v715_v2 = vadd.f32 %v714_v63, %v713_v60  ;;  %v561_v3 = vadd.f32 %v560_v0, %v464_v62 }
 0x113   :  { %v566_v4 = vadd.f32 %v760_v54, %v469_v1  ;;  %v472_v5 = vadd.f32 %v715_v2, %v1094_v34  ;;  %610 = vst.msk [vmem:[%s1184_s4 + $0x28] sm:$0xff] %vm604_vm1, %v561_v3 }
 0x115   :  { %611 = vst.msk [vmem:[%s1184_s4 + $0x30] sm:$0xff] %vm604_vm1, %v566_v4  ;;  %v569_v6 = vadd.f32 %v761_v61, %v472_v5  ;;  %v716_v7 = vpop.f32.mrb[16].mxu0  ;;  %v764_v8 = vpop.f32.mrb[16].mxu1 }
 0x116   :  { %v717_v9 = vpop.f32.mrb[17].mxu0  ;;  %v573_v10 = vpop.f32.mrb[17].mxu1 }
 0x117   :  { %612 = vst.msk [vmem:[%s1184_s4 + $0x38] sm:$0xff] %vm604_vm1, %v569_v6  ;;  %v718_v11 = vadd.f32 %v717_v9, %v716_v7  ;;  %v719_v12 = vpop.f32.mrb[18].mxu0  ;;  %v765_v13 = vpop.f32.mrb[18].mxu1 }
 0x118   :  { %v720_v14 = vpop.f32.mrb[19].mxu0  ;;  %v576_v15 = vpop.f32.mrb[19].mxu1 }
 0x119   :  { %v477_v17 = vadd.f32 %v718_v11, %v1094_v34  ;;  %v721_v18 = vadd.f32 %v720_v14, %v719_v12 }
 0x11b   :  { %v574_v19 = vadd.f32 %v573_v10, %v477_v17  ;;  %v480_v20 = vadd.f32 %v721_v18, %v1094_v34 }
 0x11d   :  { %613 = vst.msk [vmem:[%s1184_s4 + $0x40] sm:$0xff] %vm604_vm1, %v574_v19  ;;  %v577_v23 = vadd.f32 %v576_v15, %v480_v20  ;;  %v722_v24 = vpop.f32.mrb[20].mxu0  ;;  %v768_v25 = vpop.f32.mrb[20].mxu1 }
 0x11e   :  { %v598_v27 = vadd.f32 %v768_v25, %v501_v22  ;;  %v723_v29 = vpop.f32.mrb[21].mxu0  ;;  %v589_v30 = vpop.f32.mrb[21].mxu1 }
 0x11f   :  { %614 = vst.msk [vmem:[%s1184_s4 + $0x48] sm:$0xff] %vm604_vm1, %v577_v23  ;;  %v724_v28 = vadd.f32 %v723_v29, %v722_v24  ;;  %v590_v32 = vadd.f32 %v589_v30, %v493_v26  ;;  %v725_v35 = vpop.f32.mrb[22].mxu0  ;;  %v769_v36 = vpop.f32.mrb[22].mxu1 }
 0x120   :  { %619 = vst.msk [vmem:[%s1184_s4 + $0x70] sm:$0xff] %vm604_vm1, %v598_v27  ;;  %v601_v16 = vadd.f32 %v769_v36, %v504_v31  ;;  %v726_v38 = vpop.f32.mrb[23].mxu0  ;;  %v592_v33 = vpop.f32.mrb[23].mxu1 }
 0x121   :  { %v485_v39 = vadd.f32 %v724_v28, %v1094_v34  ;;  %617 = vst.msk [vmem:[%s1184_s4 + $0x60] sm:$0xff] %vm604_vm1, %v590_v32  ;;  %v727_v40 = vadd.f32 %v726_v38, %v725_v35  ;;  %v593_v41 = vadd.f32 %v592_v33, %v496_v37 }
 0x122   :  { %620 = vst.msk [vmem:[%s1184_s4 + $0x78] sm:$0xff] %vm604_vm1, %v601_v16 }
 0x123   :  { %v582_v21 = vadd.f32 %v764_v8, %v485_v39  ;;  %v488_v42 = vadd.f32 %v727_v40, %v1094_v34  ;;  %618 = vst.msk [vmem:[%s1184_s4 + $0x68] sm:$0xff] %vm604_vm1, %v593_v41 }
 0x125   :  { %615 = vst.msk [vmem:[%s1184_s4 + $0x50] sm:$0xff] %vm604_vm1, %v582_v21  ;;  %v585_v43 = vadd.f32 %v765_v13, %v488_v42 }
 0x127   :  { %616 = vst.msk [vmem:[%s1184_s4 + $0x58] sm:$0xff] %vm604_vm1, %v585_v43 }

// kernel: refnet_forward.15
= control target key start
LH: loop header
LB: loop body
LE: loop exit
PB: predicated region body
PF: predicated region fallthrough
CT: control target
= control target key end

     0   :  { %v1166_v0 = vmov 0   ;;  %vm577_vm0 = vcmask 130048   ;;  %vm963_vm1 = vcmask 121856   ;;  %s2315_s2 = inlined_call_operand.vmem [shape: bf16[144,15], index: 2, kind: input, shape index: {}]   ;;  %s2316_s0 = inlined_call_operand.vmem [shape: bf16[512,144], index: 0, kind: input, shape index: {}]   ;;  %s2317_s1 = inlined_call_operand.vmem [shape: bf16[512,144], index: 1, kind: input, shape index: {}]   ;;  %s2318_s3 = inlined_call_operand.vmem [shape: f32[1,15], index: 3, kind: input, shape index: {}]   ;;  %s2319_s4 = inlined_call_operand.vmem [shape: f32[512,15], index: 4, kind: output, shape index: {}]  }
   0x1   :  { %674 = vmatprep.subr.bf16.mxu0 %v1166_v0  ;;  %1138 = vmatprep.subr.bf16.mxu1 %v1166_v0  ;;  %v1157_v1 = vld [vmem:[%s2315_s2] sm:$0xff]   ;;  %v1158_v2 = vld [vmem:[%s2315_s2 + $0x8] sm:$0xff]   ;;  %v1159_v3 = vld [vmem:[%s2315_s2 + $0x10] sm:$0xff]  }
   0x2   :  { %675 = vmatpush1.bf16.msra.mxu0 %v1157_v1  ;;  %1147 = vmatpush1.bf16.msra.mxu1 %v1157_v1  ;;  %v1160_v4 = vld [vmem:[%s2315_s2 + $0x18] sm:$0xff]   ;;  %v18_v5 = vld [vmem:[%s2316_s0] sm:$0xff]  ;;  %v19_v6 = vld [vmem:[%s2316_s0 + $0x8] sm:$0xff] }
   0x3   :  { %676 = vmatprep.subr.bf16.mxu0 %v1166_v0  ;;  %1139 = vmatprep.subr.bf16.mxu1 %v1166_v0  ;;  %v82_v7 = vld [vmem:[%s2317_s1] sm:$0xff]  ;;  %v83_v8 = vld [vmem:[%s2317_s1 + $0x8] sm:$0xff]  ;;  %v1163_v21 = vld [vmem:[%s2315_s2 + $0x30] sm:$0xff]  }
   0x4   :  { %v1222_v9 = vsub.bf16 %v18_v5, %v82_v7  ;;  %v50_v10 = vld [vmem:[%s2316_s0 + $0x100] sm:$0xff]  ;;  %v51_v11 = vld [vmem:[%s2316_s0 + $0x108] sm:$0xff]  ;;  %v1232_v12 = vsub.bf16 %v19_v6, %v83_v8  ;;  %v20_v22 = vld [vmem:[%s2316_s0 + $0x10] sm:$0xff] }
   0x5   :  { %v114_v13 = vld [vmem:[%s2317_s1 + $0x100] sm:$0xff]  ;;  %v115_v14 = vld [vmem:[%s2317_s1 + $0x108] sm:$0xff]  ;;  %v21_v23 = vld [vmem:[%s2316_s0 + $0x18] sm:$0xff] }
   0x6   :  { %677 = vmatpush1.bf16.msra.mxu0 %v1158_v2  ;;  %1148 = vmatpush1.bf16.msra.mxu1 %v1158_v2  ;;  %v1240_v15 = vsub.bf16 %v50_v10, %v114_v13  ;;  %v1242_v16 = vsub.bf16 %v51_v11, %v115_v14  ;;  %v1034_v17 = vcombine.high %v1222_v9, %v1232_v12  ;;  %v1161_v18 = vld [vmem:[%s2315_s2 + $0x20] sm:$0xff]   ;;  %v1162_v20 = vld [vmem:[%s2315_s2 + $0x28] sm:$0xff]   ;;  %v84_v24 = vld [vmem:[%s2317_s1 + $0x10] sm:$0xff] }
   0x7   :  { %678 = vmatprep.subr.bf16.mxu0 %v1166_v0  ;;  %1140 = vmatprep.subr.bf16.mxu1 %v1166_v0  ;;  %v85_v25 = vld [vmem:[%s2317_s1 + $0x18] sm:$0xff]  ;;  %v52_v26 = vld [vmem:[%s2316_s0 + $0x110] sm:$0xff]  ;;  %v1280_v27 = vsub.bf16 %v20_v22, %v84_v24  ;;  %v22_v33 = vld [vmem:[%s2316_s0 + $0x20] sm:$0xff]  ;;  %v1033_v39 = vcombine.low %v1222_v9, %v1232_v12 }
   0x8   :  { %v1066_v19 = vcombine.high %v1240_v15, %v1242_v16  ;;  %1106 = vmatprep.mubr.msk.bf16.mxu0 %vm577_vm0, %v1034_v17  ;;  %v1282_v28 = vsub.bf16 %v21_v23, %v85_v25  ;;  %v53_v29 = vld [vmem:[%s2316_s0 + $0x118] sm:$0xff]  ;;  %v116_v30 = vld [vmem:[%s2317_s1 + $0x110] sm:$0xff]  ;;  %v23_v34 = vld [vmem:[%s2316_s0 + $0x28] sm:$0xff]  ;;  %v1065_v40 = vcombine.low %v1240_v15, %v1242_v16 }
   0x9   :  { %v117_v31 = vld [vmem:[%s2317_s1 + $0x118] sm:$0xff]  ;;  %v86_v35 = vld [vmem:[%s2317_s1 + $0x20] sm:$0xff]  ;;  %v87_v36 = vld [vmem:[%s2317_s1 + $0x28] sm:$0xff]  ;;  %v1320_v41 = vsub.bf16 %v52_v26, %v116_v30 }
   0xa   :  { %679 = vmatpush1.bf16.msra.mxu0 %v1159_v3  ;;  %1149 = vmatpush1.bf16.msra.mxu1 %v1159_v3  ;;  %v1164_v32 = vld [vmem:[%s2315_s2 + $0x38] sm:$0xff]   ;;  %v32_v37 = vld [vmem:[%s2316_s0 + $0x70] sm:$0xff]  ;;  %v1165_v38 = vld [vmem:[%s2315_s2 + $0x40] sm:$0xff]   ;;  %v1322_v42 = vsub.bf16 %v53_v29, %v117_v31  ;;  %v1036_v46 = vcombine.high %v1280_v27, %v1282_v28  ;;  %v1035_v47 = vcombine.low %v1280_v27, %v1282_v28 }
   0xb   :  { %680 = vmatprep.subr.bf16.mxu0 %v1166_v0  ;;  %1141 = vmatprep.subr.bf16.mxu1 %v1166_v0  ;;  %v33_v43 = vld [vmem:[%s2316_s0 + $0x78] sm:$0xff]  ;;  %v96_v44 = vld [vmem:[%s2317_s1 + $0x70] sm:$0xff]  ;;  %v1350_v53 = vsub.bf16 %v22_v33, %v86_v35  ;;  %v1352_v54 = vsub.bf16 %v23_v34, %v87_v36  ;;  %v54_v55 = vld [vmem:[%s2316_s0 + $0x120] sm:$0xff] }
   0xc   :  { %1122 = vmatprep.mubr.msk.bf16.mxu1 %vm577_vm0, %v1066_v19  ;;  %v97_v45 = vld [vmem:[%s2317_s1 + $0x78] sm:$0xff]  ;;  %v1337_v48 = vsub.bf16 %v32_v37, %v96_v44  ;;  %v64_v50 = vld [vmem:[%s2316_s0 + $0x170] sm:$0xff]  ;;  %v118_v56 = vld [vmem:[%s2317_s1 + $0x120] sm:$0xff]  ;;  %v1068_v5 = vcombine.high %v1320_v41, %v1322_v42  ;;  %v1067_v6 = vcombine.low %v1320_v41, %v1322_v42 }
   0xd   :  { %v1339_v49 = vsub.bf16 %v33_v43, %v97_v45  ;;  %v65_v51 = vld [vmem:[%s2316_s0 + $0x178] sm:$0xff]  ;;  %v128_v52 = vld [vmem:[%s2317_s1 + $0x170] sm:$0xff]  ;;  %v34_v59 = vld [vmem:[%s2316_s0 + $0x80] sm:$0xff]  ;;  %v1449_v33 = vsub.bf16 %v54_v55, %v118_v56  ;;  %v1038_v44 = vcombine.high %v1350_v53, %v1352_v54 }
   0xe   :  { %681 = vmatpush1.bf16.msra.mxu0 %v1160_v4  ;;  %1150 = vmatpush1.bf16.msra.mxu1 %v1160_v4  ;;  %v129_v57 = vld [vmem:[%s2317_s1 + $0x178] sm:$0xff]  ;;  %v1363_v58 = vsub.bf16 %v64_v50, %v128_v52  ;;  %v35_v60 = vld [vmem:[%s2316_s0 + $0x88] sm:$0xff]  ;;  %v66_v4 = vld [vmem:[%s2316_s0 + $0x180] sm:$0xff] }
   0xf   :  { %682 = vmatprep.subr.bf16.mxu0 %v1166_v0  ;;  %1142 = vmatprep.subr.bf16.mxu1 %v1166_v0  ;;  %v55_v61 = vld [vmem:[%s2316_s0 + $0x128] sm:$0xff]  ;;  %v1381_v1 = vsub.bf16 %v65_v51, %v129_v57  ;;  %v130_v11 = vld [vmem:[%s2317_s1 + $0x180] sm:$0xff]  ;;  %v100_v22 = vld [vmem:[%s2317_s1 + $0x90] sm:$0xff] }
  0x10   :  { %v119_v62 = vld [vmem:[%s2317_s1 + $0x128] sm:$0xff]  ;;  %v24_v23 = vld [vmem:[%s2316_s0 + $0x30] sm:$0xff]  ;;  %v101_v29 = vld [vmem:[%s2317_s1 + $0x98] sm:$0xff] }
  0x11   :  { %v99_v3 = vld [vmem:[%s2317_s1 + $0x88] sm:$0xff]  ;;  %v88_v24 = vld [vmem:[%s2317_s1 + $0x30] sm:$0xff]  ;;  %v38_v43 = vld [vmem:[%s2316_s0 + $0xa0] sm:$0xff]  ;;  %v1468_v45 = vsub.bf16 %v55_v61, %v119_v62 }
  0x12   :  { %683 = vmatpush1.bf16.msra.mxu0 %v1161_v18  ;;  %1151 = vmatpush1.bf16.msra.mxu1 %v1161_v18  ;;  %v1400_v8 = vsub.bf16 %v35_v60, %v99_v3  ;;  %v67_v10 = vld [vmem:[%s2316_s0 + $0x188] sm:$0xff]  ;;  %v1415_v18 = vsub.bf16 %v66_v4, %v130_v11  ;;  %v68_v31 = vld [vmem:[%s2316_s0 + $0x190] sm:$0xff]  ;;  %v102_v55 = vld [vmem:[%s2317_s1 + $0xa0] sm:$0xff]  ;;  %v1037_v4 = vcombine.low %v1350_v53, %v1352_v54 }
  0x13   :  { %684 = vmatprep.subr.bf16.mxu0 %v1166_v0  ;;  %1143 = vmatprep.subr.bf16.mxu1 %v1166_v0  ;;  %v131_v13 = vld [vmem:[%s2317_s1 + $0x188] sm:$0xff]  ;;  %v132_v37 = vld [vmem:[%s2317_s1 + $0x190] sm:$0xff]  ;;  %v1493_v60 = vsub.bf16 %v38_v43, %v102_v55  ;;  %v70_v61 = vld [vmem:[%s2316_s0 + $0x1a0] sm:$0xff] }
  0x14   :  { %v1417_v19 = vsub.bf16 %v67_v10, %v131_v13  ;;  %v1470_v50 = vsub.bf16 %v68_v31, %v132_v37  ;;  %v39_v52 = vld [vmem:[%s2316_s0 + $0xa8] sm:$0xff]  ;;  %v134_v12 = vld [vmem:[%s2317_s1 + $0x1a0] sm:$0xff]  ;;  %v25_v15 = vld [vmem:[%s2316_s0 + $0x38] sm:$0xff] }
  0x15   :  { %v103_v56 = vld [vmem:[%s2317_s1 + $0xa8] sm:$0xff]  ;;  %v89_v16 = vld [vmem:[%s2317_s1 + $0x38] sm:$0xff]  ;;  %v56_v10 = vld [vmem:[%s2316_s0 + $0x130] sm:$0xff] }
  0x16   :  { %685 = vmatpush1.bf16.msra.mxu0 %v1162_v20  ;;  %1152 = vmatpush1.bf16.msra.mxu1 %v1162_v20  ;;  %v36_v20 = vld [vmem:[%s2316_s0 + $0x90] sm:$0xff]  ;;  %v71_v9 = vld [vmem:[%s2316_s0 + $0x1a8] sm:$0xff]  ;;  %v1519_v62 = vsub.bf16 %v39_v52, %v103_v56  ;;  %v41_v3 = vld [vmem:[%s2316_s0 + $0xb8] sm:$0xff] }
  0x17   :  { %686 = vmatprep.subr.bf16.mxu0 %v1166_v0  ;;  %1144 = vmatprep.subr.bf16.mxu1 %v1166_v0  ;;  %v1441_v30 = vsub.bf16 %v36_v20, %v100_v22  ;;  %v57_v11 = vld [vmem:[%s2316_s0 + $0x138] sm:$0xff]  ;;  %v120_v13 = vld [vmem:[%s2317_s1 + $0x130] sm:$0xff]  ;;  %v78_v42 = vld [vmem:[%s2316_s0 + $0x1e0] sm:$0xff] }
  0x18   :  { %v121_v20 = vld [vmem:[%s2317_s1 + $0x138] sm:$0xff]  ;;  %v136_v52 = vld [vmem:[%s2317_s1 + $0x1b0] sm:$0xff]  ;;  %v31_v53 = vld [vmem:[%s2316_s0 + $0x68] sm:$0xff] }
  0x19   :  { %v73_v43 = vld [vmem:[%s2316_s0 + $0x1b8] sm:$0xff]  ;;  %v140_v28 = vld [vmem:[%s2317_s1 + $0x1d0] sm:$0xff] }
  0x1a   :  { %687 = vmatpush1.bf16.msra.mxu0 %v1163_v21  ;;  %1153 = vmatpush1.bf16.msra.mxu1 %v1163_v21  ;;  %v37_v21 = vld [vmem:[%s2316_s0 + $0x98] sm:$0xff]  ;;  %v112_v35 = vld [vmem:[%s2317_s1 + $0xf0] sm:$0xff] }
  0x1b   :  { %688 = vmatprep.subr.bf16.mxu0 %v1166_v0  ;;  %1145 = vmatprep.subr.bf16.mxu1 %v1166_v0  ;;  %v1455_v36 = vsub.bf16 %v37_v21, %v101_v29  ;;  %v1546_v21 = vsub.bf16 %v70_v61, %v134_v12  ;;  %v72_v29 = vld [vmem:[%s2316_s0 + $0x1b0] sm:$0xff]  ;;  %v137_v55 = vld [vmem:[%s2317_s1 + $0x1b8] sm:$0xff]  ;;  %v75_v61 = vld [vmem:[%s2316_s0 + $0x1c8] sm:$0xff] }
  0x1c   :  { %v1582_v12 = vsub.bf16 %v73_v43, %v137_v55  ;;  %v107_v43 = vld [vmem:[%s2317_s1 + $0xc8] sm:$0xff]  ;;  %v74_v55 = vld [vmem:[%s2316_s0 + $0x1c0] sm:$0xff]  ;;  %v77_v27 = vld [vmem:[%s2316_s0 + $0x1d8] sm:$0xff] }
  0x1d   :  { %v49_v57 = vld [vmem:[%s2316_s0 + $0xf8] sm:$0xff] }
  0x1e   :  { %689 = vmatpush1.bf16.msra.mxu0 %v1164_v32  ;;  %1154 = vmatpush1.bf16.msra.mxu1 %v1164_v32  ;;  %v69_v32 = vld [vmem:[%s2316_s0 + $0x198] sm:$0xff] }
  0x1f   :  { %690 = vmatprep.subr.bf16.mxu0 %v1166_v0  ;;  %1146 = vmatprep.subr.bf16.mxu1 %v1166_v0  ;;  %v98_v0 = vld [vmem:[%s2317_s1 + $0x80] sm:$0xff]  ;;  %v81_v26 = vld [vmem:[%s2316_s0 + $0x1f8] sm:$0xff] }
  0x20   :  { %v1398_v7 = vsub.bf16 %v34_v59, %v98_v0  ;;  %v40_v0 = vld [vmem:[%s2316_s0 + $0xb0] sm:$0xff]  ;;  %v142_v59 = vld [vmem:[%s2317_s1 + $0x1e0] sm:$0xff]  ;;  %v145_v25 = vld [vmem:[%s2317_s1 + $0x1f8] sm:$0xff] }
  0x21   :  { %v1791_v63 = vsub.bf16 %v81_v26, %v145_v25 }
  0x22   :  { %691 = vmatpush1.bf16.msra.mxu0 %v1165_v38  ;;  %1155 = vmatpush1.bf16.msra.mxu1 %v1165_v38  ;;  %v133_v38 = vld [vmem:[%s2317_s1 + $0x198] sm:$0xff] }
  0x23   :  { %v1472_v51 = vsub.bf16 %v69_v32, %v133_v38  ;;  %v1610_v32 = vsub.bf16 %v25_v15, %v89_v16  ;;  %v44_v15 = vld [vmem:[%s2316_s0 + $0xd0] sm:$0xff]  ;;  %v1627_v16 = vsub.bf16 %v56_v10, %v120_v13  ;;  %v79_v10 = vld [vmem:[%s2316_s0 + $0x1e8] sm:$0xff] }
  0x25   :  { %707 = vmatmul.mubr.bf16.vlgmr.msra.gmra.mrb[0].mxu0 %v1033_v39  ;;  %835 = vmatmul.mubr.bf16.vlgmr.msra.gmra.mrb[0].mxu1 %v1065_v40  ;;  %v109_v40 = vld [vmem:[%s2317_s1 + $0xd8] sm:$0xff]  ;;  %v143_v39 = vld [vmem:[%s2317_s1 + $0x1e8] sm:$0xff] }
  0x26   :  { %1107 = vmatprep.mubr.msk.bf16.mxu0 %vm577_vm0, %v1036_v46  ;;  %1123 = vmatprep.mubr.msk.bf16.mxu1 %vm577_vm0, %v1068_v5  ;;  %v135_v46 = vld [vmem:[%s2317_s1 + $0x1a8] sm:$0xff]  ;;  %v1532_v5 = vsub.bf16 %v24_v23, %v88_v24  ;;  %v104_v23 = vld [vmem:[%s2317_s1 + $0xb0] sm:$0xff]  ;;  %v105_v24 = vld [vmem:[%s2317_s1 + $0xb8] sm:$0xff] }
  0x27   :  { %v1548_v22 = vsub.bf16 %v71_v9, %v135_v46  ;;  %v1563_v37 = vsub.bf16 %v40_v0, %v104_v23  ;;  %v1565_v38 = vsub.bf16 %v41_v3, %v105_v24  ;;  %v1580_v9 = vsub.bf16 %v72_v29, %v136_v52  ;;  %v42_v46 = vld [vmem:[%s2316_s0 + $0xc0] sm:$0xff]  ;;  %v43_v0 = vld [vmem:[%s2316_s0 + $0xc8] sm:$0xff]  ;;  %v108_v29 = vld [vmem:[%s2317_s1 + $0xd0] sm:$0xff] }
  0x28   :  { %v106_v3 = vld [vmem:[%s2317_s1 + $0xc0] sm:$0xff]  ;;  %v1070_v23 = vcombine.high %v1449_v33, %v1468_v45  ;;  %v1616_v56 = vsub.bf16 %v43_v0, %v107_v43  ;;  %v1629_v24 = vsub.bf16 %v57_v11, %v121_v20  ;;  %v45_v43 = vld [vmem:[%s2316_s0 + $0xd8] sm:$0xff]  ;;  %v1654_v13 = vsub.bf16 %v44_v15, %v108_v29  ;;  %v76_v20 = vld [vmem:[%s2316_s0 + $0x1d0] sm:$0xff] }
  0x29   :  { %v1602_v52 = vsub.bf16 %v42_v46, %v106_v3  ;;  %v138_v46 = vld [vmem:[%s2317_s1 + $0x1c0] sm:$0xff]  ;;  %v139_v3 = vld [vmem:[%s2317_s1 + $0x1c8] sm:$0xff]  ;;  %v1040_v29 = vcombine.high %v1532_v5, %v1610_v32  ;;  %v1039_v54 = vcombine.low %v1532_v5, %v1610_v32  ;;  %v93_v5 = vld [vmem:[%s2317_s1 + $0x58] sm:$0xff] }
  0x2a   :  { %v1631_v31 = vsub.bf16 %v74_v55, %v138_v46  ;;  %v1633_v0 = vsub.bf16 %v75_v61, %v139_v3  ;;  %v46_v61 = vld [vmem:[%s2316_s0 + $0xe0] sm:$0xff]  ;;  %v27_v55 = vld [vmem:[%s2316_s0 + $0x48] sm:$0xff]  ;;  %v1071_v26 = vcombine.low %v1627_v16, %v1629_v24  ;;  %v60_v32 = vld [vmem:[%s2316_s0 + $0x150] sm:$0xff] }
  0x2b   :  { %v90_v46 = vld [vmem:[%s2317_s1 + $0x40] sm:$0xff]  ;;  %v91_v3 = vld [vmem:[%s2317_s1 + $0x48] sm:$0xff] }
  0x2c   :  { %v110_v15 = vld [vmem:[%s2317_s1 + $0xe0] sm:$0xff]  ;;  %v155_v2 = vsub.bf16 %v27_v55, %v91_v3  ;;  %v92_v55 = vld [vmem:[%s2317_s1 + $0x50] sm:$0xff] }
  0x2d   :  { %715 = vmatmul.mubr.bf16.gmra.mrb[4].mxu0 %v1035_v47  ;;  %843 = vmatmul.mubr.bf16.gmra.mrb[4].mxu1 %v1067_v6  ;;  %v1674_v47 = vsub.bf16 %v45_v43, %v109_v40  ;;  %v141_v6 = vld [vmem:[%s2317_s1 + $0x1d8] sm:$0xff]  ;;  %v26_v40 = vld [vmem:[%s2316_s0 + $0x40] sm:$0xff]  ;;  %v111_v43 = vld [vmem:[%s2317_s1 + $0xe8] sm:$0xff] }
  0x2e   :  { %1108 = vmatprep.mubr.msk.bf16.mxu0 %vm577_vm0, %v1038_v44  ;;  %1124 = vmatprep.mubr.msk.bf16.mxu1 %vm577_vm0, %v1070_v23  ;;  %v47_v44 = vld [vmem:[%s2316_s0 + $0xe8] sm:$0xff]  ;;  %v1069_v23 = vcombine.low %v1449_v33, %v1468_v45  ;;  %v1701_v33 = vsub.bf16 %v76_v20, %v140_v28  ;;  %v1703_v45 = vsub.bf16 %v77_v27, %v141_v6  ;;  %v58_v11 = vld [vmem:[%s2316_s0 + $0x140] sm:$0xff]  ;;  %v48_v27 = vld [vmem:[%s2316_s0 + $0xf0] sm:$0xff] }
  0x2f   :  { %v122_v20 = vld [vmem:[%s2317_s1 + $0x140] sm:$0xff]  ;;  %v1724_v6 = vsub.bf16 %v46_v61, %v110_v15  ;;  %v1726_v41 = vsub.bf16 %v47_v44, %v111_v43  ;;  %v59_v28 = vld [vmem:[%s2316_s0 + $0x148] sm:$0xff]  ;;  %v1744_v15 = vsub.bf16 %v78_v42, %v142_v59  ;;  %v1746_v43 = vsub.bf16 %v79_v10, %v143_v39  ;;  %v113_v10 = vld [vmem:[%s2317_s1 + $0xf8] sm:$0xff] }
  0x30   :  { %v1072_v61 = vcombine.high %v1627_v16, %v1629_v24  ;;  %v1766_v42 = vsub.bf16 %v48_v27, %v112_v35  ;;  %v80_v44 = vld [vmem:[%s2316_s0 + $0x1f0] sm:$0xff]  ;;  %v123_v59 = vld [vmem:[%s2317_s1 + $0x148] sm:$0xff]  ;;  %v1781_v35 = vsub.bf16 %v49_v57, %v113_v10  ;;  %v154_v17 = vsub.bf16 %v26_v40, %v90_v46  ;;  %v61_v24 = vld [vmem:[%s2316_s0 + $0x158] sm:$0xff] }
  0x31   :  { %v1094_v39 = vcombine.high %v1744_v15, %v1746_v43  ;;  %v144_v27 = vld [vmem:[%s2317_s1 + $0x1f0] sm:$0xff]  ;;  %v186_v57 = vsub.bf16 %v58_v11, %v122_v20  ;;  %v187_v40 = vsub.bf16 %v59_v28, %v123_v59  ;;  %v29_v11 = vld [vmem:[%s2316_s0 + $0x58] sm:$0xff] }
  0x32   :  { %v1789_v14 = vsub.bf16 %v80_v44, %v144_v27  ;;  %v1064_v10 = vcombine.high %v1766_v42, %v1781_v35  ;;  %v1063_v34 = vcombine.low %v1766_v42, %v1781_v35  ;;  %v124_v16 = vld [vmem:[%s2317_s1 + $0x150] sm:$0xff]  ;;  %v125_v46 = vld [vmem:[%s2317_s1 + $0x158] sm:$0xff]  ;;  %v157_v20 = vsub.bf16 %v29_v11, %v93_v5  ;;  %v30_v27 = vld [vmem:[%s2316_s0 + $0x60] sm:$0xff] }
  0x33   :  { %v188_v28 = vsub.bf16 %v60_v32, %v124_v16  ;;  %v1041_v44 = vcombine.low %v154_v17, %v155_v2  ;;  %v1073_v59 = vcombine.low %v186_v57, %v187_v40  ;;  %v95_v11 = vld [vmem:[%s2317_s1 + $0x68] sm:$0xff] }
  0x34   :  { %v1096_v25 = vcombine.high %v1789_v14, %v1791_v63 }
  0x35   :  { %723 = vmatmul.mubr.bf16.gmra.mrb[8].mxu0 %v1037_v4  ;;  %851 = vmatmul.mubr.bf16.gmra.mrb[8].mxu1 %v1069_v23  ;;  %v28_v4 = vld [vmem:[%s2316_s0 + $0x50] sm:$0xff]  ;;  %v1042_v23 = vcombine.high %v154_v17, %v155_v2  ;;  %v62_v2 = vld [vmem:[%s2316_s0 + $0x160] sm:$0xff]  ;;  %v63_v17 = vld [vmem:[%s2316_s0 + $0x168] sm:$0xff] }
  0x36   :  { %1109 = vmatprep.mubr.msk.bf16.mxu0 %vm577_vm0, %v1040_v29  ;;  %1125 = vmatprep.mubr.msk.bf16.mxu1 %vm577_vm0, %v1072_v61  ;;  %v1074_v29 = vcombine.high %v186_v57, %v187_v40  ;;  %v156_v3 = vsub.bf16 %v28_v4, %v92_v55  ;;  %v189_v61 = vsub.bf16 %v61_v24, %v125_v46  ;;  %v94_v4 = vld [vmem:[%s2317_s1 + $0x60] sm:$0xff]  ;;  %v127_v40 = vld [vmem:[%s2317_s1 + $0x168] sm:$0xff] }
  0x37   :  { %v126_v57 = vld [vmem:[%s2317_s1 + $0x160] sm:$0xff]  ;;  %v191_v5 = vsub.bf16 %v63_v17, %v127_v40 }
  0x38   :  { %v190_v55 = vsub.bf16 %v62_v2, %v126_v57  ;;  %v1043_v32 = vcombine.low %v156_v3, %v157_v20  ;;  %v1075_v24 = vcombine.low %v188_v28, %v189_v61 }
  0x3a   :  { %v1078_v46 = vcombine.high %v190_v55, %v191_v5 }
  0x3d   :  { %731 = vmatmul.mubr.bf16.gmra.mrb[12].mxu0 %v1039_v54  ;;  %859 = vmatmul.mubr.bf16.gmra.mrb[12].mxu1 %v1071_v26  ;;  %v1044_v54 = vcombine.high %v156_v3, %v157_v20  ;;  %v1076_v26 = vcombine.high %v188_v28, %v189_v61  ;;  %v2322_v3 = vcombine.low %v1337_v48, %v1339_v49 }
  0x3e   :  { %1110 = vmatprep.mubr.msk.bf16.mxu0 %vm577_vm0, %v1042_v23  ;;  %1126 = vmatprep.mubr.msk.bf16.mxu1 %vm577_vm0, %v1074_v29  ;;  %v158_v23 = vsub.bf16 %v30_v27, %v94_v4  ;;  %v159_v29 = vsub.bf16 %v31_v53, %v95_v11  ;;  %v2320_v27 = vcombine.high %v1337_v48, %v1339_v49 }
  0x3f   :  { %v2321_v53 = vcombine.high %v1363_v58, %v1381_v1  ;;  %v2323_v20 = vcombine.low %v1363_v58, %v1381_v1  ;;  %v2324_v28 = vcombine.high %v1398_v7, %v1400_v8  ;;  %v2325_v61 = vcombine.high %v1415_v18, %v1417_v19 }
  0x40   :  { %v1046_v16 = vcombine.high %v158_v23, %v159_v29  ;;  %v2327_v48 = vcombine.low %v1415_v18, %v1417_v19  ;;  %v2328_v49 = vcombine.high %v1441_v30, %v1455_v36  ;;  %v2329_v58 = vcombine.high %v1470_v50, %v1472_v51 }
  0x41   :  { %v2330_v1 = vcombine.low %v1441_v30, %v1455_v36  ;;  %v2333_v18 = vcombine.high %v1546_v21, %v1548_v22  ;;  %v2334_v19 = vcombine.low %v1493_v60, %v1519_v62  ;;  %v2335_v30 = vcombine.low %v1546_v21, %v1548_v22 }
  0x42   :  { %v2336_v36 = vcombine.high %v1563_v37, %v1565_v38  ;;  %v2341_v21 = vcombine.high %v1631_v31, %v1633_v0  ;;  %v2342_v22 = vcombine.low %v1602_v52, %v1616_v56 }
  0x45   :  { %739 = vmatmul.mubr.bf16.gmra.mrb[16].mxu0 %v1041_v44  ;;  %867 = vmatmul.mubr.bf16.gmra.mrb[16].mxu1 %v1073_v59  ;;  %v1045_v44 = vcombine.low %v158_v23, %v159_v29  ;;  %v1077_v59 = vcombine.low %v190_v55, %v191_v5 }
  0x46   :  { %1111 = vmatprep.mubr.msk.bf16.mxu0 %vm577_vm0, %v1044_v54  ;;  %1127 = vmatprep.mubr.msk.bf16.mxu1 %vm577_vm0, %v1076_v26  ;;  %v2326_v54 = vcombine.low %v1398_v7, %v1400_v8  ;;  %v2331_v7 = vcombine.low %v1470_v50, %v1472_v51  ;;  %v2332_v8 = vcombine.high %v1493_v60, %v1519_v62 }
  0x47   :  { %v2337_v50 = vcombine.high %v1580_v9, %v1582_v12  ;;  %v2338_v51 = vcombine.low %v1563_v37, %v1565_v38  ;;  %v2339_v60 = vcombine.low %v1580_v9, %v1582_v12  ;;  %v2340_v62 = vcombine.high %v1602_v52, %v1616_v56 }
  0x48   :  { %v2343_v37 = vcombine.low %v1631_v31, %v1633_v0  ;;  %v2344_v38 = vcombine.high %v1654_v13, %v1674_v47  ;;  %v2345_v9 = vcombine.high %v1701_v33, %v1703_v45  ;;  %v2346_v12 = vcombine.low %v1654_v13, %v1674_v47 }
  0x49   :  { %v2347_v56 = vcombine.low %v1701_v33, %v1703_v45  ;;  %v2348_v31 = vcombine.high %v1724_v6, %v1726_v41  ;;  %v2349_v52 = vcombine.low %v1724_v6, %v1726_v41  ;;  %v2350_v0 = vcombine.low %v1744_v15, %v1746_v43  ;;  %v1993_v41 = vld [vmem:[%s2318_s3] ss:$0 sm:$0xff] }
  0x4a   :  { %v2351_v13 = vcombine.low %v1789_v14, %v1791_v63 }
  0x4d   :  { %747 = vmatmul.mubr.bf16.gmra.mrb[20].mxu0 %v1043_v32  ;;  %875 = vmatmul.mubr.bf16.gmra.mrb[20].mxu1 %v1075_v24 }
  0x4e   :  { %1112 = vmatprep.mubr.msk.bf16.mxu0 %vm577_vm0, %v1046_v16  ;;  %1128 = vmatprep.mubr.msk.bf16.mxu1 %vm577_vm0, %v1078_v46 }
  0x55   :  { %755 = vmatmul.mubr.bf16.gmra.mrb[24].mxu0 %v1045_v44  ;;  %883 = vmatmul.mubr.bf16.gmra.mrb[24].mxu1 %v1077_v59 }
  0x56   :  { %1113 = vmatprep.mubr.msk.bf16.mxu0 %vm577_vm0, %v2320_v27  ;;  %1129 = vmatprep.mubr.msk.bf16.mxu1 %vm577_vm0, %v2321_v53 }
  0x5d   :  { %763 = vmatmul.mubr.bf16.gmra.mrb[28].mxu0 %v2322_v3  ;;  %891 = vmatmul.mubr.bf16.gmra.mrb[28].mxu1 %v2323_v20 }
  0x5e   :  { %1114 = vmatprep.mubr.msk.bf16.mxu0 %vm577_vm0, %v2324_v28  ;;  %1130 = vmatprep.mubr.msk.bf16.mxu1 %vm577_vm0, %v2325_v61 }
  0x65   :  { %771 = vmatmul.mubr.bf16.gmra.mrb[32].mxu0 %v2326_v54  ;;  %899 = vmatmul.mubr.bf16.gmra.mrb[32].mxu1 %v2327_v48 }
  0x66   :  { %1115 = vmatprep.mubr.msk.bf16.mxu0 %vm577_vm0, %v2328_v49  ;;  %1131 = vmatprep.mubr.msk.bf16.mxu1 %vm577_vm0, %v2329_v58 }
  0x6d   :  { %779 = vmatmul.mubr.bf16.gmra.mrb[36].mxu0 %v2330_v1  ;;  %907 = vmatmul.mubr.bf16.gmra.mrb[36].mxu1 %v2331_v7 }
  0x6e   :  { %1116 = vmatprep.mubr.msk.bf16.mxu0 %vm577_vm0, %v2332_v8  ;;  %1132 = vmatprep.mubr.msk.bf16.mxu1 %vm577_vm0, %v2333_v18 }
  0x75   :  { %787 = vmatmul.mubr.bf16.gmra.mrb[40].mxu0 %v2334_v19  ;;  %915 = vmatmul.mubr.bf16.gmra.mrb[40].mxu1 %v2335_v30 }
  0x76   :  { %1117 = vmatprep.mubr.msk.bf16.mxu0 %vm577_vm0, %v2336_v36  ;;  %1133 = vmatprep.mubr.msk.bf16.mxu1 %vm577_vm0, %v2337_v50 }
  0x7d   :  { %795 = vmatmul.mubr.bf16.gmra.mrb[44].mxu0 %v2338_v51  ;;  %923 = vmatmul.mubr.bf16.gmra.mrb[44].mxu1 %v2339_v60 }
  0x7e   :  { %1118 = vmatprep.mubr.msk.bf16.mxu0 %vm577_vm0, %v2340_v62  ;;  %1134 = vmatprep.mubr.msk.bf16.mxu1 %vm577_vm0, %v2341_v21 }
  0x85   :  { %803 = vmatmul.mubr.bf16.gmra.mrb[48].mxu0 %v2342_v22  ;;  %931 = vmatmul.mubr.bf16.gmra.mrb[48].mxu1 %v2343_v37 }
  0x86   :  { %1119 = vmatprep.mubr.msk.bf16.mxu0 %vm577_vm0, %v2344_v38  ;;  %1135 = vmatprep.mubr.msk.bf16.mxu1 %vm577_vm0, %v2345_v9 }
  0x8d   :  { %811 = vmatmul.mubr.bf16.gmra.mrb[52].mxu0 %v2346_v12  ;;  %939 = vmatmul.mubr.bf16.gmra.mrb[52].mxu1 %v2347_v56 }
  0x8e   :  { %1120 = vmatprep.mubr.msk.bf16.mxu0 %vm577_vm0, %v2348_v31  ;;  %1136 = vmatprep.mubr.msk.bf16.mxu1 %vm577_vm0, %v1094_v39 }
  0x95   :  { %819 = vmatmul.mubr.bf16.gmra.mrb[56].mxu0 %v2349_v52  ;;  %947 = vmatmul.mubr.bf16.gmra.mrb[56].mxu1 %v2350_v0 }
  0x96   :  { %1121 = vmatprep.mubr.msk.bf16.mxu0 %vm577_vm0, %v1064_v10  ;;  %1137 = vmatprep.mubr.msk.bf16.mxu1 %vm577_vm0, %v1096_v25 }
  0x9d   :  { %827 = vmatmul.mubr.bf16.gmra.mrb[60].mxu0 %v1063_v34  ;;  %955 = vmatmul.mubr.bf16.gmra.mrb[60].mxu1 %v2351_v13 }
  0xf8   :  { %v708_v47 = vpop.f32.mrb[0].mxu0  ;;  %v836_v33 = vpop.f32.mrb[0].mxu1 }
  0xf9   :  { %v709_v45 = vadd.f32 %v1993_v41, %v708_v47  ;;  %v837_v6 = vadd.f32 %v1993_v41, %v836_v33  ;;  %v710_v15 = vpop.f32.mrb[1].mxu0  ;;  %v838_v43 = vpop.f32.mrb[1].mxu1 }
  0xfa   :  { %v711_v39 = vpop.f32.mrb[2].mxu0  ;;  %v839_v34 = vpop.f32.mrb[2].mxu1 }
  0xfb   :  { %964 = vst.msk [vmem:[%s2319_s4] sm:$0xff] %vm963_vm1, %v709_v45  ;;  %996 = vst.msk [vmem:[%s2319_s4 + $0x100] sm:$0xff] %vm963_vm1, %v837_v6  ;;  %v712_v63 = vadd.f32 %v1993_v41, %v711_v39  ;;  %v840_v14 = vadd.f32 %v1993_v41, %v839_v34  ;;  %v713_v42 = vpop.f32.mrb[3].mxu0  ;;  %v841_v35 = vpop.f32.mrb[3].mxu1 }
  0xfd   :  { %965 = vst.msk [vmem:[%s2319_s4 + $0x8] sm:$0xff] %vm963_vm1, %v712_v63  ;;  %997 = vst.msk [vmem:[%s2319_s4 + $0x108] sm:$0xff] %vm963_vm1, %v840_v14 }
 0x100   :  { %v716_v10 = vpop.f32.mrb[4].mxu0  ;;  %v844_v25 = vpop.f32.mrb[4].mxu1 }
 0x101   :  { %v717_v26 = vadd.f32 %v1993_v41, %v716_v10  ;;  %v845_v4 = vadd.f32 %v1993_v41, %v844_v25  ;;  %v718_v11 = vpop.f32.mrb[5].mxu0  ;;  %v846_v2 = vpop.f32.mrb[5].mxu1 }
 0x102   :  { %v719_v17 = vpop.f32.mrb[6].mxu0  ;;  %v847_v57 = vpop.f32.mrb[6].mxu1 }
 0x103   :  { %966 = vst.msk [vmem:[%s2319_s4 + $0x10] sm:$0xff] %vm963_vm1, %v717_v26  ;;  %998 = vst.msk [vmem:[%s2319_s4 + $0x110] sm:$0xff] %vm963_vm1, %v845_v4  ;;  %v720_v40 = vadd.f32 %v1993_v41, %v719_v17  ;;  %v848_v23 = vadd.f32 %v1993_v41, %v847_v57  ;;  %v721_v29 = vpop.f32.mrb[7].mxu0  ;;  %v849_v55 = vpop.f32.mrb[7].mxu1 }
 0x105   :  { %967 = vst.msk [vmem:[%s2319_s4 + $0x18] sm:$0xff] %vm963_vm1, %v720_v40  ;;  %999 = vst.msk [vmem:[%s2319_s4 + $0x118] sm:$0xff] %vm963_vm1, %v848_v23 }
 0x108   :  { %v724_v5 = vpop.f32.mrb[8].mxu0  ;;  %v852_v32 = vpop.f32.mrb[8].mxu1 }
 0x109   :  { %v725_v24 = vadd.f32 %v1993_v41, %v724_v5  ;;  %v853_v16 = vadd.f32 %v1993_v41, %v852_v32  ;;  %v726_v46 = vpop.f32.mrb[9].mxu0  ;;  %v854_v44 = vpop.f32.mrb[9].mxu1 }
 0x10a   :  { %v727_v59 = vpop.f32.mrb[10].mxu0  ;;  %v855_v27 = vpop.f32.mrb[10].mxu1 }
 0x10b   :  { %968 = vst.msk [vmem:[%s2319_s4 + $0x20] sm:$0xff] %vm963_vm1, %v725_v24  ;;  %1000 = vst.msk [vmem:[%s2319_s4 + $0x120] sm:$0xff] %vm963_vm1, %v853_v16  ;;  %v728_v53 = vadd.f32 %v1993_v41, %v727_v59  ;;  %v856_v3 = vadd.f32 %v1993_v41, %v855_v27  ;;  %v729_v20 = vpop.f32.mrb[11].mxu0  ;;  %v857_v28 = vpop.f32.mrb[11].mxu1 }
 0x10d   :  { %969 = vst.msk [vmem:[%s2319_s4 + $0x28] sm:$0xff] %vm963_vm1, %v728_v53  ;;  %1001 = vst.msk [vmem:[%s2319_s4 + $0x128] sm:$0xff] %vm963_vm1, %v856_v3 }
 0x110   :  { %v732_v61 = vpop.f32.mrb[12].mxu0  ;;  %v860_v54 = vpop.f32.mrb[12].mxu1 }
 0x111   :  { %v733_v48 = vadd.f32 %v1993_v41, %v732_v61  ;;  %v861_v49 = vadd.f32 %v1993_v41, %v860_v54  ;;  %v734_v58 = vpop.f32.mrb[13].mxu0  ;;  %v862_v1 = vpop.f32.mrb[13].mxu1 }
 0x112   :  { %v735_v7 = vpop.f32.mrb[14].mxu0  ;;  %v863_v8 = vpop.f32.mrb[14].mxu1 }
 0x113   :  { %970 = vst.msk [vmem:[%s2319_s4 + $0x30] sm:$0xff] %vm963_vm1, %v733_v48  ;;  %1002 = vst.msk [vmem:[%s2319_s4 + $0x130] sm:$0xff] %vm963_vm1, %v861_v49  ;;  %v736_v18 = vadd.f32 %v1993_v41, %v735_v7  ;;  %v864_v19 = vadd.f32 %v1993_v41, %v863_v8  ;;  %v737_v30 = vpop.f32.mrb[15].mxu0  ;;  %v865_v36 = vpop.f32.mrb[15].mxu1 }
 0x115   :  { %971 = vst.msk [vmem:[%s2319_s4 + $0x38] sm:$0xff] %vm963_vm1, %v736_v18  ;;  %1003 = vst.msk [vmem:[%s2319_s4 + $0x138] sm:$0xff] %vm963_vm1, %v864_v19 }
 0x118   :  { %v740_v50 = vpop.f32.mrb[16].mxu0  ;;  %v868_v51 = vpop.f32.mrb[16].mxu1 }
 0x119   :  { %v741_v60 = vadd.f32 %v1993_v41, %v740_v50  ;;  %v869_v62 = vadd.f32 %v1993_v41, %v868_v51  ;;  %v742_v21 = vpop.f32.mrb[17].mxu0  ;;  %v870_v22 = vpop.f32.mrb[17].mxu1 }
 0x11a   :  { %v743_v37 = vpop.f32.mrb[18].mxu0  ;;  %v871_v38 = vpop.f32.mrb[18].mxu1 }
 0x11b   :  { %972 = vst.msk [vmem:[%s2319_s4 + $0x40] sm:$0xff] %vm963_vm1, %v741_v60  ;;  %1004 = vst.msk [vmem:[%s2319_s4 + $0x140] sm:$0xff] %vm963_vm1, %v869_v62  ;;  %v744_v9 = vadd.f32 %v1993_v41, %v743_v37  ;;  %v872_v12 = vadd.f32 %v1993_v41, %v871_v38  ;;  %v745_v56 = vpop.f32.mrb[19].mxu0  ;;  %v873_v31 = vpop.f32.mrb[19].mxu1 }
 0x11d   :  { %973 = vst.msk [vmem:[%s2319_s4 + $0x48] sm:$0xff] %vm963_vm1, %v744_v9  ;;  %1005 = vst.msk [vmem:[%s2319_s4 + $0x148] sm:$0xff] %vm963_vm1, %v872_v12 }
 0x120   :  { %v748_v52 = vpop.f32.mrb[20].mxu0  ;;  %v876_v0 = vpop.f32.mrb[20].mxu1 }
 0x121   :  { %v749_v13 = vadd.f32 %v1993_v41, %v748_v52  ;;  %v877_v47 = vadd.f32 %v1993_v41, %v876_v0  ;;  %v750_v33 = vpop.f32.mrb[21].mxu0  ;;  %v878_v45 = vpop.f32.mrb[21].mxu1 }
 0x122   :  { %v751_v6 = vpop.f32.mrb[22].mxu0  ;;  %v879_v15 = vpop.f32.mrb[22].mxu1 }
 0x123   :  { %974 = vst.msk [vmem:[%s2319_s4 + $0x50] sm:$0xff] %vm963_vm1, %v749_v13  ;;  %1006 = vst.msk [vmem:[%s2319_s4 + $0x150] sm:$0xff] %vm963_vm1, %v877_v47  ;;  %v752_v43 = vadd.f32 %v1993_v41, %v751_v6  ;;  %v880_v39 = vadd.f32 %v1993_v41, %v879_v15  ;;  %v753_v34 = vpop.f32.mrb[23].mxu0  ;;  %v881_v63 = vpop.f32.mrb[23].mxu1 }
 0x125   :  { %975 = vst.msk [vmem:[%s2319_s4 + $0x58] sm:$0xff] %vm963_vm1, %v752_v43  ;;  %1007 = vst.msk [vmem:[%s2319_s4 + $0x158] sm:$0xff] %vm963_vm1, %v880_v39 }
 0x128   :  { %v756_v14 = vpop.f32.mrb[24].mxu0  ;;  %v884_v42 = vpop.f32.mrb[24].mxu1 }
 0x129   :  { %v757_v35 = vadd.f32 %v1993_v41, %v756_v14  ;;  %v885_v10 = vadd.f32 %v1993_v41, %v884_v42  ;;  %v758_v25 = vpop.f32.mrb[25].mxu0  ;;  %v886_v26 = vpop.f32.mrb[25].mxu1 }
 0x12a   :  { %v759_v4 = vpop.f32.mrb[26].mxu0  ;;  %v887_v11 = vpop.f32.mrb[26].mxu1 }
 0x12b   :  { %976 = vst.msk [vmem:[%s2319_s4 + $0x60] sm:$0xff] %vm963_vm1, %v757_v35  ;;  %1008 = vst.msk [vmem:[%s2319_s4 + $0x160] sm:$0xff] %vm963_vm1, %v885_v10  ;;  %v760_v2 = vadd.f32 %v1993_v41, %v759_v4  ;;  %v888_v17 = vadd.f32 %v1993_v41, %v887_v11  ;;  %v761_v57 = vpop.f32.mrb[27].mxu0  ;;  %v889_v40 = vpop.f32.mrb[27].mxu1 }
 0x12d   :  { %977 = vst.msk [vmem:[%s2319_s4 + $0x68] sm:$0xff] %vm963_vm1, %v760_v2  ;;  %1009 = vst.msk [vmem:[%s2319_s4 + $0x168] sm:$0xff] %vm963_vm1, %v888_v17 }
 0x130   :  { %v764_v23 = vpop.f32.mrb[28].mxu0  ;;  %v892_v29 = vpop.f32.mrb[28].mxu1 }
 0x131   :  { %v765_v55 = vadd.f32 %v1993_v41, %v764_v23  ;;  %v893_v5 = vadd.f32 %v1993_v41, %v892_v29  ;;  %v766_v32 = vpop.f32.mrb[29].mxu0  ;;  %v894_v24 = vpop.f32.mrb[29].mxu1 }
 0x132   :  { %v767_v16 = vpop.f32.mrb[30].mxu0  ;;  %v895_v46 = vpop.f32.mrb[30].mxu1 }
 0x133   :  { %978 = vst.msk [vmem:[%s2319_s4 + $0x70] sm:$0xff] %vm963_vm1, %v765_v55  ;;  %1010 = vst.msk [vmem:[%s2319_s4 + $0x170] sm:$0xff] %vm963_vm1, %v893_v5  ;;  %v768_v44 = vadd.f32 %v1993_v41, %v767_v16  ;;  %v896_v59 = vadd.f32 %v1993_v41, %v895_v46  ;;  %v769_v27 = vpop.f32.mrb[31].mxu0  ;;  %v897_v53 = vpop.f32.mrb[31].mxu1 }
 0x135   :  { %979 = vst.msk [vmem:[%s2319_s4 + $0x78] sm:$0xff] %vm963_vm1, %v768_v44  ;;  %1011 = vst.msk [vmem:[%s2319_s4 + $0x178] sm:$0xff] %vm963_vm1, %v896_v59 }
 0x138   :  { %v772_v3 = vpop.f32.mrb[32].mxu0  ;;  %v900_v20 = vpop.f32.mrb[32].mxu1 }
 0x139   :  { %v773_v28 = vadd.f32 %v1993_v41, %v772_v3  ;;  %v901_v61 = vadd.f32 %v1993_v41, %v900_v20  ;;  %v774_v54 = vpop.f32.mrb[33].mxu0  ;;  %v902_v48 = vpop.f32.mrb[33].mxu1 }
 0x13a   :  { %v775_v49 = vpop.f32.mrb[34].mxu0  ;;  %v903_v58 = vpop.f32.mrb[34].mxu1 }
 0x13b   :  { %980 = vst.msk [vmem:[%s2319_s4 + $0x80] sm:$0xff] %vm963_vm1, %v773_v28  ;;  %1012 = vst.msk [vmem:[%s2319_s4 + $0x180] sm:$0xff] %vm963_vm1, %v901_v61  ;;  %v776_v1 = vadd.f32 %v1993_v41, %v775_v49  ;;  %v904_v7 = vadd.f32 %v1993_v41, %v903_v58  ;;  %v777_v8 = vpop.f32.mrb[35].mxu0  ;;  %v905_v18 = vpop.f32.mrb[35].mxu1 }
 0x13d   :  { %981 = vst.msk [vmem:[%s2319_s4 + $0x88] sm:$0xff] %vm963_vm1, %v776_v1  ;;  %1013 = vst.msk [vmem:[%s2319_s4 + $0x188] sm:$0xff] %vm963_vm1, %v904_v7 }
 0x140   :  { %v780_v19 = vpop.f32.mrb[36].mxu0  ;;  %v908_v30 = vpop.f32.mrb[36].mxu1 }
 0x141   :  { %v781_v36 = vadd.f32 %v1993_v41, %v780_v19  ;;  %v909_v50 = vadd.f32 %v1993_v41, %v908_v30  ;;  %v782_v51 = vpop.f32.mrb[37].mxu0  ;;  %v910_v60 = vpop.f32.mrb[37].mxu1 }
 0x142   :  { %v783_v62 = vpop.f32.mrb[38].mxu0  ;;  %v911_v21 = vpop.f32.mrb[38].mxu1 }
 0x143   :  { %982 = vst.msk [vmem:[%s2319_s4 + $0x90] sm:$0xff] %vm963_vm1, %v781_v36  ;;  %1014 = vst.msk [vmem:[%s2319_s4 + $0x190] sm:$0xff] %vm963_vm1, %v909_v50  ;;  %v784_v22 = vadd.f32 %v1993_v41, %v783_v62  ;;  %v912_v37 = vadd.f32 %v1993_v41, %v911_v21  ;;  %v785_v38 = vpop.f32.mrb[39].mxu0  ;;  %v913_v9 = vpop.f32.mrb[39].mxu1 }
 0x145   :  { %983 = vst.msk [vmem:[%s2319_s4 + $0x98] sm:$0xff] %vm963_vm1, %v784_v22  ;;  %1015 = vst.msk [vmem:[%s2319_s4 + $0x198] sm:$0xff] %vm963_vm1, %v912_v37 }
 0x148   :  { %v788_v12 = vpop.f32.mrb[40].mxu0  ;;  %v916_v56 = vpop.f32.mrb[40].mxu1 }
 0x149   :  { %v789_v31 = vadd.f32 %v1993_v41, %v788_v12  ;;  %v917_v52 = vadd.f32 %v1993_v41, %v916_v56  ;;  %v790_v0 = vpop.f32.mrb[41].mxu0  ;;  %v918_v13 = vpop.f32.mrb[41].mxu1 }
 0x14a   :  { %v791_v47 = vpop.f32.mrb[42].mxu0  ;;  %v919_v33 = vpop.f32.mrb[42].mxu1 }
 0x14b   :  { %984 = vst.msk [vmem:[%s2319_s4 + $0xa0] sm:$0xff] %vm963_vm1, %v789_v31  ;;  %1016 = vst.msk [vmem:[%s2319_s4 + $0x1a0] sm:$0xff] %vm963_vm1, %v917_v52  ;;  %v792_v45 = vadd.f32 %v1993_v41, %v791_v47  ;;  %v920_v6 = vadd.f32 %v1993_v41, %v919_v33  ;;  %v793_v15 = vpop.f32.mrb[43].mxu0  ;;  %v921_v43 = vpop.f32.mrb[43].mxu1 }
 0x14d   :  { %985 = vst.msk [vmem:[%s2319_s4 + $0xa8] sm:$0xff] %vm963_vm1, %v792_v45  ;;  %1017 = vst.msk [vmem:[%s2319_s4 + $0x1a8] sm:$0xff] %vm963_vm1, %v920_v6 }
 0x150   :  { %v796_v39 = vpop.f32.mrb[44].mxu0  ;;  %v924_v34 = vpop.f32.mrb[44].mxu1 }
 0x151   :  { %v797_v63 = vadd.f32 %v1993_v41, %v796_v39  ;;  %v925_v14 = vadd.f32 %v1993_v41, %v924_v34  ;;  %v798_v42 = vpop.f32.mrb[45].mxu0  ;;  %v926_v35 = vpop.f32.mrb[45].mxu1 }
 0x152   :  { %v799_v10 = vpop.f32.mrb[46].mxu0  ;;  %v927_v25 = vpop.f32.mrb[46].mxu1 }
 0x153   :  { %986 = vst.msk [vmem:[%s2319_s4 + $0xb0] sm:$0xff] %vm963_vm1, %v797_v63  ;;  %1018 = vst.msk [vmem:[%s2319_s4 + $0x1b0] sm:$0xff] %vm963_vm1, %v925_v14  ;;  %v800_v26 = vadd.f32 %v1993_v41, %v799_v10  ;;  %v928_v4 = vadd.f32 %v1993_v41, %v927_v25  ;;  %v801_v11 = vpop.f32.mrb[47].mxu0  ;;  %v929_v2 = vpop.f32.mrb[47].mxu1 }
 0x155   :  { %987 = vst.msk [vmem:[%s2319_s4 + $0xb8] sm:$0xff] %vm963_vm1, %v800_v26  ;;  %1019 = vst.msk [vmem:[%s2319_s4 + $0x1b8] sm:$0xff] %vm963_vm1, %v928_v4 }
 0x158   :  { %v804_v17 = vpop.f32.mrb[48].mxu0  ;;  %v932_v57 = vpop.f32.mrb[48].mxu1 }
 0x159   :  { %v805_v40 = vadd.f32 %v1993_v41, %v804_v17  ;;  %v933_v23 = vadd.f32 %v1993_v41, %v932_v57  ;;  %v806_v29 = vpop.f32.mrb[49].mxu0  ;;  %v934_v55 = vpop.f32.mrb[49].mxu1 }
 0x15a   :  { %v807_v5 = vpop.f32.mrb[50].mxu0  ;;  %v935_v32 = vpop.f32.mrb[50].mxu1 }
 0x15b   :  { %988 = vst.msk [vmem:[%s2319_s4 + $0xc0] sm:$0xff] %vm963_vm1, %v805_v40  ;;  %1020 = vst.msk [vmem:[%s2319_s4 + $0x1c0] sm:$0xff] %vm963_vm1, %v933_v23  ;;  %v808_v24 = vadd.f32 %v1993_v41, %v807_v5  ;;  %v936_v16 = vadd.f32 %v1993_v41, %v935_v32  ;;  %v809_v46 = vpop.f32.mrb[51].mxu0  ;;  %v937_v44 = vpop.f32.mrb[51].mxu1 }
 0x15d   :  { %989 = vst.msk [vmem:[%s2319_s4 + $0xc8] sm:$0xff] %vm963_vm1, %v808_v24  ;;  %1021 = vst.msk [vmem:[%s2319_s4 + $0x1c8] sm:$0xff] %vm963_vm1, %v936_v16 }
 0x160   :  { %v812_v59 = vpop.f32.mrb[52].mxu0  ;;  %v940_v27 = vpop.f32.mrb[52].mxu1 }
 0x161   :  { %v813_v53 = vadd.f32 %v1993_v41, %v812_v59  ;;  %v941_v3 = vadd.f32 %v1993_v41, %v940_v27  ;;  %v814_v20 = vpop.f32.mrb[53].mxu0  ;;  %v942_v28 = vpop.f32.mrb[53].mxu1 }
 0x162   :  { %v815_v61 = vpop.f32.mrb[54].mxu0  ;;  %v943_v54 = vpop.f32.mrb[54].mxu1 }
 0x163   :  { %990 = vst.msk [vmem:[%s2319_s4 + $0xd0] sm:$0xff] %vm963_vm1, %v813_v53  ;;  %1022 = vst.msk [vmem:[%s2319_s4 + $0x1d0] sm:$0xff] %vm963_vm1, %v941_v3  ;;  %v816_v48 = vadd.f32 %v1993_v41, %v815_v61  ;;  %v944_v49 = vadd.f32 %v1993_v41, %v943_v54  ;;  %v817_v58 = vpop.f32.mrb[55].mxu0  ;;  %v945_v1 = vpop.f32.mrb[55].mxu1 }
 0x165   :  { %991 = vst.msk [vmem:[%s2319_s4 + $0xd8] sm:$0xff] %vm963_vm1, %v816_v48  ;;  %1023 = vst.msk [vmem:[%s2319_s4 + $0x1d8] sm:$0xff] %vm963_vm1, %v944_v49 }
 0x168   :  { %v820_v7 = vpop.f32.mrb[56].mxu0  ;;  %v948_v8 = vpop.f32.mrb[56].mxu1 }
 0x169   :  { %v821_v18 = vadd.f32 %v1993_v41, %v820_v7  ;;  %v949_v19 = vadd.f32 %v1993_v41, %v948_v8  ;;  %v822_v30 = vpop.f32.mrb[57].mxu0  ;;  %v950_v36 = vpop.f32.mrb[57].mxu1 }
 0x16a   :  { %v823_v50 = vpop.f32.mrb[58].mxu0  ;;  %v951_v51 = vpop.f32.mrb[58].mxu1 }
 0x16b   :  { %992 = vst.msk [vmem:[%s2319_s4 + $0xe0] sm:$0xff] %vm963_vm1, %v821_v18  ;;  %1024 = vst.msk [vmem:[%s2319_s4 + $0x1e0] sm:$0xff] %vm963_vm1, %v949_v19  ;;  %v824_v60 = vadd.f32 %v1993_v41, %v823_v50  ;;  %v952_v62 = vadd.f32 %v1993_v41, %v951_v51  ;;  %v825_v21 = vpop.f32.mrb[59].mxu0  ;;  %v953_v22 = vpop.f32.mrb[59].mxu1 }
 0x16d   :  { %993 = vst.msk [vmem:[%s2319_s4 + $0xe8] sm:$0xff] %vm963_vm1, %v824_v60  ;;  %1025 = vst.msk [vmem:[%s2319_s4 + $0x1e8] sm:$0xff] %vm963_vm1, %v952_v62 }
 0x170   :  { %v828_v37 = vpop.f32.mrb[60].mxu0  ;;  %v956_v38 = vpop.f32.mrb[60].mxu1 }
 0x171   :  { %v829_v9 = vadd.f32 %v1993_v41, %v828_v37  ;;  %v957_v12 = vadd.f32 %v1993_v41, %v956_v38  ;;  %v830_v56 = vpop.f32.mrb[61].mxu0  ;;  %v958_v31 = vpop.f32.mrb[61].mxu1 }
 0x172   :  { %v831_v52 = vpop.f32.mrb[62].mxu0  ;;  %v959_v0 = vpop.f32.mrb[62].mxu1 }
 0x173   :  { %994 = vst.msk [vmem:[%s2319_s4 + $0xf0] sm:$0xff] %vm963_vm1, %v829_v9  ;;  %1026 = vst.msk [vmem:[%s2319_s4 + $0x1f0] sm:$0xff] %vm963_vm1, %v957_v12  ;;  %v832_v13 = vadd.f32 %v1993_v41, %v831_v52  ;;  %v960_v47 = vadd.f32 %v1993_v41, %v959_v0  ;;  %v833_v33 = vpop.f32.mrb[63].mxu0  ;;  %v961_v45 = vpop.f32.mrb[63].mxu1 }
 0x175   :  { %995 = vst.msk [vmem:[%s2319_s4 + $0xf8] sm:$0xff] %vm963_vm1, %v832_v13  ;;  %1027 = vst.msk [vmem:[%s2319_s4 + $0x1f8] sm:$0xff] %vm963_vm1, %v960_v47 }

</bundles_post_ra>
